<compile_context>
chip_gen: v7x
topology: tpu7x:2x2x1
jax: 0.10.0
libtpu: 0.0.40
codegen_flags: <defaults>
</compile_context>

<pallas_src>
import jax
import jax.numpy as jnp
from jax import lax
from jax.experimental import pallas as pl
from jax.experimental.pallas import tpu as pltpu


# ----------------------------------------------------------------------------
# Fused (optional 2x2 MaxPool) + DoubleConv (conv3x3+BN+ReLU twice) Pallas kernel
# ----------------------------------------------------------------------------
def _make_dc_kernel(H, W, Cin, Cmid, Cout, pool):
    """Kernel specialised for one layer (static shapes)."""
    P = W + 8                      # top halo rows (>= W+1; multiple of 8 when W is)
    R = P + (H + 1) * W + 8        # total rows of the flat padded scratch
    HW = H * W
    w_aligned = (W % 8 == 0)

    def kernel(x_ref, w1_ref, sc1_ref, sh1_ref, w2_ref, sc2_ref, sh2_ref,
               o_ref, pf1_ref, pf2_ref):
        # ---- stage 0: fused 2x2 max-pool (if any) + fill flat padded conv1 input ----
        if pool:
            x4 = x_ref[0]                                          # (2H, W, 2*Cin)
            wmax = jnp.maximum(x4[:, :, :Cin], x4[:, :, Cin:])     # max over W parity
            v = jnp.max(wmax.reshape(H, 2, W, Cin), axis=1)        # max over H parity -> (H, W, Cin)
            if w_aligned:
                # layout-preserving reshape + single aligned store
                pf1_ref[P:P + HW, :] = v.reshape(HW, Cin).astype(jnp.bfloat16)
            else:
                # only the tiny deep layers (W in {1,2,4} here): few small row stores
                for h in range(H):
                    pf1_ref[P + h * W:P + (h + 1) * W, :] = v[h].astype(jnp.bfloat16)
        else:
            # wrapper already presents the input flat as (H*W, Cin): one store
            pf1_ref[P:P + HW, :] = x_ref[0].astype(jnp.bfloat16)

        # zero only the halo rows -- the interior is fully overwritten every step
        pf1_ref[0:P, :] = jnp.zeros((P, Cin), jnp.bfloat16)
        pf1_ref[P + HW:R, :] = jnp.zeros((R - P - HW, Cin), jnp.bfloat16)

        # edge-column masks: the flat dx-shift wraps across rows at w==0 / w==W-1
        col = lax.broadcasted_iota(jnp.int32, (HW, 1), 0) % W
        not_left = col != 0
        not_right = col != (W - 1)

        def conv3x3(pf_ref, cc, w_ref):
            """3 matmuls (H*W, 3*cc) @ (3*cc, cn); dy taps collapsed into K."""
            parts = []
            for dx in range(3):
                wins = []
                for dy in range(3):
                    s = P + (dy - 1) * W + (dx - 1)
                    win = pf_ref[s:s + HW, :]                      # (HW, cc) bf16
                    if dx == 0:
                        win = jnp.where(not_left, win, jnp.zeros_like(win))
                    elif dx == 2:
                        win = jnp.where(not_right, win, jnp.zeros_like(win))
                    wins.append(win)
                im2col = jnp.concatenate(wins, axis=-1)            # (HW, 3*cc)
                parts.append(jnp.dot(im2col, w_ref[dx],
                                     preferred_element_type=jnp.float32))
            return parts[0] + parts[1] + parts[2]                  # (HW, cn) f32

        # ---- conv1 + folded BatchNorm(eval) + ReLU (Dropout == identity) ----
        a1 = conv3x3(pf1_ref, Cin, w1_ref)
        a1 = jnp.maximum(a1 * sc1_ref[...] + sh1_ref[...], 0.0)

        # conv2 flat padded input: result is already (HW, Cmid) -> single store
        pf2_ref[0:P, :] = jnp.zeros((P, Cmid), jnp.bfloat16)
        pf2_ref[P + HW:R, :] = jnp.zeros((R - P - HW, Cmid), jnp.bfloat16)
        pf2_ref[P:P + HW, :] = a1.astype(jnp.bfloat16)

        # ---- conv2 + folded BatchNorm(eval) + ReLU ----
        a2 = conv3x3(pf2_ref, Cmid, w2_ref)
        o_ref[0] = jnp.maximum(a2 * sc2_ref[...] + sh2_ref[...], 0.0)

    return kernel, R


def pallas_double_conv(x_nhwc, p, pool):
    """(optional MaxPool2d(2)) + DoubleConv, NHWC in / NHWC out."""
    N, Hin, Win, Cin = x_nhwc.shape
    if pool:
        assert Hin % 2 == 0 and Win % 2 == 0, "MaxPool2d(2) needs even spatial dims"
        H, W = Hin // 2, Win // 2
        # free reshape: fold W parity into lanes -> one contiguous input block
        xk = x_nhwc.reshape(N, Hin, W, 2 * Cin)
        x_spec = pl.BlockSpec((1, Hin, W, 2 * Cin), lambda n: (n, 0, 0, 0))
    else:
        H, W = Hin, Win
        xk = x_nhwc.reshape(N, H * W, Cin)            # free reshape
        x_spec = pl.BlockSpec((1, H * W, Cin), lambda n: (n, 0, 0))

    Cmid = p['w1'].shape[3]
    Cout = p['w2'].shape[3]
    # weights (3,3,ci,co) HWIO -> (dx, dy*ci, co), bf16 for the MXU
    w1k = jnp.transpose(p['w1'], (1, 0, 2, 3)).reshape(3, 3 * Cin, Cmid).astype(jnp.bfloat16)
    w2k = jnp.transpose(p['w2'], (1, 0, 2, 3)).reshape(3, 3 * Cmid, Cout).astype(jnp.bfloat16)

    kernel, R = _make_dc_kernel(H, W, Cin, Cmid, Cout, pool)

    def full(shape):
        return pl.BlockSpec(shape, lambda n, _s=shape: (0,) * len(_s))

    out = pl.pallas_call(
        kernel,
        out_shape=jax.ShapeDtypeStruct((N, H * W, Cout), jnp.float32),
        grid_spec=pltpu.PrefetchScalarGridSpec(
            num_scalar_prefetch=0,
            grid=(N,),
            in_specs=[x_spec,
                      full((3, 3 * Cin, Cmid)), full((1, Cmid)), full((1, Cmid)),
                      full((3, 3 * Cmid, Cout)), full((1, Cout)), full((1, Cout))],
            out_specs=pl.BlockSpec((1, H * W, Cout), lambda n: (n, 0, 0)),
            scratch_shapes=[pltpu.VMEM((R, Cin), jnp.bfloat16),
                            pltpu.VMEM((R, Cmid), jnp.bfloat16)],
        ),
        compiler_params=pltpu.CompilerParams(
            dimension_semantics=("parallel",),
            vmem_limit_bytes=48 * 1024 * 1024),
    )(xk, w1k, p['sc1'], p['sh1'], w2k, p['sc2'], p['sh2'])

    return out.reshape(N, H, W, Cout)


# ----------------------------------------------------------------------------
# OutConv (1x1 conv) Pallas kernel
# ----------------------------------------------------------------------------
def _outconv_kernel(x_ref, w_ref, b_ref, o_ref):
    o_ref[...] = jnp.dot(x_ref[...], w_ref[...],
                         preferred_element_type=jnp.float32) + b_ref[...]


def pallas_outconv(x_nhwc, p):
    N, H, W, C = x_nhwc.shape
    co = p['w'].shape[1]
    M = N * H * W
    out = pl.pallas_call(
        _outconv_kernel,
        out_shape=jax.ShapeDtypeStruct((M, co), jnp.float32),
        grid_spec=pltpu.PrefetchScalarGridSpec(
            num_scalar_prefetch=0,
            grid=(1,),
            in_specs=[pl.BlockSpec((M, C), lambda i: (0, 0)),
                      pl.BlockSpec((C, co), lambda i: (0, 0)),
                      pl.BlockSpec((1, co), lambda i: (0, 0))],
            out_specs=pl.BlockSpec((M, co), lambda i: (0, 0))),
        compiler_params=pltpu.CompilerParams(dimension_semantics=("arbitrary",)),
    )(x_nhwc.reshape(M, C), p['w'], p['b'])
    return out.reshape(N, H, W, co)


# ----------------------------------------------------------------------------
# XLA glue shared by the Pallas path and the reference (pure data movement)
# ----------------------------------------------------------------------------
def _bilinear_up2x_align_corners(x):
    """nn.Upsample(scale_factor=2, mode='bilinear', align_corners=True), NHWC."""
    N, H, W, C = x.shape

    def grid(n_in, n_out):
        if n_in == 1:
            lo = jnp.zeros((n_out,), jnp.int32)
            return lo, lo, jnp.zeros((n_out,), jnp.float32)
        pos = jnp.arange(n_out, dtype=jnp.float32) * (n_in - 1) / (n_out - 1)
        lo = jnp.clip(jnp.floor(pos).astype(jnp.int32), 0, n_in - 2)
        return lo, lo + 1, pos - lo.astype(jnp.float32)

    hlo, hhi, hf = grid(H, 2 * H)
    wlo, whi, wf = grid(W, 2 * W)
    xh = x[:, hlo] * (1 - hf)[None, :, None, None] + x[:, hhi] * hf[None, :, None, None]
    return (xh[:, :, wlo] * (1 - wf)[None, None, :, None]
            + xh[:, :, whi] * wf[None, None, :, None])


def _up_cat(x_small, x_skip):
    x1 = _bilinear_up2x_align_corners(x_small)
    dY = x_skip.shape[1] - x1.shape[1]
    dX = x_skip.shape[2] - x1.shape[2]
    x1 = jnp.pad(x1, ((0, 0), (dY // 2, dY - dY // 2), (dX // 2, dX - dX // 2), (0, 0)))
    return jnp.concatenate([x_skip, x1], axis=-1)      # torch.cat([x2, x1], dim=1)


def unet_forward(x_nhwc, params, double_conv, out_conv):
    x1 = double_conv(x_nhwc, params['inc'], pool=False)
    x2 = double_conv(x1, params['down1'], pool=True)
    x3 = double_conv(x2, params['down2'], pool=True)
    x4 = double_conv(x3, params['down3'], pool=True)
    x5 = double_conv(x4, params['down4'], pool=True)
    y = double_conv(_up_cat(x5, x4), params['up1'], pool=False)
    y = double_conv(_up_cat(y, x3), params['up2'], pool=False)
    y = double_conv(_up_cat(y, x2), params['up3'], pool=False)
    y = double_conv(_up_cat(y, x1), params['up4'], pool=False)
    return out_conv(y, params['outc'])


# ----------------------------------------------------------------------------
# Pure-JAX reference (same eval semantics, same bf16 MXU operands)
# ----------------------------------------------------------------------------
def ref_double_conv(x_nhwc, p, pool):
    x = x_nhwc
    if pool:
        N, Hin, Win, C = x.shape
        x = x.reshape(N, Hin // 2, 2, Win // 2, 2, C).max(axis=(2, 4))

    def block(h, w_hwio, sc, sh):
        co = w_hwio.shape[3]
        y = lax.conv_general_dilated(
            h.astype(jnp.bfloat16), w_hwio.astype(jnp.bfloat16),
            window_strides=(1, 1), padding='SAME',
            dimension_numbers=('NHWC', 'HWIO', 'NHWC'),
            preferred_element_type=jnp.float32)
        return jnp.maximum(y * sc.reshape(1, 1, 1, co) + sh.reshape(1, 1, 1, co), 0.0)

    h1 = block(x, p['w1'], p['sc1'], p['sh1'])
    return block(h1, p['w2'], p['sc2'], p['sh2'])


def ref_outconv(x_nhwc, p):
    N, H, W, C = x_nhwc.shape
    y = jnp.dot(x_nhwc.reshape(-1, C), p['w'], preferred_element_type=jnp.float32) + p['b']
    return y.reshape(N, H, W, -1)


# ----------------------------------------------------------------------------
# Parameter construction (eval-mode BN folded into scale/shift; conv bias folded)
# ----------------------------------------------------------------------------
def _init_double_conv(key, cin, cout, cmid=None, eps=1e-5):
    if cmid is None:
        cmid = cout
    k1, k2 = jax.random.split(key)

    def conv_bn(k, ci, co):
        kw, kb, kg, kB, km, kv = jax.random.split(k, 6)
        w = jax.random.normal(kw, (3, 3, ci, co), jnp.float32) / jnp.sqrt(9.0 * ci)
        b = 0.1 * jax.random.normal(kb, (co,), jnp.float32)
        gamma = 1.0 + 0.1 * jax.random.normal(kg, (co,), jnp.float32)
        beta = 0.1 * jax.random.normal(kB, (co,), jnp.float32)
        mean = 0.1 * jax.random.normal(km, (co,), jnp.float32)
        var = 1.0 + 0.1 * jax.random.uniform(kv, (co,), jnp.float32)
        scale = gamma * lax.rsqrt(var + eps)
        shift = (b - mean) * scale + beta          # conv bias folded into BN shift
        return w, scale.reshape(1, co), shift.reshape(1, co)

    w1, sc1, sh1 = conv_bn(k1, cin, cmid)
    w2, sc2, sh2 = conv_bn(k2, cmid, cout)
    return dict(w1=w1, sc1=sc1, sh1=sh1, w2=w2, sc2=sc2, sh2=sh2)


if __name__ == "__main__":
    N, IN_CH, OUT_CH, RES = 2, 4, 3, 16
    factor = 2  # bilinear=True

    key = jax.random.PRNGKey(0)
    kx, *ks = jax.random.split(key, 12)
    params = {
        'inc':   _init_double_conv(ks[0], IN_CH, 64),
        'down1': _init_double_conv(ks[1], 64, 128),
        'down2': _init_double_conv(ks[2], 128, 256),
        'down3': _init_double_conv(ks[3], 256, 512),
        'down4': _init_double_conv(ks[4], 512, 1024 // factor),
        'up1':   _init_double_conv(ks[5], 1024, 512 // factor, 512),
        'up2':   _init_double_conv(ks[6], 512, 256 // factor, 256),
        'up3':   _init_double_conv(ks[7], 256, 128 // factor, 128),
        'up4':   _init_double_conv(ks[8], 128, 64, 64),
        'outc':  dict(w=jax.random.normal(ks[9], (64, OUT_CH), jnp.float32) / 8.0,
                      b=0.1 * jax.random.normal(ks[10], (1, OUT_CH), jnp.float32)),
    }

    x_nchw = jax.random.normal(kx, (N, IN_CH, RES, RES), jnp.float32)
    x_nhwc = jnp.transpose(x_nchw, (0, 2, 3, 1))

    out = unet_forward(x_nhwc, params, pallas_double_conv, pallas_outconv)
    out_nchw = jax.block_until_ready(jnp.transpose(out, (0, 3, 1, 2)))

    ref = unet_forward(x_nhwc, params, ref_double_conv, ref_outconv)
    ref_nchw = jnp.transpose(ref, (0, 3, 1, 2))

    assert out_nchw.shape == (N, OUT_CH, RES, RES), out_nchw.shape
    err = float(jnp.max(jnp.abs(out_nchw - ref_nchw)))
    assert jnp.allclose(out_nchw, ref_nchw, atol=1e-2, rtol=1e-2), err
    print("KERNEL_OK")
</pallas_src>

<mosaic_0001>
module attributes {stable_mosaic.version = 11 : i64} {
  func.func @kernel(%arg0: i32, %arg1: memref<1x256x4xf32, #tpu.memory_space<vmem>>, %arg2: memref<3x12x64xbf16, #tpu.memory_space<vmem>>, %arg3: memref<1x64xf32, #tpu.memory_space<vmem>>, %arg4: memref<1x64xf32, #tpu.memory_space<vmem>>, %arg5: memref<3x192x64xbf16, #tpu.memory_space<vmem>>, %arg6: memref<1x64xf32, #tpu.memory_space<vmem>>, %arg7: memref<1x64xf32, #tpu.memory_space<vmem>>, %arg8: memref<1x256x64xf32, #tpu.memory_space<vmem>>, %arg9: memref<304x4xbf16, #tpu.memory_space<vmem>>, %arg10: memref<304x64xbf16, #tpu.memory_space<vmem>>) attributes {dimension_semantics = [#tpu.dimension_semantics<parallel>], iteration_bounds = array<i64: 2>, scalar_prefetch = 0 : i64, scratch_operands = 2 : i64, tpu.core_type = #tpu.core_type<tc>, window_params = [{transform_indices = @transform_0, window_bounds = array<i64: 1, 256, 4>}, {pipeline_mode = #tpu.pipeline_mode<synchronous>, transform_indices = @transform_1, window_bounds = array<i64: 3, 12, 64>}, {pipeline_mode = #tpu.pipeline_mode<synchronous>, transform_indices = @transform_2, window_bounds = array<i64: 1, 64>}, {pipeline_mode = #tpu.pipeline_mode<synchronous>, transform_indices = @transform_3, window_bounds = array<i64: 1, 64>}, {pipeline_mode = #tpu.pipeline_mode<synchronous>, transform_indices = @transform_4, window_bounds = array<i64: 3, 192, 64>}, {pipeline_mode = #tpu.pipeline_mode<synchronous>, transform_indices = @transform_5, window_bounds = array<i64: 1, 64>}, {pipeline_mode = #tpu.pipeline_mode<synchronous>, transform_indices = @transform_6, window_bounds = array<i64: 1, 64>}, {transform_indices = @transform_7, window_bounds = array<i64: 1, 256, 64>}]} {
    %c0 = arith.constant 0 : index
    %c0_0 = arith.constant 0 : index
    %c0_1 = arith.constant 0 : index
    %0 = vector.load %arg1[%c0, %c0_0, %c0_1] : memref<1x256x4xf32, #tpu.memory_space<vmem>>, vector<1x256x4xf32>
    %1 = vector.shape_cast %0 : vector<1x256x4xf32> to vector<256x4xf32>
    %2 = arith.truncf %1 : vector<256x4xf32> to vector<256x4xbf16>
    %c24 = arith.constant 24 : index
    %c0_2 = arith.constant 0 : index
    %3 = vector.load %arg9[%c24, %c0_2] : memref<304x4xbf16, #tpu.memory_space<vmem>>, vector<256x4xbf16>
    tpu.vector_store %arg9[%c24, %c0_2], %2 {strides = array<i32>} : memref<304x4xbf16, #tpu.memory_space<vmem>>, vector<256x4xbf16>,
    %cst = arith.constant 0.000000e+00 : bf16
    %4 = vector.broadcast %cst : bf16 to vector<24x4xbf16>
    %c0_3 = arith.constant 0 : index
    %c0_4 = arith.constant 0 : index
    %5 = vector.load %arg9[%c0_3, %c0_4] : memref<304x4xbf16, #tpu.memory_space<vmem>>, vector<24x4xbf16>
    tpu.vector_store %arg9[%c0_3, %c0_4], %4 {strides = array<i32>} : memref<304x4xbf16, #tpu.memory_space<vmem>>, vector<24x4xbf16>,
    %cst_5 = arith.constant 0.000000e+00 : bf16
    %6 = vector.broadcast %cst_5 : bf16 to vector<24x4xbf16>
    %c280 = arith.constant 280 : index
    %c0_6 = arith.constant 0 : index
    %7 = vector.load %arg9[%c280, %c0_6] : memref<304x4xbf16, #tpu.memory_space<vmem>>, vector<24x4xbf16>
    tpu.vector_store %arg9[%c280, %c0_6], %6 {strides = array<i32>} : memref<304x4xbf16, #tpu.memory_space<vmem>>, vector<24x4xbf16>,
    %8 = tpu.iota {dimensions = array<i32: 0>} : vector<256x1xi32>
    %c16_i32 = arith.constant 16 : i32
    %c0_i32 = arith.constant 0 : i32
    %9 = arith.cmpi eq, %c16_i32, %c0_i32 : i32
    %c1_i32 = arith.constant 1 : i32
    %10 = arith.select %9, %c1_i32, %c16_i32 : i32
    %11 = vector.broadcast %10 : i32 to vector<256x1xi32>
    %12 = arith.remsi %8, %11 : vector<256x1xi32>
    %c0_i32_7 = arith.constant 0 : i32
    %13 = vector.broadcast %c0_i32_7 : i32 to vector<256x1xi32>
    %14 = arith.cmpi ne, %12, %13 : vector<256x1xi32>
    %c0_i32_8 = arith.constant 0 : i32
    %15 = vector.broadcast %c0_i32_8 : i32 to vector<256x1xi32>
    %16 = arith.cmpi slt, %12, %15 : vector<256x1xi32>
    %c0_i32_9 = arith.constant 0 : i32
    %17 = arith.cmpi slt, %10, %c0_i32_9 : i32
    %18 = vector.broadcast %17 : i1 to vector<256x1xi1>
    %19 = vector.broadcast %18 : vector<256x1xi1> to vector<256x1xi1>
    %20 = arith.xori %16, %19 : vector<256x1xi1>
    %21 = arith.andi %20, %14 : vector<256x1xi1>
    %22 = vector.broadcast %10 : i32 to vector<256x1xi32>
    %23 = arith.addi %12, %22 : vector<256x1xi32>
    %24 = arith.select %21, %23, %12 : vector<256x1xi1>, vector<256x1xi32>
    %c0_i32_10 = arith.constant 0 : i32
    %25 = vector.broadcast %c0_i32_10 : i32 to vector<256x1xi32>
    %26 = arith.cmpi ne, %24, %25 : vector<256x1xi32>
    %c15_i32 = arith.constant 15 : i32
    %27 = vector.broadcast %c15_i32 : i32 to vector<256x1xi32>
    %28 = arith.cmpi ne, %24, %27 : vector<256x1xi32>
    %c7 = arith.constant 7 : index
    %c0_11 = arith.constant 0 : index
    %29 = vector.load %arg9[%c7, %c0_11] : memref<304x4xbf16, #tpu.memory_space<vmem>>, vector<256x4xbf16>
    %cst_12 = arith.constant 0.000000e+00 : bf16
    %30 = vector.broadcast %cst_12 : bf16 to vector<256x4xbf16>
    %31 = vector.shape_cast %26 : vector<256x1xi1> to vector<256x1xi1>
    %32 = vector.broadcast %31 : vector<256x1xi1> to vector<256x4xi1>
    %33 = arith.select %32, %29, %30 : vector<256x4xi1>, vector<256x4xbf16>
    %c23 = arith.constant 23 : index
    %c0_13 = arith.constant 0 : index
    %34 = vector.load %arg9[%c23, %c0_13] : memref<304x4xbf16, #tpu.memory_space<vmem>>, vector<256x4xbf16>
    %cst_14 = arith.constant 0.000000e+00 : bf16
    %35 = vector.broadcast %cst_14 : bf16 to vector<256x4xbf16>
    %36 = vector.shape_cast %26 : vector<256x1xi1> to vector<256x1xi1>
    %37 = vector.broadcast %36 : vector<256x1xi1> to vector<256x4xi1>
    %38 = arith.select %37, %34, %35 : vector<256x4xi1>, vector<256x4xbf16>
    %c39 = arith.constant 39 : index
    %c0_15 = arith.constant 0 : index
    %39 = vector.load %arg9[%c39, %c0_15] : memref<304x4xbf16, #tpu.memory_space<vmem>>, vector<256x4xbf16>
    %cst_16 = arith.constant 0.000000e+00 : bf16
    %40 = vector.broadcast %cst_16 : bf16 to vector<256x4xbf16>
    %41 = vector.shape_cast %26 : vector<256x1xi1> to vector<256x1xi1>
    %42 = vector.broadcast %41 : vector<256x1xi1> to vector<256x4xi1>
    %43 = arith.select %42, %39, %40 : vector<256x4xi1>, vector<256x4xbf16>
    %44 = tpu.concatenate %33, %38, %43 in 1 : vector<256x4xbf16>, vector<256x4xbf16>, vector<256x4xbf16> -> vector<256x12xbf16>
    %c0_17 = arith.constant 0 : index
    %c0_18 = arith.constant 0 : index
    %c0_19 = arith.constant 0 : index
    %45 = vector.load %arg2[%c0_17, %c0_18, %c0_19] : memref<3x12x64xbf16, #tpu.memory_space<vmem>>, vector<1x12x64xbf16>
    %46 = vector.shape_cast %45 : vector<1x12x64xbf16> to vector<12x64xbf16>
    %cst_20 = arith.constant dense<0.000000e+00> : vector<256x64xf32>
    %47 = tpu.matmul %44, %46, %cst_20 {dimension_numbers = #tpu.dot_dimension_numbers<[1], [0], [0], [1], [0, 0, 1, 1], [], []>} : vector<256x12xbf16>, vector<12x64xbf16>, vector<256x64xf32> -> vector<256x64xf32>
    %c8 = arith.constant 8 : index
    %c0_21 = arith.constant 0 : index
    %48 = vector.load %arg9[%c8, %c0_21] : memref<304x4xbf16, #tpu.memory_space<vmem>>, vector<256x4xbf16>
    %c24_22 = arith.constant 24 : index
    %c0_23 = arith.constant 0 : index
    %49 = vector.load %arg9[%c24_22, %c0_23] : memref<304x4xbf16, #tpu.memory_space<vmem>>, vector<256x4xbf16>
    %c40 = arith.constant 40 : index
    %c0_24 = arith.constant 0 : index
    %50 = vector.load %arg9[%c40, %c0_24] : memref<304x4xbf16, #tpu.memory_space<vmem>>, vector<256x4xbf16>
    %51 = tpu.concatenate %48, %49, %50 in 1 : vector<256x4xbf16>, vector<256x4xbf16>, vector<256x4xbf16> -> vector<256x12xbf16>
    %c1 = arith.constant 1 : index
    %c0_25 = arith.constant 0 : index
    %c0_26 = arith.constant 0 : index
    %52 = vector.load %arg2[%c1, %c0_25, %c0_26] : memref<3x12x64xbf16, #tpu.memory_space<vmem>>, vector<1x12x64xbf16>
    %53 = vector.shape_cast %52 : vector<1x12x64xbf16> to vector<12x64xbf16>
    %cst_27 = arith.constant dense<0.000000e+00> : vector<256x64xf32>
    %54 = tpu.matmul %51, %53, %cst_27 {dimension_numbers = #tpu.dot_dimension_numbers<[1], [0], [0], [1], [0, 0, 1, 1], [], []>} : vector<256x12xbf16>, vector<12x64xbf16>, vector<256x64xf32> -> vector<256x64xf32>
    %c9 = arith.constant 9 : index
    %c0_28 = arith.constant 0 : index
    %55 = vector.load %arg9[%c9, %c0_28] : memref<304x4xbf16, #tpu.memory_space<vmem>>, vector<256x4xbf16>
    %cst_29 = arith.constant 0.000000e+00 : bf16
    %56 = vector.broadcast %cst_29 : bf16 to vector<256x4xbf16>
    %57 = vector.shape_cast %28 : vector<256x1xi1> to vector<256x1xi1>
    %58 = vector.broadcast %57 : vector<256x1xi1> to vector<256x4xi1>
    %59 = arith.select %58, %55, %56 : vector<256x4xi1>, vector<256x4xbf16>
    %c25 = arith.constant 25 : index
    %c0_30 = arith.constant 0 : index
    %60 = vector.load %arg9[%c25, %c0_30] : memref<304x4xbf16, #tpu.memory_space<vmem>>, vector<256x4xbf16>
    %cst_31 = arith.constant 0.000000e+00 : bf16
    %61 = vector.broadcast %cst_31 : bf16 to vector<256x4xbf16>
    %62 = vector.shape_cast %28 : vector<256x1xi1> to vector<256x1xi1>
    %63 = vector.broadcast %62 : vector<256x1xi1> to vector<256x4xi1>
    %64 = arith.select %63, %60, %61 : vector<256x4xi1>, vector<256x4xbf16>
    %c41 = arith.constant 41 : index
    %c0_32 = arith.constant 0 : index
    %65 = vector.load %arg9[%c41, %c0_32] : memref<304x4xbf16, #tpu.memory_space<vmem>>, vector<256x4xbf16>
    %cst_33 = arith.constant 0.000000e+00 : bf16
    %66 = vector.broadcast %cst_33 : bf16 to vector<256x4xbf16>
    %67 = vector.shape_cast %28 : vector<256x1xi1> to vector<256x1xi1>
    %68 = vector.broadcast %67 : vector<256x1xi1> to vector<256x4xi1>
    %69 = arith.select %68, %65, %66 : vector<256x4xi1>, vector<256x4xbf16>
    %70 = tpu.concatenate %59, %64, %69 in 1 : vector<256x4xbf16>, vector<256x4xbf16>, vector<256x4xbf16> -> vector<256x12xbf16>
    %c2 = arith.constant 2 : index
    %c0_34 = arith.constant 0 : index
    %c0_35 = arith.constant 0 : index
    %71 = vector.load %arg2[%c2, %c0_34, %c0_35] : memref<3x12x64xbf16, #tpu.memory_space<vmem>>, vector<1x12x64xbf16>
    %72 = vector.shape_cast %71 : vector<1x12x64xbf16> to vector<12x64xbf16>
    %cst_36 = arith.constant dense<0.000000e+00> : vector<256x64xf32>
    %73 = tpu.matmul %70, %72, %cst_36 {dimension_numbers = #tpu.dot_dimension_numbers<[1], [0], [0], [1], [0, 0, 1, 1], [], []>} : vector<256x12xbf16>, vector<12x64xbf16>, vector<256x64xf32> -> vector<256x64xf32>
    %74 = arith.addf %47, %54 : vector<256x64xf32>
    %75 = arith.addf %74, %73 : vector<256x64xf32>
    %c0_37 = arith.constant 0 : index
    %c0_38 = arith.constant 0 : index
    %76 = vector.load %arg3[%c0_37, %c0_38] : memref<1x64xf32, #tpu.memory_space<vmem>>, vector<1x64xf32>
    %77 = vector.broadcast %76 : vector<1x64xf32> to vector<256x64xf32>
    %78 = arith.mulf %75, %77 : vector<256x64xf32>
    %c0_39 = arith.constant 0 : index
    %c0_40 = arith.constant 0 : index
    %79 = vector.load %arg4[%c0_39, %c0_40] : memref<1x64xf32, #tpu.memory_space<vmem>>, vector<1x64xf32>
    %80 = vector.broadcast %79 : vector<1x64xf32> to vector<256x64xf32>
    %81 = arith.addf %78, %80 : vector<256x64xf32>
    %cst_41 = arith.constant 0.000000e+00 : f32
    %82 = vector.broadcast %cst_41 : f32 to vector<256x64xf32>
    %83 = arith.maximumf %81, %82 : vector<256x64xf32>
    %cst_42 = arith.constant 0.000000e+00 : bf16
    %84 = vector.broadcast %cst_42 : bf16 to vector<24x64xbf16>
    %c0_43 = arith.constant 0 : index
    %c0_44 = arith.constant 0 : index
    %85 = vector.load %arg10[%c0_43, %c0_44] : memref<304x64xbf16, #tpu.memory_space<vmem>>, vector<24x64xbf16>
    tpu.vector_store %arg10[%c0_43, %c0_44], %84 {strides = array<i32>} : memref<304x64xbf16, #tpu.memory_space<vmem>>, vector<24x64xbf16>,
    %cst_45 = arith.constant 0.000000e+00 : bf16
    %86 = vector.broadcast %cst_45 : bf16 to vector<24x64xbf16>
    %c280_46 = arith.constant 280 : index
    %c0_47 = arith.constant 0 : index
    %87 = vector.load %arg10[%c280_46, %c0_47] : memref<304x64xbf16, #tpu.memory_space<vmem>>, vector<24x64xbf16>
    tpu.vector_store %arg10[%c280_46, %c0_47], %86 {strides = array<i32>} : memref<304x64xbf16, #tpu.memory_space<vmem>>, vector<24x64xbf16>,
    %88 = arith.truncf %83 : vector<256x64xf32> to vector<256x64xbf16>
    %c24_48 = arith.constant 24 : index
    %c0_49 = arith.constant 0 : index
    %89 = vector.load %arg10[%c24_48, %c0_49] : memref<304x64xbf16, #tpu.memory_space<vmem>>, vector<256x64xbf16>
    tpu.vector_store %arg10[%c24_48, %c0_49], %88 {strides = array<i32>} : memref<304x64xbf16, #tpu.memory_space<vmem>>, vector<256x64xbf16>,
    %c7_50 = arith.constant 7 : index
    %c0_51 = arith.constant 0 : index
    %90 = vector.load %arg10[%c7_50, %c0_51] : memref<304x64xbf16, #tpu.memory_space<vmem>>, vector<256x64xbf16>
    %cst_52 = arith.constant 0.000000e+00 : bf16
    %91 = vector.broadcast %cst_52 : bf16 to vector<256x64xbf16>
    %92 = vector.shape_cast %26 : vector<256x1xi1> to vector<256x1xi1>
    %93 = vector.broadcast %92 : vector<256x1xi1> to vector<256x64xi1>
    %94 = arith.select %93, %90, %91 : vector<256x64xi1>, vector<256x64xbf16>
    %c23_53 = arith.constant 23 : index
    %c0_54 = arith.constant 0 : index
    %95 = vector.load %arg10[%c23_53, %c0_54] : memref<304x64xbf16, #tpu.memory_space<vmem>>, vector<256x64xbf16>
    %cst_55 = arith.constant 0.000000e+00 : bf16
    %96 = vector.broadcast %cst_55 : bf16 to vector<256x64xbf16>
    %97 = vector.shape_cast %26 : vector<256x1xi1> to vector<256x1xi1>
    %98 = vector.broadcast %97 : vector<256x1xi1> to vector<256x64xi1>
    %99 = arith.select %98, %95, %96 : vector<256x64xi1>, vector<256x64xbf16>
    %c39_56 = arith.constant 39 : index
    %c0_57 = arith.constant 0 : index
    %100 = vector.load %arg10[%c39_56, %c0_57] : memref<304x64xbf16, #tpu.memory_space<vmem>>, vector<256x64xbf16>
    %cst_58 = arith.constant 0.000000e+00 : bf16
    %101 = vector.broadcast %cst_58 : bf16 to vector<256x64xbf16>
    %102 = vector.shape_cast %26 : vector<256x1xi1> to vector<256x1xi1>
    %103 = vector.broadcast %102 : vector<256x1xi1> to vector<256x64xi1>
    %104 = arith.select %103, %100, %101 : vector<256x64xi1>, vector<256x64xbf16>
    %105 = tpu.concatenate %94, %99, %104 in 1 : vector<256x64xbf16>, vector<256x64xbf16>, vector<256x64xbf16> -> vector<256x192xbf16>
    %c0_59 = arith.constant 0 : index
    %c0_60 = arith.constant 0 : index
    %c0_61 = arith.constant 0 : index
    %106 = vector.load %arg5[%c0_59, %c0_60, %c0_61] : memref<3x192x64xbf16, #tpu.memory_space<vmem>>, vector<1x192x64xbf16>
    %107 = vector.shape_cast %106 : vector<1x192x64xbf16> to vector<192x64xbf16>
    %cst_62 = arith.constant dense<0.000000e+00> : vector<256x64xf32>
    %108 = tpu.matmul %105, %107, %cst_62 {dimension_numbers = #tpu.dot_dimension_numbers<[1], [0], [0], [1], [0, 0, 1, 1], [], []>} : vector<256x192xbf16>, vector<192x64xbf16>, vector<256x64xf32> -> vector<256x64xf32>
    %c8_63 = arith.constant 8 : index
    %c0_64 = arith.constant 0 : index
    %109 = vector.load %arg10[%c8_63, %c0_64] : memref<304x64xbf16, #tpu.memory_space<vmem>>, vector<256x64xbf16>
    %c24_65 = arith.constant 24 : index
    %c0_66 = arith.constant 0 : index
    %110 = vector.load %arg10[%c24_65, %c0_66] : memref<304x64xbf16, #tpu.memory_space<vmem>>, vector<256x64xbf16>
    %c40_67 = arith.constant 40 : index
    %c0_68 = arith.constant 0 : index
    %111 = vector.load %arg10[%c40_67, %c0_68] : memref<304x64xbf16, #tpu.memory_space<vmem>>, vector<256x64xbf16>
    %112 = tpu.concatenate %109, %110, %111 in 1 : vector<256x64xbf16>, vector<256x64xbf16>, vector<256x64xbf16> -> vector<256x192xbf16>
    %c1_69 = arith.constant 1 : index
    %c0_70 = arith.constant 0 : index
    %c0_71 = arith.constant 0 : index
    %113 = vector.load %arg5[%c1_69, %c0_70, %c0_71] : memref<3x192x64xbf16, #tpu.memory_space<vmem>>, vector<1x192x64xbf16>
    %114 = vector.shape_cast %113 : vector<1x192x64xbf16> to vector<192x64xbf16>
    %cst_72 = arith.constant dense<0.000000e+00> : vector<256x64xf32>
    %115 = tpu.matmul %112, %114, %cst_72 {dimension_numbers = #tpu.dot_dimension_numbers<[1], [0], [0], [1], [0, 0, 1, 1], [], []>} : vector<256x192xbf16>, vector<192x64xbf16>, vector<256x64xf32> -> vector<256x64xf32>
    %c9_73 = arith.constant 9 : index
    %c0_74 = arith.constant 0 : index
    %116 = vector.load %arg10[%c9_73, %c0_74] : memref<304x64xbf16, #tpu.memory_space<vmem>>, vector<256x64xbf16>
    %cst_75 = arith.constant 0.000000e+00 : bf16
    %117 = vector.broadcast %cst_75 : bf16 to vector<256x64xbf16>
    %118 = vector.shape_cast %28 : vector<256x1xi1> to vector<256x1xi1>
    %119 = vector.broadcast %118 : vector<256x1xi1> to vector<256x64xi1>
    %120 = arith.select %119, %116, %117 : vector<256x64xi1>, vector<256x64xbf16>
    %c25_76 = arith.constant 25 : index
    %c0_77 = arith.constant 0 : index
    %121 = vector.load %arg10[%c25_76, %c0_77] : memref<304x64xbf16, #tpu.memory_space<vmem>>, vector<256x64xbf16>
    %cst_78 = arith.constant 0.000000e+00 : bf16
    %122 = vector.broadcast %cst_78 : bf16 to vector<256x64xbf16>
    %123 = vector.shape_cast %28 : vector<256x1xi1> to vector<256x1xi1>
    %124 = vector.broadcast %123 : vector<256x1xi1> to vector<256x64xi1>
    %125 = arith.select %124, %121, %122 : vector<256x64xi1>, vector<256x64xbf16>
    %c41_79 = arith.constant 41 : index
    %c0_80 = arith.constant 0 : index
    %126 = vector.load %arg10[%c41_79, %c0_80] : memref<304x64xbf16, #tpu.memory_space<vmem>>, vector<256x64xbf16>
    %cst_81 = arith.constant 0.000000e+00 : bf16
    %127 = vector.broadcast %cst_81 : bf16 to vector<256x64xbf16>
    %128 = vector.shape_cast %28 : vector<256x1xi1> to vector<256x1xi1>
    %129 = vector.broadcast %128 : vector<256x1xi1> to vector<256x64xi1>
    %130 = arith.select %129, %126, %127 : vector<256x64xi1>, vector<256x64xbf16>
    %131 = tpu.concatenate %120, %125, %130 in 1 : vector<256x64xbf16>, vector<256x64xbf16>, vector<256x64xbf16> -> vector<256x192xbf16>
    %c2_82 = arith.constant 2 : index
    %c0_83 = arith.constant 0 : index
    %c0_84 = arith.constant 0 : index
    %132 = vector.load %arg5[%c2_82, %c0_83, %c0_84] : memref<3x192x64xbf16, #tpu.memory_space<vmem>>, vector<1x192x64xbf16>
    %133 = vector.shape_cast %132 : vector<1x192x64xbf16> to vector<192x64xbf16>
    %cst_85 = arith.constant dense<0.000000e+00> : vector<256x64xf32>
    %134 = tpu.matmul %131, %133, %cst_85 {dimension_numbers = #tpu.dot_dimension_numbers<[1], [0], [0], [1], [0, 0, 1, 1], [], []>} : vector<256x192xbf16>, vector<192x64xbf16>, vector<256x64xf32> -> vector<256x64xf32>
    %135 = arith.addf %108, %115 : vector<256x64xf32>
    %136 = arith.addf %135, %134 : vector<256x64xf32>
    %c0_86 = arith.constant 0 : index
    %c0_87 = arith.constant 0 : index
    %137 = vector.load %arg6[%c0_86, %c0_87] : memref<1x64xf32, #tpu.memory_space<vmem>>, vector<1x64xf32>
    %138 = vector.broadcast %137 : vector<1x64xf32> to vector<256x64xf32>
    %139 = arith.mulf %136, %138 : vector<256x64xf32>
    %c0_88 = arith.constant 0 : index
    %c0_89 = arith.constant 0 : index
    %140 = vector.load %arg7[%c0_88, %c0_89] : memref<1x64xf32, #tpu.memory_space<vmem>>, vector<1x64xf32>
    %141 = vector.broadcast %140 : vector<1x64xf32> to vector<256x64xf32>
    %142 = arith.addf %139, %141 : vector<256x64xf32>
    %cst_90 = arith.constant 0.000000e+00 : f32
    %143 = vector.broadcast %cst_90 : f32 to vector<256x64xf32>
    %144 = arith.maximumf %142, %143 : vector<256x64xf32>
    %c0_91 = arith.constant 0 : index
    %c0_92 = arith.constant 0 : index
    %c0_93 = arith.constant 0 : index
    %145 = vector.load %arg8[%c0_91, %c0_92, %c0_93] : memref<1x256x64xf32, #tpu.memory_space<vmem>>, vector<1x256x64xf32>
    %146 = vector.shape_cast %145 : vector<1x256x64xf32> to vector<256x64xf32>
    %147 = vector.shape_cast %144 : vector<256x64xf32> to vector<1x256x64xf32>
    tpu.vector_store %arg8[%c0_91, %c0_92, %c0_93], %147 {strides = array<i32>} : memref<1x256x64xf32, #tpu.memory_space<vmem>>, vector<1x256x64xf32>,
    return
  }
  func.func @transform_0(%arg0: i32) -> (i32, i32, i32) {
    %c0_i32 = arith.constant 0 : i32
    %c0_i32_0 = arith.constant 0 : i32
    %c0_i32_1 = arith.constant 0 : i32
    return %arg0, %c0_i32, %c0_i32_0 : i32, i32, i32
  }
  func.func @transform_1(%arg0: i32) -> (i32, i32, i32) {
    %c0_i32 = arith.constant 0 : i32
    %c0_i32_0 = arith.constant 0 : i32
    %c0_i32_1 = arith.constant 0 : i32
    %c0_i32_2 = arith.constant 0 : i32
    return %c0_i32, %c0_i32_0, %c0_i32_1 : i32, i32, i32
  }
  func.func @transform_2(%arg0: i32) -> (i32, i32) {
    %c0_i32 = arith.constant 0 : i32
    %c0_i32_0 = arith.constant 0 : i32
    %c0_i32_1 = arith.constant 0 : i32
    return %c0_i32, %c0_i32_0 : i32, i32
  }
  func.func @transform_3(%arg0: i32) -> (i32, i32) {
    %c0_i32 = arith.constant 0 : i32
    %c0_i32_0 = arith.constant 0 : i32
    %c0_i32_1 = arith.constant 0 : i32
    return %c0_i32, %c0_i32_0 : i32, i32
  }
  func.func @transform_4(%arg0: i32) -> (i32, i32, i32) {
    %c0_i32 = arith.constant 0 : i32
    %c0_i32_0 = arith.constant 0 : i32
    %c0_i32_1 = arith.constant 0 : i32
    %c0_i32_2 = arith.constant 0 : i32
    return %c0_i32, %c0_i32_0, %c0_i32_1 : i32, i32, i32
  }
  func.func @transform_5(%arg0: i32) -> (i32, i32) {
    %c0_i32 = arith.constant 0 : i32
    %c0_i32_0 = arith.constant 0 : i32
    %c0_i32_1 = arith.constant 0 : i32
    return %c0_i32, %c0_i32_0 : i32, i32
  }
  func.func @transform_6(%arg0: i32) -> (i32, i32) {
    %c0_i32 = arith.constant 0 : i32
    %c0_i32_0 = arith.constant 0 : i32
    %c0_i32_1 = arith.constant 0 : i32
    return %c0_i32, %c0_i32_0 : i32, i32
  }
  func.func @transform_7(%arg0: i32) -> (i32, i32, i32) {
    %c0_i32 = arith.constant 0 : i32
    %c0_i32_0 = arith.constant 0 : i32
    %c0_i32_1 = arith.constant 0 : i32
    return %arg0, %c0_i32, %c0_i32_0 : i32, i32, i32
  }
}

</mosaic_0001>

<bundles_post_ra>
// kernel: tpu_custom_call.1
= control target key start
LH: loop header
LB: loop body
LE: loop exit
PB: predicated region body
PF: predicated region fallthrough
CT: control target
= control target key end

     0   :  { %s6502_s24 = smov 0   ;;  %s9240_s0 = inlined_call_operand.vmem [shape: f32[2,256,4], index: 0, kind: input, shape index: {}]   ;;  %s9241_s1 = inlined_call_operand.vmem [shape: bf16[3,12,64], index: 1, kind: input, shape index: {}]   ;;  %s9242_s2 = inlined_call_operand.vmem [shape: f32[1,64], index: 2, kind: input, shape index: {}]   ;;  %s9243_s3 = inlined_call_operand.vmem [shape: f32[1,64], index: 3, kind: input, shape index: {}]   ;;  %s9244_s4 = inlined_call_operand.vmem [shape: bf16[3,192,64], index: 4, kind: input, shape index: {}]   ;;  %s9245_s5 = inlined_call_operand.vmem [shape: f32[1,64], index: 5, kind: input, shape index: {}]   ;;  %s9246_s6 = inlined_call_operand.vmem [shape: f32[1,64], index: 6, kind: input, shape index: {}]   ;;  %s9247_s7 = inlined_call_operand.vmem [shape: f32[2,256,64], index: 7, kind: output, shape index: {}]  }
   0x1 LB: > { %s5771_s25 = sadd.s32 4294967295, %s6455_s24   ;;  %p5775_p0 = scmp.ge.s32.totalorder %s6455_s24, 1  ;;  %s6455_s24 = sphi %s6502_s24, %s17_s24  }
   0x2   : > { %p237_p1 = scmp.lt.s32.totalorder %s6455_s24, 3 }
   0x4   : > { %p238_p2 = pnand %p5775_p0, %p237_p1 }
   0x6   : > { %241 = sbr.rel (%p238_p2) target bundleno = 1134 (0x46e), region = 48 }
   0xd   : > { %p269_p3 = scmp.lt.s32.totalorder %s5771_s25, 1  ;;  %vm395_vm0 = vcmask 31748   ;;  %vm397_vm1 = vcmask 31744   ;;  %v9266_v0 = vmov 0   ;;  %vm413_vm2 = vcmask 27648   ;;  %s6458_s30 = smov 4  }
   0xe   : > { %415 = vst.msk [vmem:[#allocation2] sm:$0xff] %vm397_vm1, %v9266_v0  ;;  %418 = vst.msk [vmem:[#allocation2 + $0x90] sm:$0xff] %vm397_vm1, %v9266_v0  ;;  %4032 = vmatprep.subr.bf16.mxu1 %v9266_v0  ;;  %vm9287_vm3 = vcmask 1043456   ;;  %s6459_s8 = smov 8   ;;  %vm6460_vm6 = vmmov 1   ;;  %vm9273_vm12 = vcmask 1045504  }
   0xf   : > { %417 = vst.msk [vmem:[#allocation2 + $0x88] sm:$0xf0] %vm395_vm0, %v9266_v0  ;;  %s9646_s25 = smov (!%p269_p3, %s5771_s25), 1  ;;  %vm982_vm7 = vmpackc.low %vm6460_vm6, %vm6460_vm6  ;;  %s6461_s23 = smov 64  }
  0x10   : > { %416 = vst.msk [vmem:[#allocation2 + $0x8] sm:$0xf] %vm413_vm2, %v9266_v0  ;;  %s6005_s26 = sshll.u32 %s9646_s25, 8 }
  0x11   : > { %s6527_s29 = scalar_lea.vmem %s9240_s0, %s6005_s26  ;;  %s9056_s22 = scalar_lea.vmem %s9247_s7, %s6005_s26 }
  0x12   : > { %v282_v1 = vld [vmem:[%s6527_s29] sm:$0xff]  ;;  %v283_v2 = vld [vmem:[%s6527_s29 + $0x8] sm:$0xff]  ;;  %v284_v3 = vld [vmem:[%s6527_s29 + $0x10] sm:$0xff] }
  0x13   : > { %v285_v4 = vld [vmem:[%s6527_s29 + $0x18] sm:$0xff]  ;;  %v286_v5 = vld [vmem:[%s6527_s29 + $0x20] sm:$0xff]  ;;  %v287_v6 = vld [vmem:[%s6527_s29 + $0x28] sm:$0xff]  ;;  %v314_v7 = vpack.c.bf16 %v283_v2, %v282_v1 }
  0x14   : > { %v315_v8 = vpack.c.bf16 %v285_v4, %v284_v3  ;;  %v316_v9 = vpack.c.bf16 %v287_v6, %v286_v5  ;;  %v288_v10 = vld [vmem:[%s6527_s29 + $0x30] sm:$0xff]  ;;  %v289_v11 = vld [vmem:[%s6527_s29 + $0x38] sm:$0xff]  ;;  %v290_v12 = vld [vmem:[%s6527_s29 + $0x40] sm:$0xff] }
  0x15   : > { %v347_v13 = vrot.slane %v314_v7, 4  ;;  %v317_v14 = vpack.c.bf16 %v289_v11, %v288_v10  ;;  %v291_v15 = vld [vmem:[%s6527_s29 + $0x48] sm:$0xff]  ;;  %v292_v16 = vld [vmem:[%s6527_s29 + $0x50] sm:$0xff]  ;;  %v293_v17 = vld [vmem:[%s6527_s29 + $0x58] sm:$0xff] }
  0x16   : > { %v348_v18 = vrot.slane %v315_v8, 4  ;;  %v350_v19 = vrot.slane %v316_v9, 4  ;;  %v318_v20 = vpack.c.bf16 %v291_v15, %v290_v12  ;;  %v319_v21 = vpack.c.bf16 %v293_v17, %v292_v16  ;;  %v294_v22 = vld [vmem:[%s6527_s29 + $0x60] sm:$0xff]  ;;  %v295_v23 = vld [vmem:[%s6527_s29 + $0x68] sm:$0xff]  ;;  %v296_v26 = vld [vmem:[%s6527_s29 + $0x70] sm:$0xff] }
  0x17   : > { %396 = vst.msk [vmem:[#allocation2 + $0x8] sm:$0xf0] %vm395_vm0, %v347_v13  ;;  %v352_v24 = vrot.slane %v317_v14, 4  ;;  %v320_v25 = vpack.c.bf16 %v295_v23, %v294_v22  ;;  %v297_v27 = vld [vmem:[%s6527_s29 + $0x78] sm:$0xff]  ;;  %v298_v28 = vld [vmem:[%s6527_s29 + $0x80] sm:$0xff]  ;;  %v299_v32 = vld [vmem:[%s6527_s29 + $0x88] sm:$0xff] }
  0x18   : > { %v351_v29 = vsel %vm9287_vm3, %v348_v18, %v350_v19  ;;  %v349_v30 = vsel %vm9287_vm3, %v347_v13, %v348_v18  ;;  %v354_v31 = vrot.slane %v318_v20, 4  ;;  %v300_v33 = vld [vmem:[%s6527_s29 + $0x90] sm:$0xff]  ;;  %v301_v34 = vld [vmem:[%s6527_s29 + $0x98] sm:$0xff]  ;;  %v356_v36 = vrot.slane %v319_v21, 4  ;;  %v302_v39 = vld [vmem:[%s6527_s29 + $0xa0] sm:$0xff] }
  0x19   : > { %399 = vst.msk [vmem:[#allocation2 + $0x18] sm:$0xff] %vm397_vm1, %v351_v29  ;;  %398 = vst.msk [vmem:[#allocation2 + $0x10] sm:$0xff] %vm397_vm1, %v349_v30  ;;  %v353_v35 = vsel %vm9287_vm3, %v350_v19, %v352_v24  ;;  %v358_v37 = vrot.slane %v320_v25, 4  ;;  %v321_v38 = vpack.c.bf16 %v297_v27, %v296_v26  ;;  %v303_v40 = vld [vmem:[%s6527_s29 + $0xa8] sm:$0xff]  ;;  %v304_v41 = vld [vmem:[%s6527_s29 + $0xb0] sm:$0xff]  ;;  %v322_v43 = vpack.c.bf16 %v299_v32, %v298_v28 }
  0x1a   : > { %400 = vst.msk [vmem:[#allocation2 + $0x20] sm:$0xff] %vm397_vm1, %v353_v35  ;;  %v355_v42 = vsel %vm9287_vm3, %v352_v24, %v354_v31  ;;  %v305_v44 = vld [vmem:[%s6527_s29 + $0xb8] sm:$0xff]  ;;  %v306_v45 = vld [vmem:[%s6527_s29 + $0xc0] sm:$0xff]  ;;  %v307_v46 = vld [vmem:[%s6527_s29 + $0xc8] sm:$0xff]  ;;  %v357_v47 = vsel %vm9287_vm3, %v354_v31, %v356_v36  ;;  %v323_v50 = vpack.c.bf16 %v301_v34, %v300_v33  ;;  %v324_v54 = vpack.c.bf16 %v303_v40, %v302_v39 }
  0x1b   : > { %401 = vst.msk [vmem:[#allocation2 + $0x28] sm:$0xff] %vm397_vm1, %v355_v42  ;;  %v359_v48 = vsel %vm9287_vm3, %v356_v36, %v358_v37  ;;  %v360_v49 = vrot.slane %v321_v38, 4  ;;  %v308_v51 = vld [vmem:[%s6527_s29 + $0xd0] sm:$0xff]  ;;  %v309_v52 = vld [vmem:[%s6527_s29 + $0xd8] sm:$0xff]  ;;  %402 = vst.msk [vmem:[#allocation2 + $0x30] sm:$0xff] %vm397_vm1, %v357_v47  ;;  %v362_v53 = vrot.slane %v322_v43, 4  ;;  %v325_v59 = vpack.c.bf16 %v305_v44, %v304_v41 }
  0x1c   : > { %403 = vst.msk [vmem:[#allocation2 + $0x38] sm:$0xff] %vm397_vm1, %v359_v48  ;;  %v310_v55 = vld [vmem:[%s6527_s29 + $0xe0] sm:$0xff]  ;;  %v311_v56 = vld [vmem:[%s6527_s29 + $0xe8] sm:$0xff]  ;;  %v364_v58 = vrot.slane %v323_v50, 4  ;;  %v326_v60 = vpack.c.bf16 %v307_v46, %v306_v45  ;;  %v312_v61 = vld [vmem:[%s6527_s29 + $0xf0] sm:$0xff]  ;;  %v366_v2 = vrot.slane %v324_v54, 4  ;;  %v327_v3 = vpack.c.bf16 %v309_v52, %v308_v51 }
  0x1d   : > { %v361_v57 = vsel %vm9287_vm3, %v358_v37, %v360_v49  ;;  %v313_v62 = vld [vmem:[%s6527_s29 + $0xf8] sm:$0xff]  ;;  %v363_v1 = vsel %vm9287_vm3, %v360_v49, %v362_v53  ;;  %v368_v5 = vrot.slane %v325_v59, 4  ;;  %v328_v7 = vpack.c.bf16 %v311_v56, %v310_v55  ;;  %v6362_v43 = vld [vmem:[%s9241_s1 + $0x8] sm:$0x3f]   ;;  %v6700_v48 = vld [vmem:[%s9241_s1 + $0x10] sm:$0x3f]  }
  0x1e   : > { %v6575_v63 = vld [vmem:[#allocation2 + $0x8] sm:$0xf0]  ;;  %404 = vst.msk [vmem:[#allocation2 + $0x40] sm:$0xff] %vm397_vm1, %v361_v57  ;;  %405 = vst.msk [vmem:[#allocation2 + $0x48] sm:$0xff] %vm397_vm1, %v363_v1  ;;  %v365_v4 = vsel %vm9287_vm3, %v362_v53, %v364_v58  ;;  %v370_v6 = vrot.slane %v326_v60, 4  ;;  %v367_v10 = vsel %vm9287_vm3, %v364_v58, %v366_v2  ;;  %v372_v11 = vrot.slane %v327_v3, 4  ;;  %6346 = vmatprep.subr.msk.bf16.mxu0 %vm9273_vm12, %v6362_v43 }
  0x1f   : > { %1521 = vrot.lane.b32.xlu0 %v6575_v63, %s6458_s30  ;;  %406 = vst.msk [vmem:[#allocation2 + $0x50] sm:$0xff] %vm397_vm1, %v365_v4  ;;  %v329_v12 = vpack.c.bf16 %v313_v62, %v312_v61  ;;  %407 = vst.msk [vmem:[#allocation2 + $0x58] sm:$0xff] %vm397_vm1, %v367_v10  ;;  %v369_v13 = vsel %vm9287_vm3, %v366_v2, %v368_v5  ;;  %v374_v15 = vrot.slane %v328_v7, 4  ;;  %v419_v24 = vlaneseq  ;;  %v1293_v61 = vld [vmem:[#allocation2 + $0x90] sm:$0xf] }
  0x20   : > { %v6583_v8 = vld [vmem:[#allocation2 + $0x18] sm:$0xff]  ;;  %v6585_v9 = vld [vmem:[#allocation2 + $0x10] sm:$0xff]  ;;  %v371_v14 = vsel %vm9287_vm3, %v368_v5, %v370_v6  ;;  %408 = vst.msk [vmem:[#allocation2 + $0x60] sm:$0xff] %vm397_vm1, %v369_v13  ;;  %v373_v17 = vsel %vm9287_vm3, %v370_v6, %v372_v11  ;;  %v6686_v44 = vsel %vm982_vm7, 65537, %v9266_v0  ;;  %v1786_v56 = vsel %vm9273_vm12, %v6362_v43, 0 }
  0x21   : > { %1525 = vrot.lane.b32.xlu1 %v6583_v8, %s6458_s30  ;;  %v6594_v16 = vld [vmem:[#allocation2 + $0x10] sm:$0xf0]  ;;  %409 = vst.msk [vmem:[#allocation2 + $0x68] sm:$0xff] %vm397_vm1, %v371_v14  ;;  %v376_v18 = vrot.slane %v329_v12, 4  ;;  %410 = vst.msk [vmem:[#allocation2 + $0x70] sm:$0xff] %vm397_vm1, %v373_v17  ;;  %v375_v19 = vsel %vm9287_vm3, %v372_v11, %v374_v15  ;;  %v6609_v21 = vld [vmem:[#allocation2 + $0x20] sm:$0xff]  ;;  %6059 = vmatpush3.bf16.msra.mxu0 %v1786_v56 }
  0x22   : > { %411 = vst.msk [vmem:[#allocation2 + $0x78] sm:$0xff] %vm397_vm1, %v375_v19  ;;  %v6615_v22 = vld [vmem:[#allocation2 + $0x28] sm:$0xff]  ;;  %v6621_v23 = vld [vmem:[#allocation2 + $0x30] sm:$0xff]  ;;  %v6631_v26 = vshrl.u32 %v419_v24, 7  ;;  %6347 = vmatprep.subr.msk.bf16.mxu0 %vm9273_vm12, %v6700_v48  ;;  %vm9254_vm7 = vsmask.f32 4352 }
  0x23   : > { %1523 = vrot.lane.b32.xlu0 %v6585_v9, %s6458_s30  ;;  %v377_v20 = vsel %vm9287_vm3, %v374_v15, %v376_v18  ;;  %414 = vst.msk [vmem:[#allocation2 + $0x88] sm:$0xf] %vm413_vm2, %v376_v18  ;;  %v6627_v25 = vld [vmem:[#allocation2 + $0x38] sm:$0xff] }
  0x24   : > { %412 = vst.msk [vmem:[#allocation2 + $0x80] sm:$0xff] %vm397_vm1, %v377_v20  ;;  %v421_v28 = vadd.s32 8, %v6631_v26  ;;  %v423_v29 = vadd.s32 24, %v6631_v26  ;;  %v425_v32 = vadd.s32 40, %v6631_v26  ;;  %v427_v38 = vadd.s32 56, %v6631_v26 }
  0x25   : > { %1558 = vrot.lane.b32.xlu1 %v6594_v16, %s6459_s8  ;;  %v6635_v27 = vld [vmem:[#allocation2 + $0x40] sm:$0xff]  ;;  %v6643_v30 = vld [vmem:[#allocation2 + $0x48] sm:$0xff]  ;;  %v429_v42 = vadd.s32 72, %v6631_v26  ;;  %v431_v55 = vadd.s32 88, %v6631_v26  ;;  %v433_v57 = vadd.s32 104, %v6631_v26  ;;  %v435_v20 = vadd.s32 120, %v6631_v26 }
  0x26   : > { %v463_v31 = vand.u32 15, %v421_v28  ;;  %v477_v33 = vand.u32 15, %v423_v29  ;;  %v6650_v34 = vld [vmem:[#allocation2 + $0x50] sm:$0xff]  ;;  %v491_v36 = vand.u32 15, %v425_v32  ;;  %v6665_v39 = vld [vmem:[#allocation2 + $0x58] sm:$0xff]  ;;  %v505_v41 = vand.u32 15, %v427_v38 }
  0x27   : > { %1560 = vrot.lane.b32.xlu0 %v6583_v8, %s6459_s8  ;;  %v6689_v46 = vld [vmem:[#allocation2 + $0x60] sm:$0xff]  ;;  %v519_v51 = vand.u32 15, %v429_v42  ;;  %v533_v3 = vand.u32 15, %v431_v55  ;;  %v547_v5 = vand.u32 15, %v433_v57  ;;  %v437_v24 = vadd.s32 136, %v6631_v26 }
  0x28   : > { %vm6654_vm4 = vcmp.ne.s32.totalorder %v463_v31, 15  ;;  %vm6660_vm5 = vcmp.ne.s32.totalorder %v477_v33, 15  ;;  %vm6675_vm10 = vcmp.ne.s32.totalorder %v491_v36, 15  ;;  %vm6705_vm13 = vcmp.ne.s32.totalorder %v505_v41, 15  ;;  %v6710_v52 = vld [vmem:[#allocation2 + $0x68] sm:$0xff]  ;;  %v6731_v62 = vld [vmem:[#allocation2 + $0x70] sm:$0xff] }
  0x29   : > { %1562 = vrot.lane.b32.xlu1 %v6609_v21, %s6459_s8  ;;  %vm2015_vm8 = vmpackc.low %vm6654_vm4, %vm6654_vm4  ;;  %vm6727_vm15 = vcmp.ne.s32.totalorder %v519_v51, 15  ;;  %v6741_v12 = vld [vmem:[#allocation2 + $0x78] sm:$0xff]  ;;  %vm6744_vm2 = vcmp.ne.s32.totalorder %v533_v3, 15  ;;  %vm6751_vm4 = vcmp.ne.s32.totalorder %v547_v5, 15  ;;  %v561_v38 = vand.u32 15, %v435_v20 }
  0x2a   : > { %vm2017_vm9 = vmpackc.low %vm6660_vm5, %vm6660_vm5  ;;  %v2047_v45 = vsel %vm2015_vm8, 65537, %v9266_v0  ;;  %v575_v41 = vand.u32 15, %v437_v24  ;;  %v439_v42 = vadd.s32 152, %v6631_v26  ;;  %v6789_v57 = vld [vmem:[#allocation2 + $0x88] sm:$0xff]  ;;  %v443_v17 = vadd.s32 184, %v6631_v26 }
  0x2b   : > { %1527 = vrot.lane.b32.xlu0 %v6609_v21, %s6458_s30  ;;  %v2049_v47 = vsel %vm2017_vm9, 65537, %v9266_v0  ;;  %vm2019_vm11 = vmpackc.low %vm6675_vm10, %vm6675_vm10  ;;  %v5815_v49 = vcombine.low %v6686_v44, %v2047_v45  ;;  %v6764_v32 = vld [vmem:[#allocation2 + $0x80] sm:$0xff]  ;;  %vm6785_vm9 = vcmp.ne.s32.totalorder %v561_v38, 15 }
  0x2c   : > { %v5816_v53 = vcombine.low %v6686_v44, %v2049_v47  ;;  %v2051_v54 = vsel %vm2019_vm11, 65537, %v9266_v0  ;;  %vm2021_vm14 = vmpackc.low %vm6705_vm13, %vm6705_vm13  ;;  %v1273_v47 = vld [vmem:[#allocation2 + $0x88] sm:$0xf]  ;;  %vm6792_vm10 = vcmp.ne.s32.totalorder %v575_v41, 15 }
  0x2d   : > { %1529 = vrot.lane.b32.xlu1 %v6615_v22, %s6458_s30  ;;  %v2128_v58 = vshrl.u32 %v5815_v49, 16  ;;  %v2131_v59 = vshll.u32 %v5815_v49, 16  ;;  %v5817_v60 = vcombine.low %v6686_v44, %v2051_v54  ;;  %v2053_v4 = vsel %vm2021_vm14, 65537, %v9266_v0  ;;  %vm2023_vm0 = vmpackc.low %vm6727_vm15, %vm6727_vm15 }
  0x2e   : > { %v2136_v1 = vshrl.u32 %v5816_v53, 16  ;;  %v2139_v2 = vshll.u32 %v5816_v53, 16  ;;  %v5818_v15 = vcombine.low %v6686_v44, %v2053_v4  ;;  %v2055_v18 = vsel %vm2023_vm0, 65537, %v9266_v0  ;;  %vm2025_vm5 = vmpackc.low %vm6744_vm2, %vm6744_vm2 }
  0x2f   : > { %1564 = vrot.lane.b32.xlu0 %v6615_v22, %s6459_s8  ;;  %v2130_v6 = vrot.slane %v2128_v58, 3  ;;  %v2133_v7 = vrot.slane %v2131_v59, 4  ;;  %v2145_v10 = vshrl.u32 %v5817_v60, 16  ;;  %v2148_v11 = vshll.u32 %v5817_v60, 16  ;;  %vm2027_vm6 = vmpackc.low %vm6751_vm4, %vm6751_vm4 }
  0x30   : > { %v2138_v13 = vrot.slane %v2136_v1, 3  ;;  %v2141_v14 = vrot.slane %v2139_v2, 4  ;;  %v2154_v35 = vshrl.u32 %v5818_v15, 16  ;;  %v5819_v36 = vcombine.low %v6686_v44, %v2055_v18  ;;  %vm2029_vm13 = vmpackc.low %vm6785_vm9, %vm6785_vm9 }
  0x31   : > { %1566 = vrot.lane.b32.xlu1 %v6621_v23, %s6459_s8  ;;  %v6757_v28 = vor.u32 %v2133_v7, %v2130_v6  ;;  %v2147_v29 = vrot.slane %v2145_v10, 3  ;;  %v2150_v31 = vrot.slane %v2148_v11, 4  ;;  %v2157_v37 = vshll.u32 %v5818_v15, 16  ;;  %vm2031_vm14 = vmpackc.low %vm6792_vm10, %vm6792_vm10 }
  0x32   : > { %v2142_v33 = vor.u32 %v2141_v14, %v2138_v13  ;;  %v2057_v40 = vsel %vm2025_vm5, 65537, %v9266_v0  ;;  %v2059_v45 = vsel %vm2027_vm6, 65537, %v9266_v0  ;;  %v2156_v50 = vrot.slane %v2154_v35, 3 }
  0x33   : > { %1531 = vrot.lane.b32.xlu0 %v6621_v23, %s6458_s30  ;;  %9349 = vst [vmem:[#allocation4_spill] sm:$0xff] %v6757_v28  ;;  %vm9281_vm8 = vcmp.ne.s16.totalorder %v6757_v28, 0  ;;  %v2151_v43 = vor.u32 %v2150_v31, %v2147_v29  ;;  %v2163_v51 = vshrl.u32 %v5819_v36, 16  ;;  %v2159_v53 = vrot.slane %v2157_v37, 4 }
  0x34   : > { %v6780_v49 = vsel %vm9254_vm7, %v6757_v28, %v2142_v33  ;;  %v2166_v54 = vshll.u32 %v5819_v36, 16  ;;  %v5820_v55 = vcombine.low %v6686_v44, %v2057_v40  ;;  %v5821_v58 = vcombine.low %v6686_v44, %v2059_v45 }
  0x35   : > { %1533 = vrot.lane.b32.xlu1 %v6627_v25, %s6458_s30  ;;  %9350 = vst [vmem:[#allocation5_spill] sm:$0xff] %v6780_v49  ;;  %v589_v60 = vand.u32 15, %v439_v42  ;;  %v6798_v1 = vsel %vm9254_vm7, %v2142_v33, %v2151_v43  ;;  %v441_v2 = vadd.s32 168, %v6631_v26  ;;  %v2305_v3 = vsel %vm9281_vm8, %v6575_v63, 0 }
  0x36   : > { %9355 = vst [vmem:[#allocation6_spill] sm:$0xff] %v6798_v1  ;;  %vm9282_vm11 = vcmp.ne.s16.totalorder %v6780_v49, 0  ;;  %v2165_v4 = vrot.slane %v2163_v51, 3  ;;  %v2160_v5 = vor.u32 %v2159_v53, %v2156_v50  ;;  %v2168_v6 = vrot.slane %v2166_v54, 4 }
  0x37   : > { %1568 = vrot.lane.b32.xlu0 %v6627_v25, %s6459_s8  ;;  %v2172_v7 = vshrl.u32 %v5820_v55, 16  ;;  %v2175_v10 = vshll.u32 %v5820_v55, 16  ;;  %vm9274_vm15 = vcmp.ne.s16.totalorder %v6798_v1, 0  ;;  %v2181_v63 = vshrl.u32 %v5821_v58, 16 }
  0x38   : > { %v2184_v11 = vshll.u32 %v5821_v58, 16  ;;  %vm6814_vm0 = vcmp.ne.s32.totalorder %v589_v60, 15  ;;  %v2061_v14 = vsel %vm2029_vm13, 65537, %v9266_v0  ;;  %v603_v15 = vand.u32 15, %v441_v2 }
  0x39   : > { %1570 = vrot.lane.b32.xlu1 %v6635_v27, %s6459_s8  ;;  %v2306_v18 = vsel %vm9282_vm11, %v6585_v9, 0  ;;  %v2063_v19 = vsel %vm2031_vm14, 65537, %v9266_v0  ;;  %v2307_v20 = vsel %vm9274_vm15, %v6583_v8, 0  ;;  %v6830_v24 = vsel %vm9254_vm7, %v2151_v43, %v2160_v5  ;;  %vm2033_vm2 = vmpackc.low %vm6814_vm0, %vm6814_vm0 }
  0x3a   : > { %9358 = vst [vmem:[#allocation7_spill] sm:$0xff] %v6830_v24  ;;  %v2169_v29 = vor.u32 %v2168_v6, %v2165_v4  ;;  %v2174_v31 = vrot.slane %v2172_v7, 3  ;;  %v2177_v33 = vrot.slane %v2175_v10, 4  ;;  %v2183_v35 = vrot.slane %v2181_v63, 3 }
  0x3b   : > { %1535 = vrot.lane.b32.xlu0 %v6635_v27, %s6458_s30  ;;  %v2186_v36 = vrot.slane %v2184_v11, 4  ;;  %v5822_v37 = vcombine.low %v6686_v44, %v2061_v14  ;;  %v2323_v38 = vsel %vm9281_vm8, %v6594_v16, 0  ;;  %v5823_v40 = vcombine.low %v6686_v44, %v2063_v19 }
  0x3c   : > { %vm6841_vm4 = vcmp.ne.s32.totalorder %v603_v15, 15  ;;  %v617_v42 = vand.u32 15, %v443_v17  ;;  %v2065_v43 = vsel %vm2033_vm2, 65537, %v9266_v0  ;;  %v445_v45 = vadd.s32 200, %v6631_v26 }
  0x3d   : > { %1537 = vrot.lane.b32.xlu1 %v6643_v30, %s6458_s30  ;;  %vm9258_vm5 = vcmp.ne.s16.totalorder %v6830_v24, 0  ;;  %v6853_v16 = vsel %vm9254_vm7, %v2160_v5, %v2169_v29  ;;  %v2178_v50 = vor.u32 %v2177_v33, %v2174_v31  ;;  %v2187_v51 = vor.u32 %v2186_v36, %v2183_v35  ;;  %vm2035_vm6 = vmpackc.low %vm6841_vm4, %vm6841_vm4 }
  0x3e   : > { %9361 = vst [vmem:[#allocation8_spill] sm:$0xff] %v6853_v16  ;;  %v2190_v53 = vshrl.u32 %v5822_v37, 16  ;;  %v2193_v54 = vshll.u32 %v5822_v37, 16  ;;  %v2199_v55 = vshrl.u32 %v5823_v40, 16  ;;  %v2202_v56 = vshll.u32 %v5823_v40, 16 }
  0x3f   : > { %1572 = vrot.lane.b32.xlu0 %v6643_v30, %s6459_s8  ;;  %v5824_v58 = vcombine.low %v6686_v44, %v2065_v43  ;;  %vm6860_vm9 = vcmp.ne.s32.totalorder %v617_v42, 15  ;;  %v2325_v59 = vsel %vm9274_vm15, %v6609_v21, 0  ;;  %v631_v60 = vand.u32 15, %v445_v45 }
  0x40   : > { %v2308_v2 = vsel %vm9258_vm5, %v6609_v21, 0  ;;  %vm9257_vm10 = vcmp.ne.s16.totalorder %v6853_v16, 0  ;;  %v449_v4 = vadd.s32 232, %v6631_v26  ;;  %v6876_v5 = vsel %vm9254_vm7, %v2169_v29, %v2178_v50  ;;  %vm2037_vm13 = vmpackc.low %vm6860_vm9, %vm6860_vm9 }
  0x41   : > { %1574 = vrot.lane.b32.xlu1 %v6650_v34, %s6459_s8  ;;  %9364 = vst [vmem:[#allocation9_spill] sm:$0xff] %v6876_v5  ;;  %v6879_v6 = vsel %vm9254_vm7, %v2178_v50, %v2187_v51  ;;  %v2192_v7 = vrot.slane %v2190_v53, 3  ;;  %v2195_v10 = vrot.slane %v2193_v54, 4  ;;  %v2201_v21 = vrot.slane %v2199_v55, 3 }
  0x42   : > { %9365 = vst [vmem:[#allocation10_spill] sm:$0xff] %v6879_v6  ;;  %v2204_v63 = vrot.slane %v2202_v56, 4  ;;  %v2208_v11 = vshrl.u32 %v5824_v58, 16  ;;  %v2211_v13 = vshll.u32 %v5824_v58, 16  ;;  %v2309_v14 = vsel %vm9257_vm10, %v6615_v22, 0 }
  0x43   : > { %1539 = vrot.lane.b32.xlu0 %v6650_v34, %s6458_s30  ;;  %vm6889_vm14 = vcmp.ne.s32.totalorder %v631_v60, 15  ;;  %v2326_v19 = vsel %vm9258_vm5, %v6615_v22, 0  ;;  %v659_v29 = vand.u32 15, %v449_v4  ;;  %v2327_v31 = vsel %vm9257_vm10, %v6621_v23, 0 }
  0x44   : > { %vm9256_vm0 = vcmp.ne.s16.totalorder %v6876_v5, 0  ;;  %vm9249_vm2 = vcmp.ne.s16.totalorder %v6879_v6, 0  ;;  %v451_v33 = vadd.s32 248, %v6631_v26  ;;  %v2196_v35 = vor.u32 %v2195_v10, %v2192_v7  ;;  %vm2039_vm4 = vmpackc.low %vm6889_vm14, %vm6889_vm14 }
  0x45   : > { %1541 = vrot.lane.b32.xlu1 %v6665_v39, %s6458_s30  ;;  %v2205_v36 = vor.u32 %v2204_v63, %v2201_v21  ;;  %v2210_v37 = vrot.slane %v2208_v11, 3  ;;  %vm6914_vm9 = vcmp.ne.s32.totalorder %v659_v29, 15  ;;  %v2310_v45 = vsel %vm9256_vm0, %v6621_v23, 0 }
  0x46   : > { %v673_v50 = vand.u32 15, %v451_v33  ;;  %v2311_v53 = vsel %vm9249_vm2, %v6627_v25, 0  ;;  %v6927_v54 = vsel %vm9254_vm7, %v2187_v51, %v2196_v35  ;;  %vm2043_vm14 = vmpackc.low %vm6914_vm9, %vm6914_vm9  ;;  %v2328_v60 = vsel %vm9256_vm0, %v6627_v25, 0 }
  0x47   : > { %1576 = vrot.lane.b32.xlu0 %v6665_v39, %s6459_s8  ;;  %9372 = vst [vmem:[#allocation11_spill] sm:$0xff] %v6927_v54  ;;  %v6933_v56 = vsel %vm9254_vm7, %v2196_v35, %v2205_v36  ;;  %v2329_v4 = vsel %vm9249_vm2, %v6635_v27, 0  ;;  %v2075_v25 = vsel %vm2043_vm14, 65537, %v9266_v0  ;;  %v456_v63 = vand.u32 15, %v6631_v26 }
  0x48   : > { %9373 = vst [vmem:[#allocation12_spill] sm:$0xff] %v6933_v56  ;;  %vm9250_vm9 = vcmp.ne.s16.totalorder %v6933_v56, 0  ;;  %v432_v42 = vadd.s32 96, %v6631_v26  ;;  %vm1093_vm5 = vsmask.f32 3328 }
  0x49   : > { %1578 = vrot.lane.b32.xlu1 %v6689_v46, %s6459_s8 }
  0x4b   : > { %1543 = vrot.lane.b32.xlu0 %v6689_v46, %s6458_s30 }
  0x4d   : > { %1545 = vrot.lane.b32.xlu1 %v6710_v52, %s6458_s30 }
  0x4f   : > { %1580 = vrot.lane.b32.xlu0 %v6710_v52, %s6459_s8 }
  0x51   : > { %1582 = vrot.lane.b32.xlu1 %v6731_v62, %s6459_s8 }
  0x53   : > { %1547 = vrot.lane.b32.xlu0 %v6731_v62, %s6458_s30 }
  0x55   : > { %1549 = vrot.lane.b32.xlu1 %v6741_v12, %s6458_s30 }
  0x57   : > { %1584 = vrot.lane.b32.xlu0 %v6741_v12, %s6459_s8 }
  0x59   : > { %1586 = vrot.lane.b32.xlu1 %v6764_v32, %s6459_s8 }
  0x5b   : > { %1551 = vrot.lane.b32.xlu0 %v6764_v32, %s6458_s30 }
  0x5d   : > { %1553 = vrot.lane.b32.xlu1 %v1273_v47, %s6458_s30  ;;  %v2324_v47 = vsel %vm9282_vm11, %v6583_v8, 0 }
  0x5f   : > { %1588 = vrot.lane.b32.xlu0 %v6789_v57, %s6459_s8 }
  0x61   : > { %1590 = vrot.lane.b32.xlu1 %v1293_v61, %s6459_s8  ;;  %v447_v61 = vadd.s32 216, %v6631_v26 }
  0x63   : > { %2357 = vrot.lane.b32.xlu0 %v2305_v3, %s6458_s30  ;;  %v2067_v3 = vsel %vm2035_vm6, 65537, %v9266_v0 }
  0x64   : > { %v5825_v15 = vcombine.low %v6686_v44, %v2067_v3  ;;  %v422_v3 = vadd.s32 16, %v6631_v26 }
  0x65   : > { %2359 = vrot.lane.b32.xlu1 %v2306_v18, %s6458_s30  ;;  %v645_v18 = vand.u32 15, %v447_v61 }
  0x66   : > { %v2217_v22 = vshrl.u32 %v5825_v15, 16  ;;  %v2220_v40 = vshll.u32 %v5825_v15, 16 }
  0x67   : > { %2361 = vrot.lane.b32.xlu0 %v2307_v20, %s6458_s30  ;;  %v2069_v20 = vsel %vm2037_vm13, 65537, %v9266_v0  ;;  %vm6909_vm6 = vcmp.ne.s32.totalorder %v645_v18, 15  ;;  %v5829_v18 = vcombine.low %v6686_v44, %v2075_v25 }
  0x68   : > { %v5826_v41 = vcombine.low %v6686_v44, %v2069_v20  ;;  %vm2041_vm13 = vmpackc.low %vm6909_vm6, %vm6909_vm6  ;;  %v2219_v23 = vrot.slane %v2217_v22, 3  ;;  %v2222_v58 = vrot.slane %v2220_v40, 4  ;;  %vm9248_vm6 = vcmp.ne.s16.totalorder %v6927_v54, 0 }
  0x69   : > { %2408 = vrot.lane.b32.xlu1 %v2323_v38, %s6459_s8  ;;  %v2213_v38 = vrot.slane %v2211_v13, 4  ;;  %v2073_v61 = vsel %vm2041_vm13, 65537, %v9266_v0  ;;  %v2312_v17 = vsel %vm9248_vm6, %v6635_v27, 0  ;;  %v2313_v20 = vsel %vm9250_vm9, %v6643_v30, 0 }
  0x6a   : > { %v2226_v8 = vshrl.u32 %v5826_v41, 16  ;;  %v2223_v10 = vor.u32 %v2222_v58, %v2219_v23  ;;  %v5828_v15 = vcombine.low %v6686_v44, %v2073_v61  ;;  %v2330_v29 = vsel %vm9248_vm6, %v6643_v30, 0 }
  0x6b   : > { %2410 = vrot.lane.b32.xlu0 %v2324_v47, %s6459_s8  ;;  %v2071_v47 = vsel %vm2039_vm4, 65537, %v9266_v0  ;;  %v2214_v55 = vor.u32 %v2213_v38, %v2210_v37  ;;  %vm6944_vm4 = vcmp.ne.s32.totalorder %v673_v50, 15  ;;  %v2253_v40 = vshrl.u32 %v5829_v18, 16 }
  0x6c   : > { %v5827_v51 = vcombine.low %v6686_v44, %v2071_v47  ;;  %v2228_v21 = vrot.slane %v2226_v8, 3  ;;  %vm2045_vm13 = vmpackc.low %vm6944_vm4, %vm6944_vm4  ;;  %vm6982_vm4 = vcmp.ne.s32.totalorder %v456_v63, 0  ;;  %v2244_v22 = vshrl.u32 %v5828_v15, 16 }
  0x6d   : > { %2412 = vrot.lane.b32.xlu1 %v2325_v59, %s6459_s8  ;;  %v2229_v59 = vshll.u32 %v5826_v41, 16  ;;  %v6957_v7 = vsel %vm9254_vm7, %v2205_v36, %v2214_v55  ;;  %v6979_v33 = vsel %vm9254_vm7, %v2214_v55, %v2223_v10  ;;  %v2077_v27 = vsel %vm2045_vm13, 65537, %v9266_v0  ;;  %vm981_vm13 = vmpackc.low %vm6982_vm4, %vm6982_vm4 }
  0x6e   : > { %9376 = vst [vmem:[#allocation13_spill] sm:$0xff] %v6957_v7  ;;  %v2235_v13 = vshrl.u32 %v5827_v51, 16  ;;  %vm9252_vm14 = vcmp.ne.s16.totalorder %v6957_v7, 0  ;;  %9377 = vst [vmem:[#allocation14_spill] sm:$0xff] %v6979_v33  ;;  %v2247_v30 = vshll.u32 %v5828_v15, 16  ;;  %v2256_v41 = vshll.u32 %v5829_v18, 16 }
  0x6f   : > { %2363 = vrot.lane.b32.xlu0 %v2308_v2, %s6458_s30  ;;  %v2231_v11 = vrot.slane %v2229_v59, 4  ;;  %v5830_v43 = vcombine.low %v6686_v44, %v2077_v27  ;;  %v426_v47 = vadd.s32 48, %v6631_v26  ;;  %v2331_v50 = vsel %vm9250_vm9, %v6650_v34, 0  ;;  %v7090_v2 = vld [vmem:[#allocation2] sm:$0xf0] }
  0x70   : > { %v2237_v37 = vrot.slane %v2235_v13, 3  ;;  %vm9251_vm2 = vcmp.ne.s16.totalorder %v6979_v33, 0  ;;  %v2246_v58 = vrot.slane %v2244_v22, 3  ;;  %v2249_v8 = vrot.slane %v2247_v30, 4 }
  0x71   : > { %2365 = vrot.lane.b32.xlu1 %v2309_v14, %s6458_s30  ;;  %v2238_v14 = vshll.u32 %v5827_v51, 16  ;;  %v2232_v36 = vor.u32 %v2231_v11, %v2228_v21  ;;  %v2255_v59 = vrot.slane %v2253_v40, 3  ;;  %v2258_v51 = vrot.slane %v2256_v41, 4 }
  0x72   : > { %v2265_v61 = vshll.u32 %v5830_v43, 16  ;;  %v2315_v25 = vsel %vm9251_vm2, %v6665_v39, 0  ;;  %v2332_v21 = vsel %vm9252_vm14, %v6665_v39, 0  ;;  %v428_v63 = vadd.s32 64, %v6631_v26 }
  0x73   : > { %2414 = vrot.lane.b32.xlu0 %v2326_v19, %s6459_s8  ;;  %v470_v19 = vand.u32 15, %v422_v3  ;;  %v2240_v38 = vrot.slane %v2238_v14, 4  ;;  %v7006_v55 = vsel %vm9254_vm7, %v2223_v10, %v2232_v36  ;;  %v498_v3 = vand.u32 15, %v426_v47 }
  0x74   : > { %9382 = vst [vmem:[#allocation15_spill] sm:$0xff] %v7006_v55  ;;  %v2250_v13 = vor.u32 %v2249_v8, %v2246_v58  ;;  %v2259_v14 = vor.u32 %v2258_v51, %v2255_v59  ;;  %v2267_v18 = vrot.slane %v2265_v61, 4  ;;  %v512_v35 = vand.u32 15, %v428_v63 }
  0x75   : > { %2416 = vrot.lane.b32.xlu1 %v2327_v31, %s6459_s8  ;;  %v424_v31 = vadd.s32 32, %v6631_v26  ;;  %vm6987_vm6 = vcmp.ne.s32.totalorder %v470_v19, 0  ;;  %v2241_v23 = vor.u32 %v2240_v38, %v2237_v37  ;;  %v540_v61 = vand.u32 15, %v432_v42 }
  0x76   : > { %vm983_vm4 = vmpackc.low %vm6987_vm6, %vm6987_vm6  ;;  %vm9253_vm6 = vcmp.ne.s16.totalorder %v7006_v55, 0  ;;  %v7058_v38 = vsel %vm9254_vm7, %v2250_v13, %v2259_v14 }
  0x77   : > { %2367 = vrot.lane.b32.xlu0 %v2310_v45, %s6458_s30  ;;  %v484_v45 = vand.u32 15, %v424_v31  ;;  %v1015_v10 = vsel %vm983_vm4, 65537, %v9266_v0  ;;  %v7031_v11 = vsel %vm9254_vm7, %v2232_v36, %v2241_v23  ;;  %vm7039_vm4 = vcmp.ne.s32.totalorder %v498_v3, 0  ;;  %9389 = vst [vmem:[#allocation18_spill] sm:$0xff] %v7058_v38 }
  0x78   : > { %9385 = vst [vmem:[#allocation16_spill] sm:$0xff] %v7031_v11  ;;  %v5781_v39 = vcombine.low %v1015_v10, %v6686_v44  ;;  %v2316_v31 = vsel %vm9253_vm6, %v6689_v46, 0  ;;  %v430_v36 = vadd.s32 80, %v6631_v26  ;;  %v7055_v37 = vsel %vm9254_vm7, %v2241_v23, %v2250_v13 }
  0x79   : > { %2369 = vrot.lane.b32.xlu1 %v2311_v53, %s6458_s30  ;;  %v2314_v53 = vsel %vm9252_vm14, %v6650_v34, 0  ;;  %v2262_v34 = vshrl.u32 %v5830_v43, 16  ;;  %vm7013_vm9 = vcmp.ne.s32.totalorder %v484_v45, 0  ;;  %9388 = vst [vmem:[#allocation17_spill] sm:$0xff] %v7055_v37  ;;  %v2334_v45 = vsel %vm9253_vm6, %v6710_v52, 0 }
  0x7a   : > { %v1103_v40 = vshrl.u32 %v5781_v39, 16  ;;  %v1106_v41 = vshll.u32 %v5781_v39, 16  ;;  %vm7077_vm14 = vcmp.ne.s32.totalorder %v512_v35, 0  ;;  %v526_v23 = vand.u32 15, %v430_v36  ;;  %v7129_v35 = vld [vmem:[#allocation2 + $0x8] sm:$0xff] }
  0x7b   : > { %2418 = vrot.lane.b32.xlu0 %v2328_v60, %s6459_s8  ;;  %v1013_v60 = vsel %vm981_vm13, 65537, %v9266_v0  ;;  %vm985_vm13 = vmpackc.low %vm7013_vm9, %vm7013_vm9  ;;  %vm9255_vm9 = vcmp.ne.s16.totalorder %v7031_v11, 0  ;;  %vm9259_vm6 = vcmp.ne.s16.totalorder %v7058_v38, 0 }
  0x7c   : > { %v5780_v15 = vcombine.low %v1013_v60, %v6686_v44  ;;  %v1017_v27 = vsel %vm985_vm13, 65537, %v9266_v0  ;;  %v2317_v43 = vsel %vm9255_vm9, %v6710_v52, 0  ;;  %vm1464_vm13 = vcmask 64512  }
  0x7d   : > { %2420 = vrot.lane.b32.xlu1 %v2329_v4, %s6459_s8  ;;  %v7018_v4 = vadd.s32 240, %v6631_v26  ;;  %v5782_v47 = vcombine.low %v1017_v27, %v6686_v44  ;;  %v2335_v58 = vsel %vm9255_vm9, %v6731_v62, 0  ;;  %v1105_v60 = vrot.slane %v1103_v40, 4 }
  0x7e   : > { %v1095_v22 = vshrl.u32 %v5780_v15, 16  ;;  %v1098_v30 = vshll.u32 %v5780_v15, 16  ;;  %v2319_v13 = vsel %vm9259_vm6, %v6741_v12, 0  ;;  %v2322_v15 = vld [vmem:[#allocation2 + $0x90] sm:$0x1f]  ;;  %vm7109_vm9 = vcmp.ne.s32.totalorder %v526_v23, 0 }
  0x7f   : > { %2371 = vrot.lane.b32.xlu0 %v2312_v17, %s6458_s30  ;;  %v2264_v17 = vrot.slane %v2262_v34, 3  ;;  %v1108_v34 = vrot.slane %v1106_v41, 5  ;;  %v1115_v10 = vshll.u32 %v5782_v47, 16  ;;  %v434_v27 = vadd.s32 112, %v6631_v26 }
  0x80   : > { %v1097_v52 = vrot.slane %v1095_v22, 4  ;;  %v1100_v8 = vrot.slane %v1098_v30, 5 }
  0x81   : > { %2373 = vrot.lane.b32.xlu1 %v2313_v20, %s6458_s30  ;;  %v666_v20 = vand.u32 15, %v7018_v4  ;;  %v1109_v19 = vor.u32 %v1108_v34, %v1105_v60  ;;  %v1117_v22 = vrot.slane %v1115_v10, 5 }
  0x82   : > { %v7115_v39 = vor.u32 %v1100_v8, %v1097_v52 }
  0x83   : > { %2422 = vrot.lane.b32.xlu0 %v2330_v29, %s6459_s8  ;;  %v2333_v29 = vsel %vm9251_vm2, %v6689_v46, 0  ;;  %vm987_vm2 = vmpackc.low %vm7039_vm4, %vm7039_vm4  ;;  %v7064_v46 = vor.u32 %v2267_v18, %v2264_v17  ;;  %vm9260_vm4 = vcmp.ne.s16.totalorder %v7055_v37, 0  ;;  %v2304_v18 = vld [vmem:[#allocation2 + $0x88] sm:$0x1f] }
  0x84   : > { %v2318_v3 = vsel %vm9260_vm4, %v6731_v62, 0  ;;  %v2337_v62 = vsel %vm9259_vm6, %v6764_v32, 0  ;;  %vm7124_vm6 = vcmp.ne.s32.totalorder %v540_v61, 0  ;;  %v7159_v52 = vsel %vm1093_vm5, %v7115_v39, %v1109_v19 }
  0x85   : > { %2424 = vrot.lane.b32.xlu1 %v2331_v50, %s6459_s8  ;;  %9390 = vst [vmem:[#allocation19_spill] sm:$0xff] %v7064_v46  ;;  %v1019_v50 = vsel %vm987_vm2, 65537, %v9266_v0  ;;  %v7088_v51 = vsel %vm9254_vm7, %v2259_v14, %v7064_v46  ;;  %vm989_vm2 = vmpackc.low %vm7077_vm14, %vm7077_vm14  ;;  %v2336_v14 = vsel %vm9260_vm4, %v6741_v12, 0  ;;  %vm1735_vm7 = vcmask 97280  }
  0x86   : > { %9393 = vst [vmem:[#allocation20_spill] sm:$0xff] %v7088_v51  ;;  %vm9263_vm0 = vcmp.ne.s16.totalorder %v7088_v51, 0  ;;  %vm9262_vm10 = vcmp.ne.s16.totalorder %v7064_v46, 0  ;;  %vm991_vm4 = vmpackc.low %vm7109_vm9, %vm7109_vm9  ;;  %vm9261_vm14 = vcmp.ne.s16.totalorder %v7115_v39, 0 }
  0x87   : > { %2375 = vrot.lane.b32.xlu0 %v2314_v53, %s6458_s30  ;;  %v7150_v53 = vsel %vm9263_vm0, %v6789_v57, 0  ;;  %v1023_v8 = vsel %vm991_vm4, 65537, %v9266_v0  ;;  %vm993_vm9 = vmpackc.low %vm7124_vm6, %vm7124_vm6  ;;  %v554_v57 = vand.u32 15, %v434_v27  ;;  %vm9268_vm6 = vcmp.ne.s16.totalorder %v7159_v52, 0 }
  0x89   : > { %2377 = vrot.lane.b32.xlu1 %v2315_v25, %s6458_s30  ;;  %v1112_v25 = vshrl.u32 %v5782_v47, 16  ;;  %v7144_v47 = vsel %vm9262_vm10, %v2322_v15, 0  ;;  %v436_v15 = vadd.s32 128, %v6631_v26  ;;  %vm7179_vm4 = vcmp.ne.s32.totalorder %v554_v57, 0 }
  0x8b   : > { %2426 = vrot.lane.b32.xlu0 %v2332_v21, %s6459_s8  ;;  %v5783_v21 = vcombine.low %v1019_v50, %v6686_v44  ;;  %v1114_v36 = vrot.slane %v1112_v25, 4 }
  0x8d   : > { %2428 = vrot.lane.b32.xlu1 %v2333_v29, %s6459_s8  ;;  %v1021_v29 = vsel %vm989_vm2, 65537, %v9266_v0  ;;  %v1121_v30 = vshrl.u32 %v5783_v21, 16  ;;  %v1124_v40 = vshll.u32 %v5783_v21, 16  ;;  %v1118_v60 = vor.u32 %v1117_v22, %v1114_v36  ;;  %vm995_vm2 = vmpackc.low %vm7179_vm4, %vm7179_vm4 }
  0x8e   : > { %v5784_v23 = vcombine.low %v1021_v29, %v6686_v44  ;;  %v438_v22 = vadd.s32 144, %v6631_v26 }
  0x8f   : > { %2379 = vrot.lane.b32.xlu0 %v2316_v31, %s6458_s30  ;;  %v1123_v34 = vrot.slane %v1121_v30, 4  ;;  %v1126_v61 = vrot.slane %v1124_v40, 5  ;;  %v7186_v30 = vsel %vm1093_vm5, %v1109_v19, %v1118_v60  ;;  %v2719_v31 = vsel %vm9273_vm12, %v6700_v48, 0 }
  0x90   : > { %v1133_v29 = vshll.u32 %v5784_v23, 16  ;;  %v568_v48 = vand.u32 15, %v436_v15 }
  0x91   : > { %2381 = vrot.lane.b32.xlu1 %v2317_v43, %s6458_s30  ;;  %v1522_v59 = vpop.permute.xlu0 %1521  ;;  %v2320_v43 = vsel %vm9263_vm0, %v6764_v32, 0  ;;  %v1127_v40 = vor.u32 %v1126_v61, %v1123_v34  ;;  %v582_v34 = vand.u32 15, %v438_v22  ;;  %v440_v61 = vadd.s32 160, %v6631_v26 }
  0x92   : > { %v1594_v41 = vsel %vm397_vm1, %v7090_v2, %v1522_v59 }
  0x93   : > { %v1526_v63 = vpop.permute.xlu1 %1525  ;;  %2430 = vrot.lane.b32.xlu0 %v2334_v45, %s6459_s8  ;;  %v2321_v45 = vsel %vm9262_vm10, %v2304_v18, 0  ;;  %v1291_v18 = vld [vmem:[#allocation2 + $0x10] sm:$0xf8]  ;;  %vm7243_vm10 = vcmp.ne.s32.totalorder %v582_v34, 0  ;;  %v442_v34 = vadd.s32 176, %v6631_v26 }
  0x94   : > { %vm999_vm0 = vmpackc.low %vm7243_vm10, %vm7243_vm10 }
  0x95   : > { %2432 = vrot.lane.b32.xlu1 %v2335_v58, %s6459_s8  ;;  %v1524_v12 = vpop.permute.xlu0 %1523 }
  0x96   : > { %v1597_v32 = vsel %vm397_vm1, %v7129_v35, %v1524_v12  ;;  %v1130_v12 = vshrl.u32 %v5784_v23, 16  ;;  %v7202_v23 = vsel %vm9261_vm14, %v1291_v18, 0  ;;  %v1031_v18 = vsel %vm999_vm0, 65537, %v9266_v0 }
  0x97   : > { %v1559_v42 = vpop.permute.xlu1 %1558  ;;  %2383 = vrot.lane.b32.xlu0 %v2318_v3, %s6458_s30  ;;  %v1600_v3 = vsel %vm397_vm1, %v6585_v9, %v1526_v63  ;;  %v1025_v9 = vsel %vm993_vm9, 65537, %v9266_v0  ;;  %vm9264_vm9 = vcmp.ne.s16.totalorder %v7186_v30, 0 }
  0x98   : > { %v1644_v50 = vsel %vm1464_vm13, %v1594_v41, %v1559_v42  ;;  %v7194_v41 = vld [vmem:[%s9241_s1] sm:$0x3f]  }
  0x99   : > { %2385 = vrot.lane.b32.xlu1 %v2319_v13, %s6458_s30  ;;  %v1561_v58 = vpop.permute.xlu0 %1560  ;;  %v1697_v25 = vrot.slane %v1644_v50, 4  ;;  %v1271_v13 = vld [vmem:[#allocation2 + $0x8] sm:$0xf8] }
  0x9a   : > { %v1646_v59 = vsel %vm1464_vm13, %v1597_v32, %v1561_v58  ;;  %v1274_v19 = vsel %vm9261_vm14, %v1271_v13, 0  ;;  %v1132_v32 = vrot.slane %v1130_v12, 4  ;;  %v1135_v58 = vrot.slane %v1133_v29, 5  ;;  %v7223_v13 = vld [vmem:[#allocation2 + $0x20] sm:$0xff] }
  0x9b   : > { %v1698_v10 = vrot.slane %v1646_v59, 4  ;;  %v1563_v21 = vpop.permute.xlu1 %1562  ;;  %2434 = vrot.lane.b32.xlu0 %v2336_v14, %s6459_s8  ;;  %vm7235_vm14 = vcmp.ne.s32.totalorder %v568_v48, 0 }
  0x9c   : > { %v1648_v17 = vsel %vm1464_vm13, %v1600_v3, %v1563_v21  ;;  %v1136_v29 = vor.u32 %v1135_v58, %v1132_v32  ;;  %vm997_vm4 = vmpackc.low %vm7235_vm14, %vm7235_vm14 }
  0x9d   : > { %v1700_v63 = vrot.slane %v1648_v17, 4  ;;  %2436 = vrot.lane.b32.xlu1 %v2337_v62, %s6459_s8  ;;  %v1528_v27 = vpop.permute.xlu0 %1527  ;;  %v1699_v14 = vsel %vm9287_vm3, %v1697_v25, %v1698_v10  ;;  %v5785_v62 = vcombine.low %v1023_v8, %v6686_v44  ;;  %v5786_v8 = vcombine.low %v1025_v9, %v6686_v44 }
  0x9e   : > { %6060 = vmatprep.mubr.msk.bf16.mxu0 %vm1735_vm7, %v1699_v14  ;;  %v7219_v25 = vsel %vm1093_vm5, %v1118_v60, %v1127_v40  ;;  %v1027_v60 = vsel %vm995_vm2, 65537, %v9266_v0 }
  0x9f   : > { %v1530_v42 = vpop.permute.xlu1 %1529  ;;  %2387 = vrot.lane.b32.xlu0 %v2320_v43, %s6458_s30  ;;  %v1701_v50 = vsel %vm9287_vm3, %v1698_v10, %v1700_v63  ;;  %v7210_v43 = vld [vmem:[#allocation2 + $0x18] sm:$0xff]  ;;  %v1139_v10 = vshrl.u32 %v5785_v62, 16  ;;  %v1142_v21 = vshll.u32 %v5785_v62, 16  ;;  %v1148_v9 = vshrl.u32 %v5786_v8, 16  ;;  %v7248_v62 = vld [vmem:[#allocation2 + $0x10] sm:$0xff] }
  0xa0   : > { %6061 = vmatmul.mubr.msk.bf16.vlgmr.msra.gmra.mrb[0].mxu0 %vm1735_vm7, %v1701_v50  ;;  %v1603_v57 = vsel %vm397_vm1, %v7210_v43, %v1528_v27  ;;  %v1151_v27 = vshll.u32 %v5786_v8, 16  ;;  %v1276_v58 = vsel %vm9264_vm9, %v7210_v43, 0  ;;  %v1295_v8 = vsel %vm9268_vm6, %v7210_v43, 0 }
  0xa1   : > { %2389 = vrot.lane.b32.xlu1 %v2321_v45, %s6458_s30  ;;  %v1565_v59 = vpop.permute.xlu0 %1564  ;;  %6093 = vmatpush3.bf16.msra.mxu0 %v2719_v31  ;;  %v1606_v45 = vsel %vm397_vm1, %v7223_v13, %v1530_v42  ;;  %v596_v31 = vand.u32 15, %v440_v61  ;;  %v1275_v42 = vsel %vm9268_vm6, %v7248_v62, 0  ;;  %v1141_v50 = vrot.slane %v1139_v10, 4  ;;  %v7277_v61 = vld [vmem:[#allocation2 + $0x28] sm:$0xff] }
  0xa2   : > { %v1650_v3 = vsel %vm1464_vm13, %v1603_v57, %v1565_v59  ;;  %6348 = vmatprep.subr.msk.bf16.mxu0 %vm9273_vm12, %v7194_v41  ;;  %v1144_v48 = vrot.slane %v1142_v21, 5  ;;  %v1296_v57 = vsel %vm9264_vm9, %v7223_v13, 0  ;;  %vm9265_vm2 = vcmp.ne.s16.totalorder %v7219_v25, 0 }
  0xa3   : > { %v1702_v15 = vrot.slane %v1650_v3, 4  ;;  %v1567_v17 = vpop.permute.xlu1 %1566  ;;  %2438 = vrot.lane.b32.xlu0 %v7150_v53, %s6459_s8  ;;  %v1150_v59 = vrot.slane %v1148_v9, 4  ;;  %v1153_v21 = vrot.slane %v1151_v27, 5  ;;  %vm7288_vm9 = vcmp.ne.s32.totalorder %v596_v31, 0  ;;  %v7293_v9 = vld [vmem:[#allocation2 + $0x30] sm:$0xff] }
  0xa4   : > { %v1652_v12 = vsel %vm1464_vm13, %v1606_v45, %v1567_v17  ;;  %v1145_v17 = vor.u32 %v1144_v48, %v1141_v50  ;;  %v444_v31 = vadd.s32 192, %v6631_v26  ;;  %v1277_v50 = vsel %vm9265_vm2, %v7223_v13, 0  ;;  %vm1001_vm14 = vmpackc.low %vm7288_vm9, %vm7288_vm9 }
  0xa5   : > { %v1704_v14 = vrot.slane %v1652_v12, 4  ;;  %2440 = vrot.lane.b32.xlu1 %v7144_v47, %s6459_s8  ;;  %v1532_v53 = vpop.permute.xlu0 %1531  ;;  %v1703_v22 = vsel %vm9287_vm3, %v1700_v63, %v1702_v15  ;;  %v5787_v47 = vcombine.low %v1027_v60, %v6686_v44 }
  0xa6   : > { %6064 = vmatprep.mubr.msk.bf16.mxu0 %vm1735_vm7, %v1703_v22  ;;  %v1609_v3 = vsel %vm397_vm1, %v7277_v61, %v1532_v53 }
  0xa7   : > { %v1534_v63 = vpop.permute.xlu1 %1533  ;;  %1328 = vrot.lane.b32.xlu0 %v1274_v19, %s6458_s30  ;;  %v1705_v32 = vsel %vm9287_vm3, %v1702_v15, %v1704_v14  ;;  %v7271_v19 = vsel %vm1093_vm5, %v1127_v40, %v1136_v29  ;;  %v1029_v40 = vsel %vm997_vm4, 65537, %v9266_v0  ;;  %v1157_v60 = vshrl.u32 %v5787_v47, 16 }
  0xa8   : > { %6065 = vmatmul.mubr.msk.bf16.gmra.mrb[4].mxu0 %vm1735_vm7, %v1705_v32  ;;  %9404 = vst [vmem:[#allocation21_spill] sm:$0xff] %v7271_v19  ;;  %v1160_v12 = vshll.u32 %v5787_v47, 16  ;;  %v1612_v27 = vsel %vm397_vm1, %v7293_v9, %v1534_v63  ;;  %v5788_v48 = vcombine.low %v1029_v40, %v6686_v44  ;;  %v610_v47 = vand.u32 15, %v442_v34 }
  0xa9   : > { %1330 = vrot.lane.b32.xlu1 %v1275_v42, %s6458_s30  ;;  %v1569_v10 = vpop.permute.xlu0 %1568  ;;  %vm9269_vm10 = vcmp.ne.s16.totalorder %v7271_v19, 0 }
  0xaa   : > { %v1654_v15 = vsel %vm1464_vm13, %v1609_v3, %v1569_v10  ;;  %v7319_v3 = vsel %vm1093_vm5, %v1136_v29, %v1145_v17  ;;  %v1159_v10 = vrot.slane %v1157_v60, 4  ;;  %v1162_v40 = vrot.slane %v1160_v12, 5 }
  0xab   : > { %v1706_v53 = vrot.slane %v1654_v15, 4  ;;  %v1571_v22 = vpop.permute.xlu1 %1570  ;;  %1332 = vrot.lane.b32.xlu0 %v1276_v58, %s6458_s30  ;;  %v1154_v58 = vor.u32 %v1153_v21, %v1150_v59  ;;  %9407 = vst [vmem:[#allocation22_spill] sm:$0xff] %v7319_v3  ;;  %v5789_v15 = vcombine.low %v1031_v18, %v6686_v44  ;;  %v1033_v29 = vsel %vm1001_vm14, 65537, %v9266_v0 }
  0xac   : > { %v1656_v42 = vsel %vm1464_vm13, %v1612_v27, %v1571_v22  ;;  %v624_v59 = vand.u32 15, %v444_v31  ;;  %v1166_v21 = vshrl.u32 %v5788_v48, 16  ;;  %v1169_v60 = vshll.u32 %v5788_v48, 16  ;;  %v7341_v27 = vld [vmem:[#allocation2 + $0x38] sm:$0xff] }
  0xad   : > { %v1708_v63 = vrot.slane %v1656_v42, 4  ;;  %1379 = vrot.lane.b32.xlu1 %v7202_v23, %s6459_s8  ;;  %v1536_v36 = vpop.permute.xlu0 %1535  ;;  %v1707_v32 = vsel %vm9287_vm3, %v1704_v14, %v1706_v53  ;;  %v1297_v14 = vsel %vm9265_vm2, %v7277_v61, 0  ;;  %vm7337_vm0 = vcmp.ne.s32.totalorder %v610_v47, 0 }
  0xae   : > { %6068 = vmatprep.mubr.msk.bf16.mxu0 %vm1735_vm7, %v1707_v32  ;;  %v1615_v45 = vsel %vm397_vm1, %v7341_v27, %v1536_v36  ;;  %vm9272_vm9 = vcmp.ne.s16.totalorder %v7319_v3, 0  ;;  %v7348_v22 = vsel %vm1093_vm5, %v1145_v17, %v1154_v58  ;;  %v446_v18 = vadd.s32 208, %v6631_v26  ;;  %v7353_v32 = vld [vmem:[#allocation2 + $0x40] sm:$0xff]  ;;  %vm1003_vm4 = vmpackc.low %vm7337_vm0, %vm7337_vm0 }
  0xaf   : > { %v1538_v34 = vpop.permute.xlu1 %1537  ;;  %1381 = vrot.lane.b32.xlu0 %v1295_v8, %s6459_s8  ;;  %v1709_v23 = vsel %vm9287_vm3, %v1706_v53, %v1708_v63  ;;  %v1278_v8 = vsel %vm9269_vm10, %v7277_v61, 0  ;;  %9410 = vst [vmem:[#allocation23_spill] sm:$0xff] %v7348_v22  ;;  %v1163_v42 = vor.u32 %v1162_v40, %v1159_v10  ;;  %v1175_v48 = vshrl.u32 %v5789_v15, 16 }
  0xb0   : > { %6069 = vmatmul.mubr.msk.bf16.gmra.mrb[8].mxu0 %vm1735_vm7, %v1709_v23  ;;  %v5790_v47 = vcombine.low %v1033_v29, %v6686_v44  ;;  %v1618_v36 = vsel %vm397_vm1, %v7353_v32, %v1538_v34  ;;  %vm7361_vm14 = vcmp.ne.s32.totalorder %v624_v59, 0  ;;  %v448_v10 = vadd.s32 224, %v6631_v26 }
  0xb1   : > { %1383 = vrot.lane.b32.xlu1 %v1296_v57, %s6459_s8  ;;  %v1573_v53 = vpop.permute.xlu0 %1572  ;;  %v1168_v29 = vrot.slane %v1166_v21, 4  ;;  %vm7369_vm2 = vcmp.ne.s32.totalorder %v666_v20, 0  ;;  %v638_v0 = vand.u32 15, %v446_v18  ;;  %v1298_v26 = vsel %vm9269_vm10, %v7293_v9, 0  ;;  %vm1005_vm6 = vmpackc.low %vm7361_vm14, %vm7361_vm14 }
  0xb2   : > { %v1658_v31 = vsel %vm1464_vm13, %v1615_v45, %v1573_v53  ;;  %v1171_v45 = vrot.slane %v1169_v60, 5  ;;  %v1178_v53 = vshll.u32 %v5789_v15, 16  ;;  %v1279_v4 = vsel %vm9272_vm9, %v7293_v9, 0 }
  0xb3   : > { %v1710_v57 = vrot.slane %v1658_v31, 4  ;;  %v1575_v23 = vpop.permute.xlu1 %1574  ;;  %1334 = vrot.lane.b32.xlu0 %v1277_v50, %s6458_s30  ;;  %v1184_v20 = vshrl.u32 %v5790_v47, 16  ;;  %v9415_v15 = vmov 0   ;;  %vm1243_vm10 = vcmp.ne.s16.totalorder %v7348_v22, 0 }
  0xb4   : > { %v1660_v40 = vsel %vm1464_vm13, %v1618_v36, %v1575_v23  ;;  %v1187_v60 = vshll.u32 %v5790_v47, 16  ;;  %v652_v18 = vand.u32 15, %v448_v10  ;;  %v7396_v36 = vsel %vm1093_vm5, %v1154_v58, %v1163_v42 }
  0xb5   : > { %v1712_v50 = vrot.slane %v1660_v40, 4  ;;  %1336 = vrot.lane.b32.xlu1 %v1278_v8, %s6458_s30  ;;  %v1540_v59 = vpop.permute.xlu0 %1539  ;;  %v1711_v31 = vsel %vm9287_vm3, %v1708_v63, %v1710_v57  ;;  %v1035_v8 = vsel %vm1003_vm4, 65537, %v9415_v15  ;;  %v1172_v12 = vor.u32 %v1171_v45, %v1168_v29 }
  0xb6   : > { %6072 = vmatprep.mubr.msk.bf16.mxu0 %vm1735_vm7, %v1711_v31  ;;  %v1177_v23 = vrot.slane %v1175_v48, 4  ;;  %v1180_v40 = vrot.slane %v1178_v53, 5  ;;  %v7398_v31 = vld [vmem:[#allocation2 + $0x48] sm:$0xff]  ;;  %v1037_v58 = vsel %vm1005_vm6, 65537, %v9415_v15  ;;  %vm7410_vm0 = vcmp.ne.s32.totalorder %v638_v0, 0  ;;  %v7421_v53 = vld [vmem:[#allocation2 + $0x50] sm:$0xff] }
  0xb7   : > { %v1542_v63 = vpop.permute.xlu1 %1541  ;;  %1385 = vrot.lane.b32.xlu0 %v1297_v14, %s6459_s8  ;;  %v1713_v21 = vsel %vm9287_vm3, %v1710_v57, %v1712_v50  ;;  %v1621_v19 = vsel %vm397_vm1, %v7398_v31, %v1540_v59  ;;  %v5791_v57 = vcombine.low %v1035_v8, %v6686_v44  ;;  %v1280_v10 = vsel %vm1243_vm10, %v7341_v27, 0  ;;  %vm1007_vm14 = vmpackc.low %vm7410_vm0, %vm7410_vm0 }
  0xb8   : > { %6073 = vmatmul.mubr.msk.bf16.gmra.mrb[12].mxu0 %vm1735_vm7, %v1713_v21  ;;  %v1299_v29 = vsel %vm9272_vm9, %v7341_v27, 0  ;;  %v1186_v45 = vrot.slane %v1184_v20, 4  ;;  %v1624_v17 = vsel %vm397_vm1, %v7421_v53, %v1542_v63  ;;  %vm7426_vm6 = vcmp.ne.s32.totalorder %v652_v18, 0  ;;  %vm1011_vm9 = vmpackc.low %vm7369_vm2, %vm7369_vm2 }
  0xb9   : > { %1387 = vrot.lane.b32.xlu1 %v1298_v26, %s6459_s8  ;;  %v1577_v14 = vpop.permute.xlu0 %1576  ;;  %v1189_v26 = vrot.slane %v1187_v60, 5  ;;  %vm1244_vm4 = vcmp.ne.s16.totalorder %v7396_v36, 0  ;;  %v7433_v20 = vsel %vm1093_vm5, %v1163_v42, %v1172_v12  ;;  %v5792_v21 = vcombine.low %v1037_v58, %v6686_v44  ;;  %vm1009_vm12 = vmpackc.low %vm7426_vm6, %vm7426_vm6 }
  0xba   : > { %v1662_v47 = vsel %vm1464_vm13, %v1621_v19, %v1577_v14  ;;  %9420 = vst [vmem:[#allocation24_spill] sm:$0xff] %v7433_v20  ;;  %v1181_v18 = vor.u32 %v1180_v40, %v1177_v23  ;;  %v1193_v14 = vshrl.u32 %v5791_v57, 16  ;;  %v1300_v42 = vsel %vm1243_vm10, %v7353_v32, 0 }
  0xbb   : > { %v1714_v0 = vrot.slane %v1662_v47, 4  ;;  %v1579_v59 = vpop.permute.xlu1 %1578  ;;  %1338 = vrot.lane.b32.xlu0 %v1279_v4, %s6458_s30  ;;  %v1196_v58 = vshll.u32 %v5791_v57, 16  ;;  %vm1245_vm15 = vcmp.ne.s16.totalorder %v7433_v20, 0  ;;  %v1039_v23 = vsel %vm1007_vm14, 65537, %v9415_v15  ;;  %v7517_v20 = vld [vmem:[#allocation2 + $0x68] sm:$0xff] }
  0xbc   : > { %v1664_v8 = vsel %vm1464_vm13, %v1624_v17, %v1579_v59  ;;  %v1043_v40 = vsel %vm1011_vm9, 65537, %v9415_v15  ;;  %v1281_v57 = vsel %vm1244_vm4, %v7353_v32, 0  ;;  %v7470_v17 = vld [vmem:[#allocation2 + $0x58] sm:$0xff]  ;;  %v7476_v34 = vsel %vm1093_vm5, %v1172_v12, %v1181_v18 }
  0xbd   : > { %v1716_v4 = vrot.slane %v1664_v8, 4  ;;  %1340 = vrot.lane.b32.xlu1 %v1280_v10, %s6458_s30  ;;  %v1544_v63 = vpop.permute.xlu0 %1543  ;;  %v1715_v60 = vsel %vm9287_vm3, %v1712_v50, %v1714_v0  ;;  %v1190_v50 = vor.u32 %v1189_v26, %v1186_v45  ;;  %v1205_v45 = vshll.u32 %v5792_v21, 16 }
  0xbe   : > { %6076 = vmatprep.mubr.msk.bf16.mxu0 %vm1735_vm7, %v1715_v60  ;;  %v1627_v48 = vsel %vm397_vm1, %v7470_v17, %v1544_v63  ;;  %v1195_v59 = vrot.slane %v1193_v14, 4  ;;  %v1041_v26 = vsel %vm1009_vm12, 65537, %v9415_v15  ;;  %v1198_v63 = vrot.slane %v1196_v58, 5 }
  0xbf   : > { %v1546_v47 = vpop.permute.xlu1 %1545  ;;  %1389 = vrot.lane.b32.xlu0 %v1299_v29, %s6459_s8  ;;  %v1717_v10 = vsel %vm9287_vm3, %v1714_v0, %v1716_v4  ;;  %v1202_v29 = vshrl.u32 %v5792_v21, 16  ;;  %v1282_v21 = vsel %vm1245_vm15, %v7398_v31, 0  ;;  %v5793_v60 = vcombine.low %v1039_v23, %v6686_v44 }
  0xc0   : > { %6077 = vmatmul.mubr.msk.bf16.gmra.mrb[16].mxu0 %vm1735_vm7, %v1717_v10  ;;  %v1301_v19 = vsel %vm1244_vm4, %v7398_v31, 0  ;;  %v1207_v23 = vrot.slane %v1205_v45, 5  ;;  %v5794_v22 = vcombine.low %v1041_v26, %v6686_v44  ;;  %vm1246_vm12 = vcmp.ne.s16.totalorder %v7476_v34, 0 }
  0xc1   : > { %1391 = vrot.lane.b32.xlu1 %v1300_v42, %s6459_s8  ;;  %v1581_v0 = vpop.permute.xlu0 %1580  ;;  %v7489_v42 = vld [vmem:[#allocation2 + $0x60] sm:$0xff]  ;;  %v1214_v45 = vshll.u32 %v5793_v60, 16 }
  0xc2   : > { %v1666_v8 = vsel %vm1464_vm13, %v1627_v48, %v1581_v0  ;;  %v1630_v12 = vsel %vm397_vm1, %v7489_v42, %v1546_v47  ;;  %v7498_v48 = vsel %vm1093_vm5, %v1181_v18, %v1190_v50  ;;  %v1204_v0 = vrot.slane %v1202_v29, 4 }
  0xc3   : > { %v1718_v14 = vrot.slane %v1666_v8, 4  ;;  %v1583_v10 = vpop.permute.xlu1 %1582  ;;  %1342 = vrot.lane.b32.xlu0 %v1281_v57, %s6458_s30  ;;  %9421 = vst [vmem:[#allocation25_spill] sm:$0xff] %v7498_v48  ;;  %v1302_v57 = vsel %vm1245_vm15, %v7421_v53, 0  ;;  %vm1247_vm2 = vcmp.ne.s16.totalorder %v7498_v48, 0  ;;  %v1199_v18 = vor.u32 %v1198_v63, %v1195_v59 }
  0xc4   : > { %v1668_v58 = vsel %vm1464_vm13, %v1630_v12, %v1583_v10  ;;  %v1211_v29 = vshrl.u32 %v5793_v60, 16  ;;  %v1208_v12 = vor.u32 %v1207_v23, %v1204_v0  ;;  %v1220_v10 = vshrl.u32 %v5794_v22, 16 }
  0xc5   : > { %v1720_v3 = vrot.slane %v1668_v58, 4  ;;  %1344 = vrot.lane.b32.xlu1 %v1282_v21, %s6458_s30  ;;  %v1548_v47 = vpop.permute.xlu0 %1547  ;;  %v1719_v8 = vsel %vm9287_vm3, %v1716_v4, %v1718_v14  ;;  %v1283_v4 = vsel %vm1246_vm12, %v7421_v53, 0  ;;  %v1223_v58 = vshll.u32 %v5794_v22, 16 }
  0xc6   : > { %6080 = vmatprep.mubr.msk.bf16.mxu0 %vm1735_vm7, %v1719_v8  ;;  %v5795_v8 = vcombine.low %v1043_v40, %v6686_v44  ;;  %v1633_v59 = vsel %vm397_vm1, %v7517_v20, %v1548_v47  ;;  %v1284_v60 = vsel %vm1247_vm2, %v7470_v17, 0  ;;  %v1213_v22 = vrot.slane %v1211_v29, 4  ;;  %v7529_v44 = vld [vmem:[#allocation2 + $0x70] sm:$0xff] }
  0xc7   : > { %v1550_v26 = vpop.permute.xlu1 %1549  ;;  %1393 = vrot.lane.b32.xlu0 %v1301_v19, %s6459_s8  ;;  %v1721_v21 = vsel %vm9287_vm3, %v1718_v14, %v1720_v3  ;;  %v7527_v19 = vsel %vm1093_vm5, %v1190_v50, %v1199_v18  ;;  %v1216_v0 = vrot.slane %v1214_v45, 5  ;;  %v7539_v50 = vsel %vm1093_vm5, %v1199_v18, %v1208_v12 }
  0xc8   : > { %6081 = vmatmul.mubr.msk.bf16.gmra.mrb[20].mxu0 %vm1735_vm7, %v1721_v21  ;;  %9422 = vst [vmem:[#allocation26_spill] sm:$0xff] %v7527_v19  ;;  %v1636_v40 = vsel %vm397_vm1, %v7529_v44, %v1550_v26  ;;  %9423 = vst [vmem:[#allocation27_spill] sm:$0xff] %v7539_v50  ;;  %v1222_v29 = vrot.slane %v1220_v10, 4  ;;  %v1225_v45 = vrot.slane %v1223_v58, 5  ;;  %vm1248_vm9 = vcmp.ne.s16.totalorder %v7527_v19, 0 }
  0xc9   : > { %1395 = vrot.lane.b32.xlu1 %v1302_v57, %s6459_s8  ;;  %v1585_v63 = vpop.permute.xlu0 %1584  ;;  %v1303_v57 = vsel %vm1246_vm12, %v7470_v17, 0  ;;  %v1217_v18 = vor.u32 %v1216_v0, %v1213_v22  ;;  %vm1249_vm0 = vcmp.ne.s16.totalorder %v7539_v50, 0  ;;  %v7551_v58 = vld [vmem:[#allocation2 + $0x80] sm:$0xf] }
  0xca   : > { %v1670_v14 = vsel %vm1464_vm13, %v1633_v59, %v1585_v63  ;;  %v1229_v59 = vshrl.u32 %v5795_v8, 16 }
  0xcb   : > { %v1722_v23 = vrot.slane %v1670_v14, 4  ;;  %v1587_v47 = vpop.permute.xlu1 %1586  ;;  %1346 = vrot.lane.b32.xlu0 %v1283_v4, %s6458_s30  ;;  %v1232_v4 = vshll.u32 %v5795_v8, 16  ;;  %v1226_v8 = vor.u32 %v1225_v45, %v1222_v29 }
  0xcc   : > { %v1672_v21 = vsel %vm1464_vm13, %v1636_v40, %v1587_v47  ;;  %v1304_v40 = vsel %vm1247_vm2, %v7489_v42, 0 }
  0xcd   : > { %v1724_v63 = vrot.slane %v1672_v21, 4  ;;  %1348 = vrot.lane.b32.xlu1 %v1284_v60, %s6458_s30  ;;  %v1552_v26 = vpop.permute.xlu0 %1551  ;;  %v1723_v14 = vsel %vm9287_vm3, %v1720_v3, %v1722_v23  ;;  %v1285_v3 = vsel %vm1248_vm9, %v7489_v42, 0  ;;  %v1231_v60 = vrot.slane %v1229_v59, 4  ;;  %v7557_v21 = vld [vmem:[#allocation2 + $0x78] sm:$0xff] }
  0xce   : > { %6084 = vmatprep.mubr.msk.bf16.mxu0 %vm1735_vm7, %v1723_v14  ;;  %v1639_v22 = vsel %vm397_vm1, %v7557_v21, %v1552_v26  ;;  %v1286_v14 = vsel %vm1249_vm0, %v7517_v20, 0 }
  0xcf   : > { %v1554_v47 = vpop.permute.xlu1 %1553  ;;  %1397 = vrot.lane.b32.xlu0 %v1303_v57, %s6459_s8  ;;  %v1725_v10 = vsel %vm9287_vm3, %v1722_v23, %v1724_v63  ;;  %v1234_v23 = vrot.slane %v1232_v4, 5  ;;  %v1305_v4 = vsel %vm1248_vm9, %v7517_v20, 0 }
  0xd0   : > { %6085 = vmatmul.mubr.msk.bf16.gmra.mrb[24].mxu0 %vm1735_vm7, %v1725_v10  ;;  %v7567_v10 = vsel %vm1093_vm5, %v1208_v12, %v1217_v18  ;;  %v1642_v29 = vsel %vm397_vm1, %v7551_v58, %v1554_v47 }
  0xd1   : > { %1399 = vrot.lane.b32.xlu1 %v1304_v40, %s6459_s8  ;;  %v1589_v0 = vpop.permute.xlu0 %1588  ;;  %9424 = vst [vmem:[#allocation28_spill] sm:$0xff] %v7567_v10  ;;  %v7577_v40 = vsel %vm1093_vm5, %v1217_v18, %v1226_v8  ;;  %vm1250_vm6 = vcmp.ne.s16.totalorder %v7567_v10, 0  ;;  %v7582_v47 = vor.u32 %v1234_v23, %v1231_v60 }
  0xd2   : > { %v1674_v57 = vsel %vm1464_vm13, %v1639_v22, %v1589_v0  ;;  %9425 = vst [vmem:[#allocation29_spill] sm:$0xff] %v7577_v40  ;;  %vm9290_vm14 = vcmp.ne.s16.totalorder %v7577_v40, 0  ;;  %v1287_v60 = vsel %vm1250_vm6, %v7529_v44, 0 }
  0xd3   : > { %v1726_v45 = vrot.slane %v1674_v57, 4  ;;  %v1591_v59 = vpop.permute.xlu1 %1590  ;;  %1350 = vrot.lane.b32.xlu0 %v1285_v3, %s6458_s30  ;;  %9426 = vst [vmem:[#allocation30_spill] sm:$0xff] %v7582_v47  ;;  %v1306_v3 = vsel %vm1249_vm0, %v7529_v44, 0 }
  0xd4   : > { %v1676_v26 = vsel %vm1464_vm13, %v1642_v29, %v1591_v59  ;;  %v1288_v29 = vsel %vm9290_vm14, %v7557_v21, 0 }
  0xd5   : > { %v1728_v22 = vrot.slane %v1676_v26, 4  ;;  %1352 = vrot.lane.b32.xlu1 %v1286_v14, %s6458_s30  ;;  %v2358_v12 = vpop.permute.xlu0 %2357  ;;  %v1727_v0 = vsel %vm9287_vm3, %v1724_v63, %v1726_v45  ;;  %v2287_v63 = vsel %vm9281_vm8, %v7090_v2, 0  ;;  %v2288_v14 = vsel %vm9282_vm11, %v7129_v35, 0 }
  0xd6   : > { %6088 = vmatprep.mubr.msk.bf16.mxu0 %vm1735_vm7, %v1727_v0  ;;  %v7607_v2 = vsel %vm1093_vm5, %v1226_v8, %v7582_v47  ;;  %vm9428_vm8 = vcmp.ne.s16.totalorder %v6798_v1, 0  ;;  %v1307_v35 = vsel %vm1250_vm6, %v7557_v21, 0 }
  0xd7   : > { %v2360_v57 = vpop.permute.xlu1 %2359  ;;  %1401 = vrot.lane.b32.xlu0 %v1305_v4, %s6459_s8  ;;  %v1729_v18 = vsel %vm9287_vm3, %v1726_v45, %v1728_v22  ;;  %9427 = vst [vmem:[#allocation31_spill] sm:$0xff] %v7607_v2  ;;  %v2444_v45 = vsel %vm397_vm1, %v2287_v63, %v2358_v12  ;;  %v2289_v59 = vsel %vm9428_vm8, %v7248_v62, 0  ;;  %vm9334_vm11 = vcmp.ne.s16.totalorder %v7607_v2, 0  ;;  %v6415_v63 = vld [vmem:[#allocation2 + $0x80] sm:$0xff] }
  0xd8   : > { %6089 = vmatmul.mubr.msk.bf16.gmra.mrb[28].mxu0 %vm1735_vm7, %v1729_v18  ;;  %v2447_v22 = vsel %vm397_vm1, %v2288_v14, %v2360_v57  ;;  %vm9291_vm8 = vcmp.ne.s16.totalorder %v7582_v47, 0  ;;  %v1289_v49 = vsel %vm9334_vm11, %v6415_v63, 0  ;;  %vm9429_vm3 = vcmp.ne.s16.totalorder %v6830_v24, 0 }
  0xd9   : > { %1403 = vrot.lane.b32.xlu1 %v1306_v3, %s6459_s8  ;;  %v2362_v23 = vpop.permute.xlu0 %2361 }
  0xda   : > { %v2450_v3 = vsel %vm397_vm1, %v2289_v59, %v2362_v23 }
  0xdb   : > { %v2409_v26 = vpop.permute.xlu1 %2408  ;;  %1354 = vrot.lane.b32.xlu0 %v1287_v60, %s6458_s30  ;;  %v1308_v60 = vsel %vm9290_vm14, %v6415_v63, 0  ;;  %vm9430_vm14 = vcmp.ne.s16.totalorder %v6853_v16, 0 }
  0xdc   : > { %v2494_v4 = vsel %vm1464_vm13, %v2444_v45, %v2409_v26 }
  0xdd   : > { %v2530_v0 = vshrl.u32 %v2494_v4, 16  ;;  %v2533_v8 = vshll.u32 %v2494_v4, 16  ;;  %1356 = vrot.lane.b32.xlu1 %v1288_v29, %s6458_s30  ;;  %v2411_v12 = vpop.permute.xlu0 %2410 }
  0xde   : > { %v2496_v18 = vsel %vm1464_vm13, %v2447_v22, %v2411_v12  ;;  %v6416_v12 = vld [vmem:[#allocation2 + $0x88] sm:$0xf] }
  0xdf   : > { %v2532_v45 = vrot.slane %v2530_v0, 4  ;;  %v2535_v26 = vrot.slane %v2533_v8, 5  ;;  %v2537_v57 = vshrl.u32 %v2496_v18, 16  ;;  %v2540_v14 = vshll.u32 %v2496_v18, 16  ;;  %v2413_v4 = vpop.permute.xlu1 %2412  ;;  %1405 = vrot.lane.b32.xlu0 %v1307_v35, %s6459_s8 }
  0xe0   : > { %v2498_v29 = vsel %vm1464_vm13, %v2450_v3, %v2413_v4  ;;  %v1290_v0 = vsel %vm9291_vm8, %v6416_v12, 0  ;;  %v2290_v35 = vsel %vm9429_vm3, %v7210_v43, 0  ;;  %vm9431_vm3 = vcmask 1045504  }
  0xe1   : > { %v2539_v1 = vrot.slane %v2537_v57, 4  ;;  %v2542_v23 = vrot.slane %v2540_v14, 5  ;;  %v2545_v59 = vshrl.u32 %v2498_v29, 16  ;;  %1407 = vrot.lane.b32.xlu1 %v1308_v60, %s6459_s8  ;;  %v2364_v22 = vpop.permute.xlu0 %2363  ;;  %v2548_v8 = vshll.u32 %v2498_v29, 16  ;;  %v6417_v57 = vld [vmem:[#allocation2 + $0x88] sm:$0xff] }
  0xe2   : > { %v2536_v18 = vor.u32 %v2535_v26, %v2532_v45  ;;  %v2291_v60 = vsel %vm9430_vm14, %v7223_v13, 0  ;;  %v1309_v14 = vsel %vm9334_vm11, %v6417_v57, 0  ;;  %v2453_v29 = vsel %vm397_vm1, %v2290_v35, %v2364_v22  ;;  %v6418_v45 = vld [vmem:[#allocation2 + $0x90] sm:$0xf] }
  0xe3   : > { %v2543_v3 = vor.u32 %v2542_v23, %v2539_v1  ;;  %v2547_v4 = vrot.slane %v2545_v59, 4  ;;  %v2366_v28 = vpop.permute.xlu1 %2365  ;;  %1358 = vrot.lane.b32.xlu0 %v1289_v49, %s6458_s30  ;;  %v2550_v63 = vrot.slane %v2548_v8, 5  ;;  %v1310_v49 = vsel %vm9291_vm8, %v6418_v45, 0 }
  0xe4   : > { %v2456_v13 = vsel %vm397_vm1, %v2291_v60, %v2366_v28  ;;  %v3071_v22 = vsel %vm9431_vm3, %v7194_v41, 0  ;;  %vm9432_vm14 = vcmp.ne.s16.totalorder %v6876_v5, 0  ;;  %vm9433_vm3 = vcmp.ne.s16.totalorder %v6879_v6, 0 }
  0xe5   : > { %1360 = vrot.lane.b32.xlu1 %v1290_v0, %s6458_s30  ;;  %v2415_v43 = vpop.permute.xlu0 %2414  ;;  %v2544_v1 = vsel %vm1093_vm5, %v2536_v18, %v2543_v3  ;;  %v2551_v26 = vor.u32 %v2550_v63, %v2547_v4  ;;  %v2292_v60 = vsel %vm9432_vm14, %v7277_v61, 0  ;;  %vm9434_vm14 = vcmp.ne.s16.totalorder %v6927_v54, 0 }
  0xe6   : > { %v2500_v23 = vsel %vm1464_vm13, %v2453_v29, %v2415_v43  ;;  %6094 = vmatprep.mubr.msk.bf16.mxu0 %vm1735_vm7, %v2544_v1  ;;  %vm9446_vm8 = vcmp.ne.s16.totalorder %v7186_v30, 0 }
  0xe7   : > { %v2553_v59 = vshrl.u32 %v2500_v23, 16  ;;  %v2556_v12 = vshll.u32 %v2500_v23, 16  ;;  %v2417_v8 = vpop.permute.xlu1 %2416  ;;  %1409 = vrot.lane.b32.xlu0 %v1309_v14, %s6459_s8  ;;  %v2552_v35 = vsel %vm1093_vm5, %v2543_v3, %v2551_v26  ;;  %v2293_v3 = vsel %vm9433_vm3, %v7293_v9, 0 }
  0xe8   : > { %v2502_v0 = vsel %vm1464_vm13, %v2456_v13, %v2417_v8  ;;  %6095 = vmatmul.mubr.msk.bf16.vlgmr.msra.gmra.mrb[0].mxu0 %vm1735_vm7, %v2552_v35  ;;  %vm9435_vm3 = vcmp.ne.s16.totalorder %v6933_v56, 0 }
  0xe9   : > { %v2555_v18 = vrot.slane %v2553_v59, 4  ;;  %v2558_v4 = vrot.slane %v2556_v12, 5  ;;  %v2561_v63 = vshrl.u32 %v2502_v0, 16  ;;  %v2564_v57 = vshll.u32 %v2502_v0, 16  ;;  %1411 = vrot.lane.b32.xlu1 %v1310_v49, %s6459_s8  ;;  %v2368_v28 = vpop.permute.xlu0 %2367  ;;  %6127 = vmatpush3.bf16.msra.mxu0 %v3071_v22 }
  0xea   : > { %5381 = vmatprep.subr.bf16.mxu0 %v9415_v15  ;;  %v2459_v45 = vsel %vm397_vm1, %v2292_v60, %v2368_v28  ;;  %v2294_v28 = vsel %vm9434_vm14, %v7341_v27, 0  ;;  %vm9436_vm14 = vcmp.ne.s16.totalorder %v6957_v7, 0 }
  0xeb   : > { %v2559_v14 = vor.u32 %v2558_v4, %v2555_v18  ;;  %v2563_v41 = vrot.slane %v2561_v63, 4  ;;  %v2566_v29 = vrot.slane %v2564_v57, 5  ;;  %v2370_v43 = vpop.permute.xlu1 %2369 }
  0xec   : > { %v2462_v59 = vsel %vm397_vm1, %v2293_v3, %v2370_v43 }
  0xed   : > { %v2567_v1 = vor.u32 %v2566_v29, %v2563_v41  ;;  %v2419_v49 = vpop.permute.xlu0 %2418  ;;  %v2560_v23 = vsel %vm1093_vm5, %v2551_v26, %v2559_v14 }
  0xee   : > { %v2504_v13 = vsel %vm1464_vm13, %v2459_v45, %v2419_v49  ;;  %6098 = vmatprep.mubr.msk.bf16.mxu0 %vm1735_vm7, %v2560_v23 }
  0xef   : > { %v2569_v12 = vshrl.u32 %v2504_v13, 16  ;;  %v2572_v8 = vshll.u32 %v2504_v13, 16  ;;  %v2421_v22 = vpop.permute.xlu1 %2420  ;;  %v2568_v0 = vsel %vm1093_vm5, %v2559_v14, %v2567_v1  ;;  %v2295_v14 = vsel %vm9435_vm3, %v7353_v32, 0 }
  0xf0   : > { %v2506_v35 = vsel %vm1464_vm13, %v2462_v59, %v2421_v22  ;;  %6099 = vmatmul.mubr.msk.bf16.gmra.mrb[4].mxu0 %vm1735_vm7, %v2568_v0  ;;  %vm9437_vm3 = vcmp.ne.s16.totalorder %v6979_v33, 0 }
  0xf1   : > { %v2571_v18 = vrot.slane %v2569_v12, 4  ;;  %v2574_v4 = vrot.slane %v2572_v8, 5  ;;  %v2577_v63 = vshrl.u32 %v2506_v35, 16  ;;  %v2580_v57 = vshll.u32 %v2506_v35, 16  ;;  %v2372_v26 = vpop.permute.xlu0 %2371 }
  0xf2   : > { %v2465_v45 = vsel %vm397_vm1, %v2294_v28, %v2372_v26  ;;  %v2296_v26 = vsel %vm9436_vm14, %v7398_v31, 0  ;;  %vm9438_vm14 = vcmp.ne.s16.totalorder %v7006_v55, 0 }
  0xf3   : > { %v2575_v60 = vor.u32 %v2574_v4, %v2571_v18  ;;  %v2579_v41 = vrot.slane %v2577_v63, 4  ;;  %v2582_v29 = vrot.slane %v2580_v57, 5  ;;  %v2374_v43 = vpop.permute.xlu1 %2373 }
  0xf4   : > { %v2468_v59 = vsel %vm397_vm1, %v2295_v14, %v2374_v43 }
  0xf5   : > { %v2583_v3 = vor.u32 %v2582_v29, %v2579_v41  ;;  %v2423_v49 = vpop.permute.xlu0 %2422  ;;  %v2576_v23 = vsel %vm1093_vm5, %v2567_v1, %v2575_v60 }
  0xf6   : > { %v2508_v13 = vsel %vm1464_vm13, %v2465_v45, %v2423_v49  ;;  %6102 = vmatprep.mubr.msk.bf16.mxu0 %vm1735_vm7, %v2576_v23 }
  0xf7   : > { %v2585_v12 = vshrl.u32 %v2508_v13, 16  ;;  %v2588_v8 = vshll.u32 %v2508_v13, 16  ;;  %v2425_v22 = vpop.permute.xlu1 %2424  ;;  %v2584_v0 = vsel %vm1093_vm5, %v2575_v60, %v2583_v3  ;;  %v2297_v60 = vsel %vm9437_vm3, %v7421_v53, 0 }
  0xf8   : > { %v2510_v35 = vsel %vm1464_vm13, %v2468_v59, %v2425_v22  ;;  %6103 = vmatmul.mubr.msk.bf16.gmra.mrb[8].mxu0 %vm1735_vm7, %v2584_v0  ;;  %vm9439_vm3 = vcmp.ne.s16.totalorder %v7031_v11, 0 }
  0xf9   : > { %v2587_v18 = vrot.slane %v2585_v12, 4  ;;  %v2590_v4 = vrot.slane %v2588_v8, 5  ;;  %v2593_v63 = vshrl.u32 %v2510_v35, 16  ;;  %v2596_v57 = vshll.u32 %v2510_v35, 16  ;;  %v2376_v1 = vpop.permute.xlu0 %2375 }
  0xfa   : > { %v2471_v45 = vsel %vm397_vm1, %v2296_v26, %v2376_v1  ;;  %v2298_v1 = vsel %vm9438_vm14, %v7470_v17, 0  ;;  %vm9440_vm14 = vcmp.ne.s16.totalorder %v7055_v37, 0 }
  0xfb   : > { %v2591_v28 = vor.u32 %v2590_v4, %v2587_v18  ;;  %v2595_v41 = vrot.slane %v2593_v63, 4  ;;  %v2598_v29 = vrot.slane %v2596_v57, 5  ;;  %v2378_v43 = vpop.permute.xlu1 %2377 }
  0xfc   : > { %v2474_v59 = vsel %vm397_vm1, %v2297_v60, %v2378_v43 }
  0xfd   : > { %v2599_v14 = vor.u32 %v2598_v29, %v2595_v41  ;;  %v2427_v49 = vpop.permute.xlu0 %2426  ;;  %v2592_v23 = vsel %vm1093_vm5, %v2583_v3, %v2591_v28 }
  0xfe   : > { %v2512_v13 = vsel %vm1464_vm13, %v2471_v45, %v2427_v49  ;;  %6106 = vmatprep.mubr.msk.bf16.mxu0 %vm1735_vm7, %v2592_v23 }
  0xff   : > { %v2601_v12 = vshrl.u32 %v2512_v13, 16  ;;  %v2604_v8 = vshll.u32 %v2512_v13, 16  ;;  %v2429_v22 = vpop.permute.xlu1 %2428  ;;  %v2600_v0 = vsel %vm1093_vm5, %v2591_v28, %v2599_v14  ;;  %v2299_v28 = vsel %vm9439_vm3, %v7489_v42, 0 }
 0x100   : > { %v2514_v35 = vsel %vm1464_vm13, %v2474_v59, %v2429_v22  ;;  %6107 = vmatmul.mubr.msk.bf16.gmra.mrb[12].mxu0 %vm1735_vm7, %v2600_v0  ;;  %vm9441_vm3 = vcmp.ne.s16.totalorder %v7058_v38, 0 }
 0x101   : > { %v2603_v18 = vrot.slane %v2601_v12, 4  ;;  %v2606_v4 = vrot.slane %v2604_v8, 5  ;;  %v2609_v63 = vshrl.u32 %v2514_v35, 16  ;;  %v2612_v57 = vshll.u32 %v2514_v35, 16  ;;  %v2380_v3 = vpop.permute.xlu0 %2379 }
 0x102   : > { %v2477_v45 = vsel %vm397_vm1, %v2298_v1, %v2380_v3  ;;  %v2300_v3 = vsel %vm9440_vm14, %v7517_v20, 0  ;;  %vm9442_vm14 = vcmp.ne.s16.totalorder %v7088_v51, 0 }
 0x103   : > { %v2607_v26 = vor.u32 %v2606_v4, %v2603_v18  ;;  %v2611_v41 = vrot.slane %v2609_v63, 4  ;;  %v2614_v29 = vrot.slane %v2612_v57, 5  ;;  %v2382_v43 = vpop.permute.xlu1 %2381 }
 0x104   : > { %v2480_v59 = vsel %vm397_vm1, %v2299_v28, %v2382_v43 }
 0x105   : > { %v2615_v60 = vor.u32 %v2614_v29, %v2611_v41  ;;  %v2431_v49 = vpop.permute.xlu0 %2430  ;;  %v2608_v23 = vsel %vm1093_vm5, %v2599_v14, %v2607_v26 }
 0x106   : > { %v2516_v13 = vsel %vm1464_vm13, %v2477_v45, %v2431_v49  ;;  %6110 = vmatprep.mubr.msk.bf16.mxu0 %vm1735_vm7, %v2608_v23 }
 0x107   : > { %v2617_v12 = vshrl.u32 %v2516_v13, 16  ;;  %v2620_v8 = vshll.u32 %v2516_v13, 16  ;;  %v2433_v22 = vpop.permute.xlu1 %2432  ;;  %v2616_v0 = vsel %vm1093_vm5, %v2607_v26, %v2615_v60  ;;  %v2301_v26 = vsel %vm9441_vm3, %v7529_v44, 0 }
 0x108   : > { %v2518_v35 = vsel %vm1464_vm13, %v2480_v59, %v2433_v22  ;;  %6111 = vmatmul.mubr.msk.bf16.gmra.mrb[16].mxu0 %vm1735_vm7, %v2616_v0  ;;  %vm9443_vm3 = vcmp.ne.s16.totalorder %v7064_v46, 0 }
 0x109   : > { %v2619_v18 = vrot.slane %v2617_v12, 4  ;;  %v2622_v4 = vrot.slane %v2620_v8, 5  ;;  %v2625_v63 = vshrl.u32 %v2518_v35, 16  ;;  %v2628_v57 = vshll.u32 %v2518_v35, 16  ;;  %v2384_v14 = vpop.permute.xlu0 %2383 }
 0x10a   : > { %v2483_v45 = vsel %vm397_vm1, %v2300_v3, %v2384_v14  ;;  %v1949_v14 = vld [vmem:[#allocation2 + $0x80] sm:$0x1f]  ;;  %v2302_v3 = vsel %vm9442_vm14, %v7557_v21, 0  ;;  %vm9444_vm14 = vcmp.ne.s16.totalorder %v7115_v39, 0 }
 0x10b   : > { %v2623_v1 = vor.u32 %v2622_v4, %v2619_v18  ;;  %v2627_v41 = vrot.slane %v2625_v63, 4  ;;  %v2630_v29 = vrot.slane %v2628_v57, 5  ;;  %v2386_v43 = vpop.permute.xlu1 %2385 }
 0x10c   : > { %v2486_v59 = vsel %vm397_vm1, %v2301_v26, %v2386_v43 }
 0x10d   : > { %v2631_v28 = vor.u32 %v2630_v29, %v2627_v41  ;;  %v2435_v49 = vpop.permute.xlu0 %2434  ;;  %v2624_v23 = vsel %vm1093_vm5, %v2615_v60, %v2623_v1 }
 0x10e   : > { %v2520_v13 = vsel %vm1464_vm13, %v2483_v45, %v2435_v49  ;;  %6114 = vmatprep.mubr.msk.bf16.mxu0 %vm1735_vm7, %v2624_v23 }
 0x10f   : > { %v2633_v12 = vshrl.u32 %v2520_v13, 16  ;;  %v2636_v8 = vshll.u32 %v2520_v13, 16  ;;  %v2437_v22 = vpop.permute.xlu1 %2436  ;;  %v2632_v0 = vsel %vm1093_vm5, %v2623_v1, %v2631_v28  ;;  %v2303_v1 = vsel %vm9443_vm3, %v1949_v14, 0 }
 0x110   : > { %v2522_v35 = vsel %vm1464_vm13, %v2486_v59, %v2437_v22  ;;  %6115 = vmatmul.mubr.msk.bf16.gmra.mrb[20].mxu0 %vm1735_vm7, %v2632_v0  ;;  %vm9445_vm3 = vcmp.ne.s16.totalorder %v7159_v52, 0 }
 0x111   : > { %v2635_v18 = vrot.slane %v2633_v12, 4  ;;  %v2638_v4 = vrot.slane %v2636_v8, 5  ;;  %v2641_v63 = vshrl.u32 %v2522_v35, 16  ;;  %v2644_v57 = vshll.u32 %v2522_v35, 16  ;;  %v2388_v60 = vpop.permute.xlu0 %2387 }
 0x112   : > { %v2489_v49 = vsel %vm397_vm1, %v2302_v3, %v2388_v60 }
 0x113   : > { %v2639_v41 = vor.u32 %v2638_v4, %v2635_v18  ;;  %v2643_v29 = vrot.slane %v2641_v63, 4  ;;  %v2646_v43 = vrot.slane %v2644_v57, 5  ;;  %v2390_v26 = vpop.permute.xlu1 %2389 }
 0x114   : > { %v2492_v12 = vsel %vm397_vm1, %v2303_v1, %v2390_v26 }
 0x115   : > { %v2647_v45 = vor.u32 %v2646_v43, %v2643_v29  ;;  %v2439_v23 = vpop.permute.xlu0 %2438  ;;  %v2640_v13 = vsel %vm1093_vm5, %v2631_v28, %v2639_v41  ;;  %v900_v28 = vld [vmem:[#allocation2] sm:$0xf8] }
 0x116   : > { %v2524_v59 = vsel %vm1464_vm13, %v2489_v49, %v2439_v23  ;;  %6118 = vmatprep.mubr.msk.bf16.mxu0 %vm1735_vm7, %v2640_v13  ;;  %v1254_v26 = vsel %vm9444_vm14, %v900_v28, 0  ;;  %v6419_v13 = vld [vmem:[#allocation2 + $0x8] sm:$0xff] }
 0x117   : > { %v2649_v8 = vshrl.u32 %v2524_v59, 16  ;;  %v2652_v22 = vshll.u32 %v2524_v59, 16  ;;  %v2441_v0 = vpop.permute.xlu1 %2440  ;;  %v2648_v35 = vsel %vm1093_vm5, %v2639_v41, %v2647_v45  ;;  %v1255_v59 = vsel %vm9445_vm3, %v6419_v13, 0 }
 0x118   : > { %v2526_v18 = vsel %vm1464_vm13, %v2492_v12, %v2441_v0  ;;  %6119 = vmatmul.mubr.msk.bf16.gmra.mrb[24].mxu0 %vm1735_vm7, %v2648_v35  ;;  %vm9450_vm3 = vsmask.f32 4352 }
 0x119   : > { %v2651_v4 = vrot.slane %v2649_v8, 4  ;;  %v2654_v63 = vrot.slane %v2652_v22, 5  ;;  %v2657_v57 = vshrl.u32 %v2526_v18, 16  ;;  %v2660_v60 = vshll.u32 %v2526_v18, 16  ;;  %v1329_v14 = vpop.permute.xlu0 %1328 }
 0x11a   : > { %v1415_v12 = vsel %vm397_vm1, %v1254_v26, %v1329_v14  ;;  %v1256_v8 = vsel %vm9446_vm8, %v7248_v62, 0  ;;  %vm9447_vm8 = vcmp.ne.s16.totalorder %v7219_v25, 0 }
 0x11b   : > { %v2655_v3 = vor.u32 %v2654_v63, %v2651_v4  ;;  %v2659_v29 = vrot.slane %v2657_v57, 4  ;;  %v2662_v43 = vrot.slane %v2660_v60, 5  ;;  %v1331_v49 = vpop.permute.xlu1 %1330 }
 0x11c   : > { %v1418_v18 = vsel %vm397_vm1, %v1255_v59, %v1331_v49  ;;  %v6420_v59 = vld [vmem:[#allocation2 + $0x18] sm:$0xff] }
 0x11d   : > { %v2663_v1 = vor.u32 %v2662_v43, %v2659_v29  ;;  %v1333_v23 = vpop.permute.xlu0 %1332  ;;  %v2656_v41 = vsel %vm1093_vm5, %v2647_v45, %v2655_v3 }
 0x11e   : > { %6122 = vmatprep.mubr.msk.bf16.mxu0 %vm1735_vm7, %v2656_v41  ;;  %v1421_v57 = vsel %vm397_vm1, %v1256_v8, %v1333_v23 }
 0x11f   : > { %v1380_v22 = vpop.permute.xlu1 %1379  ;;  %v2664_v0 = vsel %vm1093_vm5, %v2655_v3, %v2663_v1 }
 0x120   : > { %v1466_v35 = vsel %vm1464_vm13, %v1415_v12, %v1380_v22  ;;  %6123 = vmatmul.mubr.msk.bf16.gmra.mrb[28].mxu0 %vm1735_vm7, %v2664_v0  ;;  %v1257_v12 = vsel %vm9447_vm8, %v6420_v59, 0  ;;  %vm9451_vm8 = vmmov %vm9450_vm3 }
 0x121   : > { %v2882_v45 = vshrl.u32 %v1466_v35, 16  ;;  %v2885_v4 = vshll.u32 %v1466_v35, 16  ;;  %v1382_v63 = vpop.permute.xlu0 %1381 }
 0x122   : > { %v1468_v60 = vsel %vm1464_vm13, %v1418_v18, %v1382_v63  ;;  %v6421_v18 = vld [vmem:[#allocation2 + $0x20] sm:$0xff] }
 0x123   : > { %v2884_v28 = vrot.slane %v2882_v45, 3  ;;  %v2887_v14 = vrot.slane %v2885_v4, 4  ;;  %v2889_v29 = vshrl.u32 %v1468_v60, 16  ;;  %v2892_v62 = vshll.u32 %v1468_v60, 16  ;;  %v1384_v43 = vpop.permute.xlu1 %1383  ;;  %v9448_v45 = vld [vmem:[#allocation21_spill] sm:$0xff] }
 0x124   : > { %v1470_v3 = vsel %vm1464_vm13, %v1421_v57, %v1384_v43  ;;  %vm9449_vm14 = vcmp.ne.s16.totalorder %v9448_v45, 0 }
 0x125   : > { %v2891_v26 = vrot.slane %v2889_v29, 3  ;;  %v2894_v1 = vrot.slane %v2892_v62, 4  ;;  %v2897_v41 = vshrl.u32 %v1470_v3, 16  ;;  %v1335_v49 = vpop.permute.xlu0 %1334  ;;  %v2900_v13 = vshll.u32 %v1470_v3, 16 }
 0x126   : > { %v2888_v22 = vor.u32 %v2887_v14, %v2884_v28  ;;  %v1258_v4 = vsel %vm9449_vm14, %v6421_v18, 0  ;;  %v1424_v63 = vsel %vm397_vm1, %v1257_v12, %v1335_v49 }
 0x127   : > { %v2895_v23 = vor.u32 %v2894_v1, %v2891_v26  ;;  %v2899_v8 = vrot.slane %v2897_v41, 3  ;;  %v1337_v0 = vpop.permute.xlu1 %1336  ;;  %v2902_v35 = vrot.slane %v2900_v13, 4  ;;  %v9452_v41 = vld [vmem:[#allocation22_spill] sm:$0xff] }
 0x128   : > { %v1427_v28 = vsel %vm397_vm1, %v1258_v4, %v1337_v0  ;;  %vm9453_vm14 = vcmp.ne.s16.totalorder %v9452_v41, 0 }
 0x129   : > { %v1386_v57 = vpop.permute.xlu0 %1385  ;;  %v2896_v60 = vsel %vm9450_vm3, %v2888_v22, %v2895_v23  ;;  %v2903_v29 = vor.u32 %v2902_v35, %v2899_v8  ;;  %v1259_v49 = vsel %vm9453_vm14, %v7277_v61, 0  ;;  %v1260_v35 = vsel %vm1243_vm10, %v7293_v9, 0  ;;  %vm9457_vm14 = vmmov %vm9450_vm3 }
 0x12a   : > { %v1472_v62 = vsel %vm1464_vm13, %v1424_v63, %v1386_v57  ;;  %6128 = vmatprep.mubr.msk.bf16.mxu0 %vm1735_vm7, %v2896_v60 }
 0x12b   : > { %v2905_v14 = vshrl.u32 %v1472_v62, 16  ;;  %v2908_v43 = vshll.u32 %v1472_v62, 16  ;;  %v1388_v3 = vpop.permute.xlu1 %1387  ;;  %v2904_v1 = vsel %vm9451_vm8, %v2895_v23, %v2903_v29  ;;  %vm9455_vm8 = vmmov %vm9450_vm3 }
 0x12c   : > { %v1474_v26 = vsel %vm1464_vm13, %v1427_v28, %v1388_v3  ;;  %6129 = vmatmul.mubr.msk.bf16.vlgmr.msra.gmra.mrb[0].mxu0 %vm1735_vm7, %v2904_v1 }
 0x12d   : > { %v2907_v13 = vrot.slane %v2905_v14, 3  ;;  %v2910_v59 = vrot.slane %v2908_v43, 4  ;;  %v2913_v12 = vshrl.u32 %v1474_v26, 16  ;;  %v2916_v22 = vshll.u32 %v1474_v26, 16  ;;  %v1339_v8 = vpop.permute.xlu0 %1338 }
 0x12e   : > { %v1430_v23 = vsel %vm397_vm1, %v1259_v49, %v1339_v8  ;;  %v1261_v49 = vsel %vm1244_vm4, %v7341_v27, 0 }
 0x12f   : > { %v2911_v18 = vor.u32 %v2910_v59, %v2907_v13  ;;  %v2915_v4 = vrot.slane %v2913_v12, 3  ;;  %v2918_v63 = vrot.slane %v2916_v22, 4  ;;  %v1341_v57 = vpop.permute.xlu1 %1340 }
 0x130   : > { %v1433_v61 = vsel %vm397_vm1, %v1260_v35, %v1341_v57  ;;  %v1262_v35 = vsel %vm1245_vm15, %v7353_v32, 0 }
 0x131   : > { %v2919_v60 = vor.u32 %v2918_v63, %v2915_v4  ;;  %v1390_v62 = vpop.permute.xlu0 %1389  ;;  %v2912_v28 = vsel %vm9450_vm3, %v2903_v29, %v2911_v18 }
 0x132   : > { %v1476_v14 = vsel %vm1464_vm13, %v1430_v23, %v1390_v62  ;;  %6132 = vmatprep.mubr.msk.bf16.mxu0 %vm1735_vm7, %v2912_v28 }
 0x133   : > { %v2921_v43 = vshrl.u32 %v1476_v14, 16  ;;  %v2924_v3 = vshll.u32 %v1476_v14, 16  ;;  %v1392_v26 = vpop.permute.xlu1 %1391  ;;  %v2920_v9 = vsel %vm9455_vm8, %v2911_v18, %v2919_v60  ;;  %vm9458_vm8 = vmmov %vm9450_vm3 }
 0x134   : > { %v1478_v1 = vsel %vm1464_vm13, %v1433_v61, %v1392_v26  ;;  %6133 = vmatmul.mubr.msk.bf16.gmra.mrb[4].mxu0 %vm1735_vm7, %v2920_v9 }
 0x135   : > { %v2923_v13 = vrot.slane %v2921_v43, 3  ;;  %v2926_v59 = vrot.slane %v2924_v3, 4  ;;  %v2929_v12 = vshrl.u32 %v1478_v1, 16  ;;  %v2932_v22 = vshll.u32 %v1478_v1, 16  ;;  %v1343_v29 = vpop.permute.xlu0 %1342 }
 0x136   : > { %v1436_v23 = vsel %vm397_vm1, %v1261_v49, %v1343_v29  ;;  %v1263_v1 = vsel %vm1246_vm12, %v7398_v31, 0 }
 0x137   : > { %v2927_v4 = vor.u32 %v2926_v59, %v2923_v13  ;;  %v2931_v63 = vrot.slane %v2929_v12, 3  ;;  %v2934_v18 = vrot.slane %v2932_v22, 4  ;;  %v1345_v57 = vpop.permute.xlu1 %1344  ;;  %v1264_v22 = vsel %vm1247_vm2, %v7421_v53, 0 }
 0x138   : > { %v1439_v27 = vsel %vm397_vm1, %v1262_v35, %v1345_v57 }
 0x139   : > { %v2935_v61 = vor.u32 %v2934_v18, %v2931_v63  ;;  %v1394_v62 = vpop.permute.xlu0 %1393  ;;  %v2928_v28 = vsel %vm9457_vm14, %v2919_v60, %v2927_v4  ;;  %vm9459_vm14 = vmmov %vm9450_vm3 }
 0x13a   : > { %v1480_v14 = vsel %vm1464_vm13, %v1436_v23, %v1394_v62  ;;  %6136 = vmatprep.mubr.msk.bf16.mxu0 %vm1735_vm7, %v2928_v28 }
 0x13b   : > { %v2937_v43 = vshrl.u32 %v1480_v14, 16  ;;  %v2940_v3 = vshll.u32 %v1480_v14, 16  ;;  %v1396_v26 = vpop.permute.xlu1 %1395  ;;  %v2936_v32 = vsel %vm9450_vm3, %v2927_v4, %v2935_v61 }
 0x13c   : > { %v1482_v9 = vsel %vm1464_vm13, %v1439_v27, %v1396_v26  ;;  %6137 = vmatmul.mubr.msk.bf16.gmra.mrb[8].mxu0 %vm1735_vm7, %v2936_v32  ;;  %v1265_v26 = vsel %vm1248_vm9, %v7470_v17, 0 }
 0x13d   : > { %v2939_v49 = vrot.slane %v2937_v43, 3  ;;  %v2942_v13 = vrot.slane %v2940_v3, 4  ;;  %v2945_v59 = vshrl.u32 %v1482_v9, 16  ;;  %v2948_v12 = vshll.u32 %v1482_v9, 16  ;;  %v1347_v60 = vpop.permute.xlu0 %1346 }
 0x13e   : > { %v1442_v63 = vsel %vm397_vm1, %v1263_v1, %v1347_v60 }
 0x13f   : > { %v2943_v29 = vor.u32 %v2942_v13, %v2939_v49  ;;  %v2947_v35 = vrot.slane %v2945_v59, 3  ;;  %v2950_v4 = vrot.slane %v2948_v12, 4  ;;  %v1349_v18 = vpop.permute.xlu1 %1348  ;;  %v1266_v13 = vsel %vm1249_vm0, %v7489_v42, 0 }
 0x140   : > { %v1445_v31 = vsel %vm397_vm1, %v1264_v22, %v1349_v18 }
 0x141   : > { %v2951_v23 = vor.u32 %v2950_v4, %v2947_v35  ;;  %v1398_v57 = vpop.permute.xlu0 %1397  ;;  %v2944_v27 = vsel %vm9458_vm8, %v2935_v61, %v2943_v29  ;;  %vm9460_vm8 = vmmov %vm9450_vm3 }
 0x142   : > { %v1484_v62 = vsel %vm1464_vm13, %v1442_v63, %v1398_v57  ;;  %6140 = vmatprep.mubr.msk.bf16.mxu0 %vm1735_vm7, %v2944_v27 }
 0x143   : > { %v2953_v28 = vshrl.u32 %v1484_v62, 16  ;;  %v2956_v14 = vshll.u32 %v1484_v62, 16  ;;  %v1400_v43 = vpop.permute.xlu1 %1399  ;;  %v2952_v53 = vsel %vm9459_vm14, %v2943_v29, %v2951_v23  ;;  %vm9461_vm14 = vcmp.ne.s16.totalorder %v7577_v40, 0 }
 0x144   : > { %v1486_v3 = vsel %vm1464_vm13, %v1445_v31, %v1400_v43  ;;  %6141 = vmatmul.mubr.msk.bf16.gmra.mrb[12].mxu0 %vm1735_vm7, %v2952_v53 }
 0x145   : > { %v2955_v32 = vrot.slane %v2953_v28, 3  ;;  %v2958_v9 = vrot.slane %v2956_v14, 4  ;;  %v2961_v1 = vshrl.u32 %v1486_v3, 16  ;;  %v2964_v49 = vshll.u32 %v1486_v3, 16  ;;  %v1351_v61 = vpop.permute.xlu0 %1350 }
 0x146   : > { %v1448_v22 = vsel %vm397_vm1, %v1265_v26, %v1351_v61  ;;  %v1267_v28 = vsel %vm1250_vm6, %v7517_v20, 0  ;;  %v1268_v26 = vsel %vm9461_vm14, %v7529_v44, 0  ;;  %vm9463_vm14 = vcmp.ne.s16.totalorder %v7582_v47, 0 }
 0x147   : > { %v2959_v59 = vor.u32 %v2958_v9, %v2955_v32  ;;  %v2963_v12 = vrot.slane %v2961_v1, 3  ;;  %v2966_v60 = vrot.slane %v2964_v49, 4  ;;  %v1353_v29 = vpop.permute.xlu1 %1352 }
 0x148   : > { %v1451_v17 = vsel %vm397_vm1, %v1266_v13, %v1353_v29 }
 0x149   : > { %v2967_v35 = vor.u32 %v2966_v60, %v2963_v12  ;;  %v1402_v4 = vpop.permute.xlu0 %1401  ;;  %v2960_v63 = vsel %vm9450_vm3, %v2951_v23, %v2959_v59 }
 0x14a   : > { %v1488_v18 = vsel %vm1464_vm13, %v1448_v22, %v1402_v4  ;;  %6144 = vmatprep.mubr.msk.bf16.mxu0 %vm1735_vm7, %v2960_v63  ;;  %v1269_v63 = vsel %vm9334_vm11, %v7557_v21, 0 }
 0x14b   : > { %v2969_v31 = vshrl.u32 %v1488_v18, 16  ;;  %v2972_v57 = vshll.u32 %v1488_v18, 16  ;;  %v1404_v27 = vpop.permute.xlu1 %1403  ;;  %v2968_v42 = vsel %vm9460_vm8, %v2959_v59, %v2967_v35  ;;  %vm9462_vm8 = vmmov %vm9450_vm3 }
 0x14c   : > { %v1490_v62 = vsel %vm1464_vm13, %v1451_v17, %v1404_v27  ;;  %6145 = vmatmul.mubr.msk.bf16.gmra.mrb[16].mxu0 %vm1735_vm7, %v2968_v42  ;;  %v1270_v42 = vsel %vm9463_vm14, %v7551_v58, 0 }
 0x14d   : > { %v2971_v14 = vrot.slane %v2969_v31, 3  ;;  %v2974_v43 = vrot.slane %v2972_v57, 4  ;;  %v2977_v53 = vshrl.u32 %v1490_v62, 16  ;;  %v2980_v3 = vshll.u32 %v1490_v62, 16  ;;  %v1355_v23 = vpop.permute.xlu0 %1354 }
 0x14e   : > { %v1454_v49 = vsel %vm397_vm1, %v1267_v28, %v1355_v23 }
 0x14f   : > { %v2975_v32 = vor.u32 %v2974_v43, %v2971_v14  ;;  %v2979_v9 = vrot.slane %v2977_v53, 3  ;;  %v2982_v1 = vrot.slane %v2980_v3, 4  ;;  %v1357_v61 = vpop.permute.xlu1 %1356 }
 0x150   : > { %v1457_v20 = vsel %vm397_vm1, %v1268_v26, %v1357_v61 }
 0x151   : > { %v2983_v13 = vor.u32 %v2982_v1, %v2979_v9  ;;  %v1406_v59 = vpop.permute.xlu0 %1405  ;;  %v2976_v12 = vsel %vm9450_vm3, %v2967_v35, %v2975_v32 }
 0x152   : > { %v1492_v60 = vsel %vm1464_vm13, %v1454_v49, %v1406_v59  ;;  %6148 = vmatprep.mubr.msk.bf16.mxu0 %vm1735_vm7, %v2976_v12 }
 0x153   : > { %v2985_v22 = vshrl.u32 %v1492_v60, 16  ;;  %v2988_v29 = vshll.u32 %v1492_v60, 16  ;;  %v1408_v17 = vpop.permute.xlu1 %1407  ;;  %v2984_v44 = vsel %vm9462_vm8, %v2975_v32, %v2983_v13  ;;  %vm9464_vm8 = vmmov %vm9450_vm3 }
 0x154   : > { %v1494_v4 = vsel %vm1464_vm13, %v1457_v20, %v1408_v17  ;;  %6149 = vmatmul.mubr.msk.bf16.gmra.mrb[20].mxu0 %vm1735_vm7, %v2984_v44 }
 0x155   : > { %v2987_v18 = vrot.slane %v2985_v22, 3  ;;  %v2990_v31 = vrot.slane %v2988_v29, 4  ;;  %v2993_v57 = vshrl.u32 %v1494_v4, 16  ;;  %v2996_v27 = vshll.u32 %v1494_v4, 16  ;;  %v1359_v35 = vpop.permute.xlu0 %1358 }
 0x156   : > { %v1460_v43 = vsel %vm397_vm1, %v1269_v63, %v1359_v35  ;;  %v6365_v63 = vld [vmem:[%s9244_s4 + $0x60] sm:$0xff]   ;;  %v6370_v35 = vld [vmem:[%s9244_s4 + $0x88] sm:$0xff]  }
 0x157   : > { %v2991_v62 = vor.u32 %v2990_v31, %v2987_v18  ;;  %v2995_v28 = vrot.slane %v2993_v57, 3  ;;  %v2998_v14 = vrot.slane %v2996_v27, 4  ;;  %v1361_v53 = vpop.permute.xlu1 %1360  ;;  %4033 = vmatpush1.bf16.msra.mxu1 %v6365_v63  ;;  %v6366_v18 = vld [vmem:[%s9244_s4 + $0x68] sm:$0xff]   ;;  %v6367_v31 = vld [vmem:[%s9244_s4 + $0x70] sm:$0xff]   ;;  %v6368_v57 = vld [vmem:[%s9244_s4 + $0x78] sm:$0xff]  }
 0x158   : > { %v1463_v21 = vsel %vm397_vm1, %v1270_v42, %v1361_v53  ;;  %vm9465_vm1 = vmmov %vm9450_vm3  ;;  %4034 = vmatprep.subr.bf16.mxu1 %v9415_v15  ;;  %v6369_v27 = vld [vmem:[%s9244_s4 + $0x80] sm:$0xff]   ;;  %v6371_v42 = vld [vmem:[%s9244_s4 + $0x90] sm:$0xff]  }
 0x159   : > { %v2999_v3 = vor.u32 %v2998_v14, %v2995_v28  ;;  %v1410_v23 = vpop.permute.xlu0 %1409  ;;  %v2992_v26 = vsel %vm9450_vm3, %v2983_v13, %v2991_v62  ;;  %vm9466_vm14 = vmmov %vm9465_vm1  ;;  %vm3376_vm3 = vcmask 523264   ;;  %v6373_v28 = vld [vmem:[%s9244_s4 + $0xa0] sm:$0xff]  }
 0x15a   : > { %v1496_v32 = vsel %vm1464_vm13, %v1460_v43, %v1410_v23  ;;  %6152 = vmatprep.mubr.msk.bf16.mxu0 %vm1735_vm7, %v2992_v26  ;;  %3377 = vst.msk [vmem:[#allocation3] sm:$0xff] %vm3376_vm3, %v9415_v15  ;;  %3382 = vst.msk [vmem:[#allocation3 + $0x90] sm:$0xff] %vm3376_vm3, %v9415_v15  ;;  %v7904_v14 = vld [vmem:[%s9242_s2] ss:$0 sm:$0xff]  ;;  %v6374_v43 = vld [vmem:[%s9244_s4 + $0xa8] sm:$0xff]  }
 0x15b   : > { %v3001_v9 = vshrl.u32 %v1496_v32, 16  ;;  %v3004_v1 = vshll.u32 %v1496_v32, 16  ;;  %v1412_v49 = vpop.permute.xlu1 %1411  ;;  %v3000_v58 = vsel %vm9464_vm8, %v2991_v62, %v2999_v3  ;;  %vm3378_vm8 = vcmask 519168   ;;  %4035 = vmatpush1.bf16.msra.mxu1 %v6366_v18  ;;  %v6372_v62 = vld [vmem:[%s9244_s4 + $0x98] sm:$0xff]  }
 0x15c   : > { %v1498_v61 = vsel %vm1464_vm13, %v1463_v21, %v1412_v49  ;;  %6153 = vmatmul.mubr.msk.bf16.gmra.mrb[24].mxu0 %vm1735_vm7, %v3000_v58  ;;  %vm3380_vm13 = vcmask 523268   ;;  %3379 = vst.msk [vmem:[#allocation3 + $0x8] sm:$0xf] %vm3378_vm8, %v9415_v15  ;;  %4036 = vmatprep.subr.bf16.mxu1 %v9415_v15  ;;  %v6375_v58 = vld [vmem:[%s9244_s4 + $0xb0] sm:$0xff]  }
 0x15d   : > { %v3003_v20 = vrot.slane %v3001_v9, 3  ;;  %v3006_v59 = vrot.slane %v3004_v1, 4  ;;  %v3009_v12 = vshrl.u32 %v1498_v61, 16  ;;  %v3012_v60 = vshll.u32 %v1498_v61, 16  ;;  %3381 = vst.msk [vmem:[#allocation3 + $0x88] sm:$0xf0] %vm3380_vm13, %v9415_v15 }
 0x15f   : > { %v3007_v22 = vor.u32 %v3006_v59, %v3003_v20  ;;  %v3011_v29 = vrot.slane %v3009_v12, 3  ;;  %v3014_v13 = vrot.slane %v3012_v60, 4  ;;  %4037 = vmatpush1.bf16.msra.mxu1 %v6367_v31 }
 0x160   : > { %4038 = vmatprep.subr.bf16.mxu1 %v9415_v15 }
 0x161   : > { %v3015_v17 = vor.u32 %v3014_v13, %v3011_v29  ;;  %v3008_v44 = vsel %vm9465_vm1, %v2999_v3, %v3007_v22  ;;  %v7913_v3 = vld [vmem:[%s9243_s3] ss:$0 sm:$0xff] }
 0x162   : > { %6156 = vmatprep.mubr.msk.bf16.mxu0 %vm1735_vm7, %v3008_v44 }
 0x163   : > { %v3016_v4 = vsel %vm9466_vm14, %v3007_v22, %v3015_v17  ;;  %4039 = vmatpush1.bf16.msra.mxu1 %v6368_v57 }
 0x164   : > { %6157 = vmatmul.mubr.msk.bf16.gmra.mrb[28].mxu0 %vm1735_vm7, %v3016_v4  ;;  %4040 = vmatprep.subr.bf16.mxu1 %v9415_v15  ;;  %vm9467_vm7 = vcmask 1043456  }
 0x165   : > { %vm9468_vm1 = vmmov %vm9467_vm7 }
 0x166   : > { %vm9469_vm14 = vmmov %vm9468_vm1 }
 0x167   : > { %4041 = vmatpush1.bf16.msra.mxu1 %v6369_v27 }
 0x168   : > { %4042 = vmatprep.subr.bf16.mxu1 %v9415_v15 }
 0x16b   : > { %4043 = vmatpush1.bf16.msra.mxu1 %v6370_v35 }
 0x16c   : > { %4044 = vmatprep.subr.bf16.mxu1 %v9415_v15 }
 0x16f   : > { %4045 = vmatpush1.bf16.msra.mxu1 %v6371_v42 }
 0x170   : > { %4046 = vmatprep.subr.bf16.mxu1 %v9415_v15 }
 0x173   : > { %4047 = vmatpush1.bf16.msra.mxu1 %v6372_v62 }
 0x174   : > { %4048 = vmatprep.subr.bf16.mxu1 %v9415_v15 }
 0x177   : > { %4049 = vmatpush1.bf16.msra.mxu1 %v6373_v28  ;;  %v6376_v28 = vld [vmem:[%s9244_s4 + $0xb8] sm:$0xff]  }
 0x178   : > { %4050 = vmatprep.subr.bf16.mxu1 %v9415_v15 }
 0x17b   : > { %4051 = vmatpush1.bf16.msra.mxu1 %v6374_v43 }
 0x17c   : > { %4052 = vmatprep.subr.bf16.mxu1 %v9415_v15 }
 0x17f   : > { %4053 = vmatpush1.bf16.msra.mxu1 %v6375_v58 }
 0x180   : > { %4054 = vmatprep.subr.bf16.mxu1 %v9415_v15 }
 0x183   : > { %4055 = vmatpush1.bf16.msra.mxu1 %v6376_v28 }
 0x184   : > { %4797 = vmatprep.subr.bf16.mxu1 %v9415_v15 }
 0x1ff   : > { %v6130_v53 = vpop.f32.mrb[0].mxu0 }
 0x200   : > { %v3275_v21 = vmul.f32 %v6130_v53, %v7904_v14  ;;  %v3107_v23 = vpop.f32.mrb[1].mxu0 }
 0x201   : > { %v3273_v26 = vmul.f32 %v7904_v14, %v3107_v23  ;;  %v6131_v32 = vpop.f32.mrb[2].mxu0 }
 0x202   : > { %v3314_v9 = vadd.f32 %v7913_v3, %v3275_v21  ;;  %v3276_v1 = vmul.f32 %v6131_v32, %v7904_v14  ;;  %v3110_v49 = vpop.f32.mrb[3].mxu0 }
 0x203   : > { %v3312_v61 = vadd.f32 %v7913_v3, %v3273_v26  ;;  %v3274_v20 = vmul.f32 %v7904_v14, %v3110_v49 }
 0x204   : > { %v3315_v59 = vadd.f32 %v7913_v3, %v3276_v1  ;;  %v3346_v60 = vmax.f32 %v3314_v9, 0.0 }
 0x205   : > { %v3313_v12 = vadd.f32 %v7913_v3, %v3274_v20  ;;  %v3344_v29 = vmax.f32 %v3312_v61, 0.0 }
 0x206   : > { %v3347_v22 = vmax.f32 %v3315_v59, 0.0 }
 0x207   : > { %v3345_v13 = vmax.f32 %v3313_v12, 0.0  ;;  %v6134_v17 = vpop.f32.mrb[4].mxu0 }
 0x208   : > { %v3384_v44 = vpack.c.bf16 %v3347_v22, %v3346_v60  ;;  %v3279_v4 = vmul.f32 %v6134_v17, %v7904_v14  ;;  %v3123_v63 = vpop.f32.mrb[5].mxu0 }
 0x209   : > { %v3383_v18 = vpack.c.bf16 %v3345_v13, %v3344_v29  ;;  %v3277_v31 = vmul.f32 %v7904_v14, %v3123_v63  ;;  %v6135_v57 = vpop.f32.mrb[6].mxu0 }
 0x20a   : > { %v3416_v27 = vrot.slane %v3384_v44, 4  ;;  %v3318_v35 = vadd.f32 %v7913_v3, %v3279_v4  ;;  %v3280_v42 = vmul.f32 %v6135_v57, %v7904_v14  ;;  %v3126_v62 = vpop.f32.mrb[7].mxu0 }
 0x20b   : > { %v3415_v43 = vrot.slane %v3383_v18, 4  ;;  %v3316_v53 = vadd.f32 %v7913_v3, %v3277_v31  ;;  %v3278_v21 = vmul.f32 %v7904_v14, %v3126_v62 }
 0x20c   : > { %v3319_v23 = vadd.f32 %v7913_v3, %v3280_v42  ;;  %v3350_v9 = vmax.f32 %v3318_v35, 0.0 }
 0x20d   : > { %v3417_v26 = vsel %vm9467_vm7, %v3415_v43, %v3416_v27  ;;  %3463 = vst.msk [vmem:[#allocation3 + $0x8] sm:$0xf0] %vm3380_vm13, %v3415_v43  ;;  %v3317_v32 = vadd.f32 %v7913_v3, %v3278_v21  ;;  %v3348_v49 = vmax.f32 %v3316_v53, 0.0  ;;  %vm9470_vm13 = vcmp.ne.s16.totalorder %v7115_v39, 0  ;;  %vm9471_vm7 = vmmov %vm9468_vm1 }
 0x20e   : > { %3464 = vst.msk [vmem:[#allocation3 + $0x10] sm:$0xff] %vm3376_vm3, %v3417_v26  ;;  %v3351_v1 = vmax.f32 %v3319_v23, 0.0 }
 0x20f   : > { %v3349_v58 = vmax.f32 %v3317_v32, 0.0  ;;  %v6138_v61 = vpop.f32.mrb[8].mxu0 }
 0x210   : > { %v3386_v20 = vpack.c.bf16 %v3351_v1, %v3350_v9  ;;  %v3283_v59 = vmul.f32 %v6138_v61, %v7904_v14  ;;  %v3139_v12 = vpop.f32.mrb[9].mxu0 }
 0x211   : > { %v3385_v60 = vpack.c.bf16 %v3349_v58, %v3348_v49  ;;  %v3281_v22 = vmul.f32 %v7904_v14, %v3139_v12  ;;  %v6139_v29 = vpop.f32.mrb[10].mxu0 }
 0x212   : > { %v3420_v13 = vrot.slane %v3386_v20, 4  ;;  %v3322_v17 = vadd.f32 %v7913_v3, %v3283_v59  ;;  %v3284_v44 = vmul.f32 %v6139_v29, %v7904_v14  ;;  %v3142_v4 = vpop.f32.mrb[11].mxu0 }
 0x213   : > { %v3418_v63 = vrot.slane %v3385_v60, 4  ;;  %v3320_v18 = vadd.f32 %v7913_v3, %v3281_v22  ;;  %v3282_v31 = vmul.f32 %v7904_v14, %v3142_v4 }
 0x214   : > { %v3323_v57 = vadd.f32 %v7913_v3, %v3284_v44  ;;  %v7950_v35 = vld [vmem:[#allocation3 + $0x8] sm:$0xf0]  ;;  %v3354_v21 = vmax.f32 %v3322_v17, 0.0 }
 0x215   : > { %v3419_v42 = vsel %vm9468_vm1, %v3416_v27, %v3418_v63  ;;  %v3421_v62 = vsel %vm9469_vm14, %v3418_v63, %v3420_v13  ;;  %v3321_v28 = vadd.f32 %v7913_v3, %v3282_v31  ;;  %3700 = vrot.lane.b32.xlu0 %v7950_v35, %s6461_s23  ;;  %v7957_v43 = vld [vmem:[#allocation3 + $0x10] sm:$0xff]  ;;  %v3352_v26 = vmax.f32 %v3320_v18, 0.0 }
 0x216   : > { %v3534_v53 = vld [vmem:[#allocation3 + $0x10] sm:$0xf8]  ;;  %3465 = vst.msk [vmem:[#allocation3 + $0x18] sm:$0xff] %vm3376_vm3, %v3419_v42  ;;  %3466 = vst.msk [vmem:[#allocation3 + $0x20] sm:$0xff] %vm3376_vm3, %v3421_v62  ;;  %v3355_v23 = vmax.f32 %v3323_v57, 0.0  ;;  %3702 = vrot.lane.b32.xlu1 %v7957_v43, %s6461_s23  ;;  %vm9472_vm14 = vcmp.ne.s16.totalorder %v7159_v52, 0 }
 0x217   : > { %v3537_v27 = vsel %vm9470_vm13, %v3534_v53, 0  ;;  %v3353_v32 = vmax.f32 %v3321_v28, 0.0  ;;  %v6142_v9 = vpop.f32.mrb[12].mxu0  ;;  %v3682_v12 = vld [vmem:[#allocation3 + $0x10] sm:$0xf0]  ;;  %vm9473_vm13 = vmmov %vm9468_vm1 }
 0x218   : > { %v3388_v1 = vpack.c.bf16 %v3355_v23, %v3354_v21  ;;  %v3287_v49 = vmul.f32 %v6142_v9, %v7904_v14  ;;  %v3155_v58 = vpop.f32.mrb[13].mxu0  ;;  %v4974_v60 = vshrl.u32 %v3537_v27, 16  ;;  %v3833_v57 = vrot.slane %v3682_v12, 4 }
 0x219   : > { %v3387_v61 = vpack.c.bf16 %v3353_v32, %v3352_v26  ;;  %v3285_v20 = vmul.f32 %v7904_v14, %v3155_v58  ;;  %v6143_v59 = vpop.f32.mrb[14].mxu0  ;;  %v4977_v42 = vshll.u32 %v3537_v27, 16 }
 0x21a   : > { %v3424_v22 = vrot.slane %v3388_v1, 4  ;;  %v3326_v29 = vadd.f32 %v7913_v3, %v3287_v49  ;;  %v3288_v17 = vmul.f32 %v6143_v59, %v7904_v14  ;;  %v3158_v44 = vpop.f32.mrb[15].mxu0  ;;  %v4976_v26 = vrot.slane %v4974_v60, 3 }
 0x21b   : > { %v3422_v4 = vrot.slane %v3387_v61, 4  ;;  %v3324_v63 = vadd.f32 %v7913_v3, %v3285_v20  ;;  %v3286_v18 = vmul.f32 %v7904_v14, %v3158_v44 }
 0x21c   : > { %v3327_v31 = vadd.f32 %v7913_v3, %v3288_v17  ;;  %v3358_v32 = vmax.f32 %v3326_v29, 0.0  ;;  %v4979_v17 = vrot.slane %v4977_v42, 4 }
 0x21d   : > { %v3423_v62 = vsel %vm9471_vm7, %v3420_v13, %v3422_v4  ;;  %v3425_v28 = vsel %vm9468_vm1, %v3422_v4, %v3424_v22  ;;  %v3325_v53 = vadd.f32 %v7913_v3, %v3286_v18  ;;  %v7975_v21 = vld [vmem:[#allocation3 + $0x20] sm:$0xff]  ;;  %v7977_v23 = vld [vmem:[#allocation3 + $0x18] sm:$0xff]  ;;  %v3356_v1 = vmax.f32 %v3324_v63, 0.0  ;;  %vm9474_vm7 = vmmov %vm9468_vm1 }
 0x21e   : > { %3467 = vst.msk [vmem:[#allocation3 + $0x28] sm:$0xff] %vm3376_vm3, %v3423_v62  ;;  %3468 = vst.msk [vmem:[#allocation3 + $0x30] sm:$0xff] %vm3376_vm3, %v3425_v28  ;;  %v3359_v9 = vmax.f32 %v3327_v31, 0.0  ;;  %3706 = vrot.lane.b32.xlu1 %v7975_v21, %s6461_s23  ;;  %3704 = vrot.lane.b32.xlu0 %v7977_v23, %s6461_s23  ;;  %v9292_v13 = vrot.slane %v7977_v23, 4  ;;  %v3538_v27 = vsel %vm9472_vm14, %v7977_v23, 0 }
 0x21f   : > { %v3357_v49 = vmax.f32 %v3325_v53, 0.0  ;;  %v6146_v58 = vpop.f32.mrb[16].mxu0  ;;  %v4982_v61 = vshrl.u32 %v3538_v27, 16  ;;  %v4985_v20 = vshll.u32 %v3538_v27, 16  ;;  %vm9475_vm14 = vsmask.f32 4352 }
 0x220   : > { %v3390_v59 = vpack.c.bf16 %v3359_v9, %v3358_v32  ;;  %v3291_v12 = vmul.f32 %v6146_v58, %v7904_v14  ;;  %v3171_v60 = vpop.f32.mrb[17].mxu0  ;;  %v3835_v29 = vsel %vm9473_vm13, %v3833_v57, %v9292_v13  ;;  %vm9476_vm13 = vmmov %vm9468_vm1 }
 0x221   : > { %v3389_v44 = vpack.c.bf16 %v3357_v49, %v3356_v1  ;;  %v3289_v4 = vmul.f32 %v7904_v14, %v3171_v60  ;;  %v6147_v18 = vpop.f32.mrb[18].mxu0  ;;  %5905 = vmatprep.mubr.msk.bf16.mxu1 %vm3376_vm3, %v3835_v29  ;;  %v4984_v63 = vrot.slane %v4982_v61, 3  ;;  %v4987_v31 = vrot.slane %v4985_v20, 4 }
 0x222   : > { %v3428_v62 = vrot.slane %v3390_v59, 4  ;;  %v3330_v28 = vadd.f32 %v7913_v3, %v3291_v12  ;;  %v3292_v53 = vmul.f32 %v6147_v18, %v7904_v14  ;;  %v3174_v32 = vpop.f32.mrb[19].mxu0  ;;  %v4980_v49 = vor.u32 %v4979_v17, %v4976_v26 }
 0x223   : > { %v3426_v9 = vrot.slane %v3389_v44, 4  ;;  %v3328_v27 = vadd.f32 %v7913_v3, %v3289_v4  ;;  %v3290_v57 = vmul.f32 %v7904_v14, %v3174_v32  ;;  %v7999_v42 = vor.u32 %v4987_v31, %v4984_v63 }
 0x224   : > { %v3331_v1 = vadd.f32 %v7913_v3, %v3292_v53  ;;  %v3362_v60 = vmax.f32 %v3330_v28, 0.0 }
 0x225   : > { %v3427_v58 = vsel %vm9474_vm7, %v3424_v22, %v3426_v9  ;;  %v3429_v61 = vsel %vm9468_vm1, %v3426_v9, %v3428_v62  ;;  %v3329_v20 = vadd.f32 %v7913_v3, %v3290_v57  ;;  %v8005_v59 = vld [vmem:[#allocation3 + $0x30] sm:$0xff]  ;;  %v8007_v12 = vld [vmem:[#allocation3 + $0x28] sm:$0xff]  ;;  %v4989_v44 = vsel %vm9475_vm14, %v4980_v49, %v7999_v42  ;;  %vm9477_vm7 = vmmov %vm9468_vm1 }
 0x226   : > { %3469 = vst.msk [vmem:[#allocation3 + $0x38] sm:$0xff] %vm3376_vm3, %v3427_v58  ;;  %3470 = vst.msk [vmem:[#allocation3 + $0x40] sm:$0xff] %vm3376_vm3, %v3429_v61  ;;  %v3363_v29 = vmax.f32 %v3331_v1, 0.0  ;;  %3710 = vrot.lane.b32.xlu1 %v8005_v59, %s6461_s23  ;;  %3708 = vrot.lane.b32.xlu0 %v8007_v12, %s6461_s23  ;;  %v3360_v22 = vmax.f32 %v3328_v27, 0.0  ;;  %v6380_v27 = vld [vmem:[%s9244_s4] sm:$0xff]  }
 0x227   : > { %v3361_v26 = vmax.f32 %v3329_v20, 0.0  ;;  %5985 = vmatprep.mubr.msk.bf16.mxu0 %vm3376_vm3, %v4989_v44  ;;  %v6150_v17 = vpop.f32.mrb[20].mxu0  ;;  %5382 = vmatpush1.bf16.msra.mxu0 %v6380_v27  ;;  %vm9478_vm14 = vmmov %vm9468_vm1 }
 0x228   : > { %v3392_v4 = vpack.c.bf16 %v3363_v29, %v3362_v60  ;;  %v3295_v18 = vmul.f32 %v6150_v17, %v7904_v14  ;;  %v3187_v63 = vpop.f32.mrb[21].mxu0  ;;  %5383 = vmatprep.subr.bf16.mxu0 %v9415_v15 }
 0x229   : > { %v3391_v31 = vpack.c.bf16 %v3361_v26, %v3360_v22  ;;  %v3293_v28 = vmul.f32 %v7904_v14, %v3187_v63  ;;  %v6151_v53 = vpop.f32.mrb[22].mxu0 }
 0x22a   : > { %v3432_v32 = vrot.slane %v3392_v4, 4  ;;  %v3334_v9 = vadd.f32 %v7913_v3, %v3295_v18  ;;  %v3296_v57 = vmul.f32 %v6151_v53, %v7904_v14  ;;  %v3190_v1 = vpop.f32.mrb[23].mxu0 }
 0x22b   : > { %v3430_v49 = vrot.slane %v3391_v31, 4  ;;  %v3332_v58 = vadd.f32 %v7913_v3, %v3293_v28  ;;  %v3294_v61 = vmul.f32 %v7904_v14, %v3190_v1 }
 0x22c   : > { %v3335_v20 = vadd.f32 %v7913_v3, %v3296_v57  ;;  %v3366_v17 = vmax.f32 %v3334_v9, 0.0 }
 0x22d   : > { %v3431_v60 = vsel %vm9476_vm13, %v3428_v62, %v3430_v49  ;;  %v3433_v29 = vsel %vm9477_vm7, %v3430_v49, %v3432_v32  ;;  %v3333_v44 = vadd.f32 %v7913_v3, %v3294_v61  ;;  %v8031_v22 = vld [vmem:[#allocation3 + $0x40] sm:$0xff]  ;;  %v8033_v26 = vld [vmem:[#allocation3 + $0x38] sm:$0xff]  ;;  %v6382_v62 = vld [vmem:[%s9244_s4 + $0x8] sm:$0xff]   ;;  %v3364_v18 = vmax.f32 %v3332_v58, 0.0 }
 0x22e   : > { %3471 = vst.msk [vmem:[#allocation3 + $0x48] sm:$0xff] %vm3376_vm3, %v3431_v60  ;;  %3472 = vst.msk [vmem:[#allocation3 + $0x50] sm:$0xff] %vm3376_vm3, %v3433_v29  ;;  %v3367_v4 = vmax.f32 %v3335_v20, 0.0  ;;  %3714 = vrot.lane.b32.xlu1 %v8031_v22, %s6461_s23  ;;  %3712 = vrot.lane.b32.xlu0 %v8033_v26, %s6461_s23  ;;  %v6383_v58 = vld [vmem:[%s9244_s4 + $0x10] sm:$0xff]  }
 0x22f   : > { %v3365_v63 = vmax.f32 %v3333_v44, 0.0  ;;  %v6154_v31 = vpop.f32.mrb[24].mxu0  ;;  %5384 = vmatpush1.bf16.msra.mxu0 %v6382_v62  ;;  %vm9479_vm13 = vmmov %vm9468_vm1 }
 0x230   : > { %v3394_v28 = vpack.c.bf16 %v3367_v4, %v3366_v17  ;;  %v3299_v53 = vmul.f32 %v6154_v31, %v7904_v14  ;;  %v3203_v57 = vpop.f32.mrb[25].mxu0  ;;  %5385 = vmatprep.subr.bf16.mxu0 %v9415_v15  ;;  %vm9480_vm7 = vmmov %vm9468_vm1 }
 0x231   : > { %v3393_v9 = vpack.c.bf16 %v3365_v63, %v3364_v18  ;;  %v3297_v1 = vmul.f32 %v7904_v14, %v3203_v57  ;;  %v6155_v27 = vpop.f32.mrb[26].mxu0 }
 0x232   : > { %v3436_v49 = vrot.slane %v3394_v28, 4  ;;  %v3338_v61 = vadd.f32 %v7913_v3, %v3299_v53  ;;  %v3300_v20 = vmul.f32 %v6155_v27, %v7904_v14  ;;  %v3206_v60 = vpop.f32.mrb[27].mxu0 }
 0x233   : > { %v3434_v29 = vrot.slane %v3393_v9, 4  ;;  %v3336_v44 = vadd.f32 %v7913_v3, %v3297_v1  ;;  %v3298_v17 = vmul.f32 %v7904_v14, %v3206_v60  ;;  %5386 = vmatpush1.bf16.msra.mxu0 %v6383_v58 }
 0x234   : > { %v3339_v4 = vadd.f32 %v7913_v3, %v3300_v20  ;;  %5387 = vmatprep.subr.bf16.mxu0 %v9415_v15  ;;  %v3370_v53 = vmax.f32 %v3338_v61, 0.0 }
 0x235   : > { %v3435_v62 = vsel %vm9468_vm1, %v3432_v32, %v3434_v29  ;;  %v3437_v18 = vsel %vm9478_vm14, %v3434_v29, %v3436_v49  ;;  %v3337_v63 = vadd.f32 %v7913_v3, %v3298_v17  ;;  %v8059_v31 = vld [vmem:[#allocation3 + $0x50] sm:$0xff]  ;;  %v8061_v28 = vld [vmem:[#allocation3 + $0x48] sm:$0xff]  ;;  %v6384_v32 = vld [vmem:[%s9244_s4 + $0x18] sm:$0xff]   ;;  %v3368_v9 = vmax.f32 %v3336_v44, 0.0 }
 0x236   : > { %3473 = vst.msk [vmem:[#allocation3 + $0x58] sm:$0xff] %vm3376_vm3, %v3435_v62  ;;  %3474 = vst.msk [vmem:[#allocation3 + $0x60] sm:$0xff] %vm3376_vm3, %v3437_v18  ;;  %v3371_v57 = vmax.f32 %v3339_v4, 0.0  ;;  %3718 = vrot.lane.b32.xlu1 %v8059_v31, %s6461_s23  ;;  %3716 = vrot.lane.b32.xlu0 %v8061_v28, %s6461_s23  ;;  %v6386_v44 = vld [vmem:[%s9244_s4 + $0x20] sm:$0xff]  }
 0x237   : > { %v3369_v1 = vmax.f32 %v3337_v63, 0.0  ;;  %v6158_v27 = vpop.f32.mrb[28].mxu0  ;;  %5388 = vmatpush1.bf16.msra.mxu0 %v6384_v32  ;;  %vm9481_vm14 = vmmov %vm9468_vm1 }
 0x238   : > { %v3396_v20 = vpack.c.bf16 %v3371_v57, %v3370_v53  ;;  %v3303_v60 = vmul.f32 %v6158_v27, %v7904_v14  ;;  %v3219_v58 = vpop.f32.mrb[29].mxu0  ;;  %5389 = vmatprep.subr.bf16.mxu0 %v9415_v15 }
 0x239   : > { %v3395_v61 = vpack.c.bf16 %v3369_v1, %v3368_v9  ;;  %v3301_v29 = vmul.f32 %v7904_v14, %v3219_v58  ;;  %v6159_v17 = vpop.f32.mrb[30].mxu0 }
 0x23a   : > { %v3440_v4 = vrot.slane %v3396_v20, 4  ;;  %v3342_v62 = vadd.f32 %v7913_v3, %v3303_v60  ;;  %v3304_v18 = vmul.f32 %v6159_v17, %v7904_v14  ;;  %v3222_v13 = vpop.f32.mrb[31].mxu0 }
 0x23b   : > { %v3438_v63 = vrot.slane %v3395_v61, 4  ;;  %v3340_v53 = vadd.f32 %v7913_v3, %v3301_v29  ;;  %v3302_v57 = vmul.f32 %v7904_v14, %v3222_v13  ;;  %5390 = vmatpush1.bf16.msra.mxu0 %v6386_v44 }
 0x23c   : > { %v3343_v32 = vadd.f32 %v7913_v3, %v3304_v18  ;;  %5391 = vmatprep.subr.bf16.mxu0 %v9415_v15  ;;  %v3374_v14 = vmax.f32 %v3342_v62, 0.0  ;;  %v6388_v62 = vld [vmem:[%s9244_s4 + $0x30] sm:$0xff]  }
 0x23d   : > { %v3439_v9 = vsel %vm9479_vm13, %v3436_v49, %v3438_v63  ;;  %v3441_v1 = vsel %vm9480_vm7, %v3438_v63, %v3440_v4  ;;  %v3341_v27 = vadd.f32 %v7913_v3, %v3302_v57  ;;  %v8087_v20 = vld [vmem:[#allocation3 + $0x60] sm:$0xff]  ;;  %v8089_v60 = vld [vmem:[#allocation3 + $0x58] sm:$0xff]  ;;  %v6387_v3 = vld [vmem:[%s9244_s4 + $0x28] sm:$0xff]   ;;  %v3372_v49 = vmax.f32 %v3340_v53, 0.0 }
 0x23e   : > { %3475 = vst.msk [vmem:[#allocation3 + $0x68] sm:$0xff] %vm3376_vm3, %v3439_v9  ;;  %3476 = vst.msk [vmem:[#allocation3 + $0x70] sm:$0xff] %vm3376_vm3, %v3441_v1  ;;  %v3375_v13 = vmax.f32 %v3343_v32, 0.0  ;;  %3722 = vrot.lane.b32.xlu1 %v8087_v20, %s6461_s23  ;;  %3720 = vrot.lane.b32.xlu0 %v8089_v60, %s6461_s23  ;;  %v6391_v1 = vld [vmem:[%s9244_s4 + $0x40] sm:$0xff]   ;;  %v3546_v8 = vsel %vm1246_vm12, %v8089_v60, 0 }
 0x23f   : > { %v3373_v58 = vmax.f32 %v3341_v27, 0.0  ;;  %5392 = vmatpush1.bf16.msra.mxu0 %v6387_v3  ;;  %v9482_v27 = vld [vmem:[#allocation4_spill] sm:$0xff]  ;;  %v6393_v3 = vld [vmem:[%s9244_s4 + $0x48] sm:$0xff]  }
 0x240   : > { %v3398_v61 = vpack.c.bf16 %v3375_v13, %v3374_v14  ;;  %5393 = vmatprep.subr.bf16.mxu0 %v9415_v15 }
 0x241   : > { %v3397_v29 = vpack.c.bf16 %v3373_v58, %v3372_v49  ;;  %v9484_v49 = vld [vmem:[#allocation6_spill] sm:$0xff] }
 0x242   : > { %v3444_v17 = vrot.slane %v3398_v61, 4  ;;  %vm9485_vm13 = vcmp.ne.s16.totalorder %v9484_v49, 0 }
 0x243   : > { %v3442_v18 = vrot.slane %v3397_v29, 4  ;;  %5394 = vmatpush1.bf16.msra.mxu0 %v6388_v62  ;;  %v4214_v58 = vsel %vm9485_vm13, %v7977_v23, 0  ;;  %v3514_v29 = vld [vmem:[#allocation3 + $0x8] sm:$0xf8]  ;;  %vm9491_vm13 = vcmp.ne.s16.totalorder %v7159_v52, 0 }
 0x244   : > { %3479 = vst.msk [vmem:[#allocation3 + $0x88] sm:$0xf] %vm3378_vm8, %v3444_v17  ;;  %5395 = vmatprep.subr.bf16.mxu0 %v9415_v15  ;;  %vm9483_vm8 = vcmp.ne.s16.totalorder %v9482_v27, 0 }
 0x245   : > { %v3443_v44 = vsel %vm9468_vm1, %v3440_v4, %v3442_v18  ;;  %v3445_v63 = vsel %vm9481_vm14, %v3442_v18, %v3444_v17  ;;  %v8108_v53 = vld [vmem:[#allocation3 + $0x70] sm:$0xff]  ;;  %v8110_v57 = vld [vmem:[#allocation3 + $0x68] sm:$0xff]  ;;  %v6390_v4 = vld [vmem:[%s9244_s4 + $0x38] sm:$0xff]   ;;  %v4212_v14 = vsel %vm9483_vm8, %v7950_v35, 0  ;;  %vm9488_vm1 = vcmp.ne.s16.totalorder %v7115_v39, 0 }
 0x246   : > { %3477 = vst.msk [vmem:[#allocation3 + $0x78] sm:$0xff] %vm3376_vm3, %v3443_v44  ;;  %3478 = vst.msk [vmem:[#allocation3 + $0x80] sm:$0xff] %vm3376_vm3, %v3445_v63  ;;  %3726 = vrot.lane.b32.xlu1 %v8108_v53, %s6461_s23  ;;  %3724 = vrot.lane.b32.xlu0 %v8110_v57, %s6461_s23  ;;  %v9486_v35 = vld [vmem:[#allocation5_spill] sm:$0xff]  ;;  %v6394_v17 = vld [vmem:[%s9244_s4 + $0x50] sm:$0xff]   ;;  %v3517_v62 = vsel %vm9488_vm1, %v3514_v29, 0  ;;  %vm9489_vm14 = vcmp.ne.s16.totalorder %v6830_v24, 0 }
 0x247   : > { %5396 = vmatpush1.bf16.msra.mxu0 %v6390_v4  ;;  %vm9487_vm7 = vcmp.ne.s16.totalorder %v9486_v35, 0  ;;  %v4215_v18 = vsel %vm9489_vm14, %v7975_v21, 0  ;;  %v6395_v44 = vld [vmem:[%s9244_s4 + $0x58] sm:$0xff]   ;;  %vm9490_vm8 = vcmp.ne.s16.totalorder %v6853_v16, 0  ;;  %v3518_v4 = vsel %vm9491_vm13, %v7957_v43, 0 }
 0x248   : > { %5397 = vmatprep.subr.bf16.mxu0 %v9415_v15  ;;  %v4213_v61 = vsel %vm9487_vm7, %v7957_v43, 0  ;;  %v4216_v63 = vsel %vm9490_vm8, %v8007_v12, 0  ;;  %vm9492_vm7 = vcmp.ne.s16.totalorder %v6876_v5, 0  ;;  %vm9493_vm1 = vcmp.ne.s16.totalorder %v7186_v30, 0 }
 0x249   : > { %vm9494_vm14 = vcmp.ne.s16.totalorder %v6879_v6, 0  ;;  %vm9495_vm8 = vcmp.ne.s16.totalorder %v7219_v25, 0  ;;  %vm9496_vm13 = vcmp.ne.s16.totalorder %v6927_v54, 0  ;;  %v3523_v54 = vsel %vm1243_vm10, %v8033_v26, 0 }
 0x24a   : > { %v3524_v16 = vsel %vm1244_vm4, %v8031_v22, 0 }
 0x24b   : > { %v8137_v13 = vld [vmem:[#allocation3 + $0x88] sm:$0xf]  ;;  %5398 = vmatpush1.bf16.msra.mxu0 %v6391_v1  ;;  %v4217_v1 = vsel %vm9492_vm7, %v8005_v59, 0  ;;  %vm9497_vm7 = vcmp.ne.s16.totalorder %v9448_v45, 0 }
 0x24c   : > { %5399 = vmatprep.subr.bf16.mxu0 %v9415_v15  ;;  %v3521_v29 = vsel %vm9497_vm7, %v8007_v12, 0  ;;  %vm9502_vm7 = vcmp.ne.s16.totalorder %v6957_v7, 0 }
 0x24d   : > { %v8122_v32 = vld [vmem:[#allocation3 + $0x80] sm:$0xff]  ;;  %v8124_v9 = vld [vmem:[#allocation3 + $0x78] sm:$0xff] }
 0x24e   : > { %3730 = vrot.lane.b32.xlu1 %v8122_v32, %s6461_s23  ;;  %3728 = vrot.lane.b32.xlu0 %v8124_v9, %s6461_s23 }
 0x24f   : > { %5400 = vmatpush1.bf16.msra.mxu0 %v6393_v3  ;;  %v4218_v3 = vsel %vm9494_vm14, %v8033_v26, 0  ;;  %vm9499_vm14 = vcmp.ne.s16.totalorder %v6933_v56, 0  ;;  %v4221_v56 = vsel %vm9502_vm7, %v8059_v31, 0  ;;  %vm9509_vm7 = vcmp.ne.s16.totalorder %v7088_v51, 0 }
 0x250   : > { %5401 = vmatprep.subr.bf16.mxu0 %v9415_v15 }
 0x252   : > { %4264 = vrot.lane.b32.xlu1 %v4212_v14, %s6461_s23  ;;  %3732 = vrot.lane.b32.xlu0 %v8137_v13, %s6461_s23  ;;  %v3519_v14 = vsel %vm9493_vm1, %v7977_v23, 0  ;;  %vm9498_vm1 = vcmp.ne.s16.totalorder %v7577_v40, 0 }
 0x253   : > { %5402 = vmatpush1.bf16.msra.mxu0 %v6394_v17  ;;  %v8201_v17 = vld [vmem:[#allocation3 + $0x90] sm:$0xf] }
 0x254   : > { %5403 = vmatprep.subr.bf16.mxu0 %v9415_v15 }
 0x256   : > { %4268 = vrot.lane.b32.xlu1 %v4214_v58, %s6461_s23  ;;  %4266 = vrot.lane.b32.xlu0 %v4213_v61, %s6461_s23  ;;  %v3520_v58 = vsel %vm9495_vm8, %v7975_v21, 0  ;;  %v4219_v61 = vsel %vm9496_vm13, %v8031_v22, 0  ;;  %vm9500_vm8 = vcmp.ne.s16.totalorder %v9452_v41, 0  ;;  %vm9501_vm13 = vcmp.ne.s16.totalorder %v7582_v47, 0 }
 0x257   : > { %5404 = vmatpush1.bf16.msra.mxu0 %v6395_v44 }
 0x25a   : > { %3571 = vrot.lane.b32.xlu1 %v3517_v62, %s6461_s23  ;;  %4270 = vrot.lane.b32.xlu0 %v4215_v18, %s6461_s23  ;;  %v3551_v62 = vsel %vm9498_vm1, %v8122_v32, 0  ;;  %v8206_v18 = vld [vmem:[#allocation3 + $0x88] sm:$0xff]  ;;  %vm9504_vm1 = vcmp.ne.s16.totalorder %v6979_v33, 0 }
 0x25b   : > { %v5203_v44 = vshrl.u32 %v3551_v62, 16  ;;  %v4222_v7 = vsel %vm9504_vm1, %v8089_v60, 0  ;;  %vm9510_vm1 = vcmp.ne.s16.totalorder %v7031_v11, 0 }
 0x25e   : > { %4272 = vrot.lane.b32.xlu1 %v4216_v63, %s6461_s23  ;;  %3573 = vrot.lane.b32.xlu0 %v3518_v4, %s6461_s23  ;;  %v5206_v63 = vshll.u32 %v3551_v62, 16  ;;  %v4220_v4 = vsel %vm9499_vm14, %v8061_v28, 0  ;;  %vm9505_vm14 = vsmask.f32 4352 }
 0x262   : > { %4274 = vrot.lane.b32.xlu1 %v4217_v1, %s6461_s23  ;;  %3575 = vrot.lane.b32.xlu0 %v3519_v14, %s6461_s23  ;;  %v3522_v1 = vsel %vm9500_vm8, %v8005_v59, 0  ;;  %v3553_v14 = vsel %vm9501_vm13, %v8201_v17, 0  ;;  %vm9507_vm8 = vcmp.ne.s16.totalorder %v7006_v55, 0  ;;  %vm9508_vm13 = vcmp.ne.s16.totalorder %v7058_v38, 0 }
 0x263   : > { %v5237_v62 = vshrl.u32 %v3553_v14, 16  ;;  %v3870_v55 = vrot.slane %v8087_v20, 4 }
 0x265   : > { %v5239_v5 = vrot.slane %v5237_v62, 3 }
 0x266   : > { %4276 = vrot.lane.b32.xlu1 %v4218_v3, %s6461_s23  ;;  %3577 = vrot.lane.b32.xlu0 %v3520_v58, %s6461_s23  ;;  %v5205_v3 = vrot.slane %v5203_v44, 3  ;;  %v5208_v58 = vrot.slane %v5206_v63, 4 }
 0x268   : > { %v8230_v63 = vor.u32 %v5208_v58, %v5205_v3 }
 0x26a   : > { %4278 = vrot.lane.b32.xlu1 %v4219_v61, %s6461_s23  ;;  %3579 = vrot.lane.b32.xlu0 %v3521_v29, %s6461_s23  ;;  %v3552_v61 = vsel %vm9334_vm11, %v8206_v18, 0  ;;  %9503 = vst [vmem:[#allocation21_spill] sm:$0xff] %v8230_v63 }
 0x26b   : > { %v5220_v29 = vshrl.u32 %v3552_v61, 16  ;;  %v5223_v6 = vshll.u32 %v3552_v61, 16 }
 0x26d   : > { %v5222_v44 = vrot.slane %v5220_v29, 3 }
 0x26e   : > { %4280 = vrot.lane.b32.xlu1 %v4220_v4, %s6461_s23  ;;  %3581 = vrot.lane.b32.xlu0 %v3522_v1, %s6461_s23  ;;  %v5240_v4 = vshll.u32 %v3553_v14, 16  ;;  %v5225_v1 = vrot.slane %v5223_v6, 4  ;;  %v4223_v6 = vsel %vm9507_vm8, %v8087_v20, 0  ;;  %vm9514_vm8 = vcmp.ne.s16.totalorder %v7055_v37, 0 }
 0x26f   : > { %v4225_v11 = vsel %vm9514_vm8, %v8108_v53, 0  ;;  %vm9519_vm8 = vcmp.ne.s16.totalorder %v7064_v46, 0 }
 0x270   : > { %v5226_v24 = vor.u32 %v5225_v1, %v5222_v44  ;;  %v5242_v61 = vrot.slane %v5240_v4, 4  ;;  %v3526_v4 = vsel %vm1246_vm12, %v8059_v31, 0 }
 0x272   : > { %4282 = vrot.lane.b32.xlu1 %v4221_v56, %s6461_s23  ;;  %3583 = vrot.lane.b32.xlu0 %v3523_v54, %s6461_s23  ;;  %v8242_v54 = vsel %vm9505_vm14, %v8230_v63, %v5226_v24  ;;  %v3525_v56 = vsel %vm1245_vm15, %v8061_v28, 0  ;;  %v5243_v14 = vor.u32 %v5242_v61, %v5239_v5  ;;  %v4224_v5 = vsel %vm9510_vm1, %v8110_v57, 0 }
 0x273   : > { %9506 = vst [vmem:[#allocation22_spill] sm:$0xff] %v8242_v54  ;;  %vm9516_vm1 = vcmask 1043456  }
 0x274   : > { %v8265_v1 = vsel %vm9505_vm14, %v5226_v24, %v5243_v14  ;;  %v3527_v24 = vsel %vm1247_vm2, %v8089_v60, 0  ;;  %vm9518_vm14 = vmmov %vm9516_vm1 }
 0x275   : > { %9511 = vst [vmem:[#allocation23_spill] sm:$0xff] %v8265_v1 }
 0x276   : > { %4284 = vrot.lane.b32.xlu1 %v4222_v7, %s6461_s23  ;;  %3585 = vrot.lane.b32.xlu0 %v3524_v16, %s6461_s23  ;;  %v4244_v16 = vsel %vm9508_vm13, %v8122_v32, 0  ;;  %v4245_v7 = vsel %vm9509_vm7, %v8206_v18, 0 }
 0x277   : > { %v4619_v3 = vshrl.u32 %v4244_v16, 16  ;;  %v4622_v58 = vshll.u32 %v4244_v16, 16  ;;  %v4636_v29 = vshrl.u32 %v4245_v7, 16  ;;  %v4639_v62 = vshll.u32 %v4245_v7, 16 }
 0x279   : > { %v4621_v44 = vrot.slane %v4619_v3, 4  ;;  %v4624_v61 = vrot.slane %v4622_v58, 5  ;;  %v3528_v3 = vsel %vm1248_vm9, %v8087_v20, 0  ;;  %v4226_v58 = vsel %vm9508_vm13, %v8124_v9, 0 }
 0x27a   : > { %4286 = vrot.lane.b32.xlu1 %v4223_v6, %s6461_s23  ;;  %3587 = vrot.lane.b32.xlu0 %v3525_v56, %s6461_s23  ;;  %v4638_v6 = vrot.slane %v4636_v29, 4  ;;  %v4641_v56 = vrot.slane %v4639_v62, 5  ;;  %v8292_v29 = vld [vmem:[#allocation3] sm:$0xf0]  ;;  %vm9520_vm13 = vcmp.ne.s16.totalorder %v7577_v40, 0 }
 0x27b   : > { %v8269_v16 = vor.u32 %v4624_v61, %v4621_v44  ;;  %v3838_v44 = vrot.slane %v7975_v21, 4 }
 0x27c   : > { %v8271_v7 = vor.u32 %v4641_v56, %v4638_v6  ;;  %v3529_v56 = vsel %vm1249_vm0, %v8110_v57, 0 }
 0x27d   : > { %9512 = vst [vmem:[#allocation24_spill] sm:$0xff] %v8269_v16 }
 0x27e   : > { %4288 = vrot.lane.b32.xlu1 %v4224_v5, %s6461_s23  ;;  %3589 = vrot.lane.b32.xlu0 %v3526_v4, %s6461_s23  ;;  %9513 = vst [vmem:[#allocation4_spill] sm:$0xff] %v8271_v7  ;;  %v8284_v14 = vsel %vm1093_vm5, %v8269_v16, %v8271_v7  ;;  %v8298_v5 = vld [vmem:[#allocation3 + $0x8] sm:$0xff]  ;;  %v3866_v16 = vrot.slane %v8089_v60, 4 }
 0x27f   : > { %9515 = vst [vmem:[#allocation6_spill] sm:$0xff] %v8284_v14 }
 0x282   : > { %4290 = vrot.lane.b32.xlu1 %v4225_v11, %s6461_s23  ;;  %3591 = vrot.lane.b32.xlu0 %v3527_v24, %s6461_s23  ;;  %v4227_v24 = vsel %vm9509_vm7, %v8122_v32, 0  ;;  %vm9521_vm7 = vmmov %vm9516_vm1 }
 0x286   : > { %3593 = vrot.lane.b32.xlu0 %v3528_v3, %s6461_s23  ;;  %4292 = vrot.lane.b32.xlu1 %v4226_v58, %s6461_s23  ;;  %v6377_v58 = vld [vmem:[%s9244_s4 + $0xc0] sm:$0xff]  }
 0x287   : > { %v3701_v11 = vpop.permute.xlu0 %3700 }
 0x288   : > { %v3736_v62 = vsel %vm3376_vm3, %v8292_v29, %v3701_v11  ;;  %v3703_v4 = vpop.permute.xlu1 %3702  ;;  %v4211_v11 = vld [vmem:[#allocation3 + $0x88] sm:$0x1f] }
 0x289   : > { %v3830_v61 = vrot.slane %v3736_v62, 4  ;;  %v3739_v6 = vsel %vm3376_vm3, %v8298_v5, %v3703_v4  ;;  %v9517_v4 = vrot.slane %v7977_v23, 4 }
 0x28a   : > { %v3831_v3 = vrot.slane %v3739_v6, 4  ;;  %3595 = vrot.lane.b32.xlu0 %v3529_v56, %s6461_s23  ;;  %4294 = vrot.lane.b32.xlu1 %v4227_v24, %s6461_s23  ;;  %v3530_v6 = vsel %vm1250_vm6, %v8108_v53, 0  ;;  %v4228_v56 = vsel %vm9519_vm8, %v4211_v11, 0  ;;  %v6378_v24 = vld [vmem:[%s9244_s4 + $0xc8] sm:$0xff]   ;;  %v3532_v11 = vsel %vm9334_vm11, %v8122_v32, 0  ;;  %vm9523_vm8 = vmmov %vm9516_vm1 }
 0x28b   : > { %v3839_v1 = vsel %vm9518_vm14, %v9517_v4, %v3838_v44  ;;  %vm9522_vm14 = vcmp.ne.s16.totalorder %v7582_v47, 0 }
 0x28c   : > { %v3832_v62 = vsel %vm9516_vm1, %v3830_v61, %v3831_v3 }
 0x28d   : > { %4065 = vmatmul.mubr.bf16.vlgmr.msra.gmra.mrb[0].mxu1 %v3832_v62 }
 0x28e   : > { %4798 = vmatpush1.bf16.msra.mxu1 %v6377_v58  ;;  %5906 = vmatprep.mubr.msk.bf16.mxu1 %vm3376_vm3, %v3839_v1  ;;  %v3842_v58 = vrot.slane %v8007_v12, 4 }
 0x28f   : > { %3597 = vrot.lane.b32.xlu0 %v3530_v6, %s6461_s23  ;;  %4296 = vrot.lane.b32.xlu1 %v4228_v56, %s6461_s23  ;;  %v3531_v6 = vsel %vm9520_vm13, %v8124_v9, 0  ;;  %v6379_v56 = vld [vmem:[%s9244_s4 + $0xd0] sm:$0xff]   ;;  %vm9524_vm13 = vmmov %vm9516_vm1 }
 0x290   : > { %v3705_v61 = vpop.permute.xlu0 %3704  ;;  %4799 = vmatprep.subr.bf16.mxu1 %v9415_v15  ;;  %v3707_v62 = vpop.permute.xlu1 %3706  ;;  %v3843_v7 = vsel %vm9516_vm1, %v3838_v44, %v3842_v58 }
 0x291   : > { %v3742_v1 = vsel %vm3376_vm3, %v7957_v43, %v3705_v61 }
 0x292   : > { %v3836_v4 = vrot.slane %v3742_v1, 4  ;;  %4800 = vmatpush1.bf16.msra.mxu1 %v6378_v24  ;;  %v3745_v1 = vsel %vm3376_vm3, %v7977_v23, %v3707_v62  ;;  %v3533_v24 = vsel %vm9522_vm14, %v8137_v13, 0  ;;  %v3846_v62 = vrot.slane %v8005_v59, 4  ;;  %vm9526_vm14 = vmmov %vm9516_vm1 }
 0x293   : > { %3601 = vrot.lane.b32.xlu1 %v3532_v11, %s6461_s23  ;;  %3599 = vrot.lane.b32.xlu0 %v3531_v6, %s6461_s23  ;;  %v6381_v11 = vld [vmem:[%s9244_s4 + $0xd8] sm:$0xff]  }
 0x294   : > { %v3837_v61 = vsel %vm9521_vm7, %v3831_v3, %v3836_v4  ;;  %4801 = vmatprep.subr.bf16.mxu1 %v9415_v15  ;;  %v3840_v3 = vrot.slane %v3745_v1, 4  ;;  %vm9525_vm7 = vmmov %vm9516_vm1 }
 0x295   : > { %4073 = vmatmul.mubr.bf16.gmra.mrb[4].mxu1 %v3837_v61  ;;  %v6389_v61 = vld [vmem:[%s9244_s4 + $0xe8] sm:$0xff]  }
 0x296   : > { %5907 = vmatprep.mubr.msk.bf16.mxu1 %vm3376_vm3, %v3843_v7  ;;  %4802 = vmatpush1.bf16.msra.mxu1 %v6379_v56  ;;  %v6385_v7 = vld [vmem:[%s9244_s4 + $0xe0] sm:$0xff]   ;;  %v3841_v13 = vsel %vm9523_vm8, %v3836_v4, %v3840_v3  ;;  %v3847_v56 = vsel %vm9524_vm13, %v3842_v58, %v3846_v62  ;;  %v6392_v4 = vld [vmem:[%s9244_s4 + $0xf0] sm:$0xff]   ;;  %vm9527_vm8 = vmmov %vm9516_vm1 }
 0x297   : > { %3603 = vrot.lane.b32.xlu0 %v3533_v24, %s6461_s23  ;;  %4803 = vmatprep.subr.bf16.mxu1 %v9415_v15  ;;  %v3850_v24 = vrot.slane %v8033_v26, 4  ;;  %vm9528_vm13 = vmmov %vm9516_vm1 }
 0x298   : > { %v3709_v6 = vpop.permute.xlu0 %3708 }
 0x299   : > { %v3748_v44 = vsel %vm3376_vm3, %v7975_v21, %v3709_v6 }
 0x29a   : > { %4804 = vmatpush1.bf16.msra.mxu1 %v6381_v11  ;;  %v3844_v1 = vrot.slane %v3748_v44, 4  ;;  %v3711_v11 = vpop.permute.xlu1 %3710 }
 0x29b   : > { %4805 = vmatprep.subr.bf16.mxu1 %v9415_v15  ;;  %v3751_v6 = vsel %vm3376_vm3, %v8007_v12, %v3711_v11 }
 0x29c   : > { %v3845_v58 = vsel %vm9525_vm7, %v3840_v3, %v3844_v1  ;;  %v3848_v44 = vrot.slane %v3751_v6, 4  ;;  %v6397_v3 = vld [vmem:[%s9244_s4 + $0x100] sm:$0xff]   ;;  %vm9529_vm7 = vmmov %vm9516_vm1 }
 0x29d   : > { %4081 = vmatmul.mubr.bf16.gmra.mrb[8].mxu1 %v3841_v13  ;;  %v6396_v13 = vld [vmem:[%s9244_s4 + $0xf8] sm:$0xff]  }
 0x29e   : > { %5908 = vmatprep.mubr.msk.bf16.mxu1 %vm3376_vm3, %v3847_v56  ;;  %4806 = vmatpush1.bf16.msra.mxu1 %v6385_v7  ;;  %v3851_v7 = vsel %vm9516_vm1, %v3846_v62, %v3850_v24  ;;  %v3854_v56 = vrot.slane %v8031_v22, 4  ;;  %v3849_v62 = vsel %vm9526_vm14, %v3844_v1, %v3848_v44  ;;  %v6399_v1 = vld [vmem:[%s9244_s4 + $0x110] sm:$0xff]   ;;  %vm9530_vm14 = vmmov %vm9516_vm1 }
 0x29f   : > { %4807 = vmatprep.subr.bf16.mxu1 %v9415_v15 }
 0x2a0   : > { %v3715_v6 = vpop.permute.xlu1 %3714 }
 0x2a2   : > { %4808 = vmatpush1.bf16.msra.mxu1 %v6389_v61  ;;  %v3713_v61 = vpop.permute.xlu0 %3712 }
 0x2a3   : > { %4809 = vmatprep.subr.bf16.mxu1 %v9415_v15  ;;  %v3754_v11 = vsel %vm3376_vm3, %v8005_v59, %v3713_v61 }
 0x2a5   : > { %4089 = vmatmul.mubr.bf16.gmra.mrb[12].mxu1 %v3845_v58  ;;  %v6398_v58 = vld [vmem:[%s9244_s4 + $0x108] sm:$0xff]  }
 0x2a6   : > { %5909 = vmatprep.mubr.msk.bf16.mxu1 %vm3376_vm3, %v3851_v7  ;;  %4810 = vmatpush1.bf16.msra.mxu1 %v6392_v4  ;;  %v3855_v4 = vsel %vm9527_vm8, %v3850_v24, %v3854_v56  ;;  %v3852_v7 = vrot.slane %v3754_v11, 4  ;;  %v6400_v11 = vld [vmem:[%s9244_s4 + $0x118] sm:$0xff]   ;;  %vm9531_vm8 = vmmov %vm9516_vm1 }
 0x2a7   : > { %4811 = vmatprep.subr.bf16.mxu1 %v9415_v15  ;;  %v3871_v33 = vsel %vm9531_vm8, %v3866_v16, %v3870_v55  ;;  %vm9545_vm11 = vmmov %vm9531_vm8 }
 0x2a8   : > { %v3719_v24 = vpop.permute.xlu1 %3718  ;;  %v3717_v61 = vpop.permute.xlu0 %3716 }
 0x2aa   : > { %4812 = vmatpush1.bf16.msra.mxu1 %v6396_v13  ;;  %v3858_v13 = vrot.slane %v8061_v28, 4 }
 0x2ab   : > { %4813 = vmatprep.subr.bf16.mxu1 %v9415_v15 }
 0x2ad   : > { %4097 = vmatmul.mubr.bf16.gmra.mrb[16].mxu1 %v3849_v62  ;;  %v3757_v62 = vsel %vm3376_vm3, %v8033_v26, %v3715_v6 }
 0x2ae   : > { %5910 = vmatprep.mubr.msk.bf16.mxu1 %vm3376_vm3, %v3855_v4  ;;  %4814 = vmatpush1.bf16.msra.mxu1 %v6397_v3  ;;  %v3853_v3 = vsel %vm9528_vm13, %v3848_v44, %v3852_v7  ;;  %v3859_v4 = vsel %vm9529_vm7, %v3854_v56, %v3858_v13  ;;  %v3862_v44 = vrot.slane %v8059_v31, 4  ;;  %vm9532_vm13 = vmmov %vm9516_vm1  ;;  %vm9534_vm7 = vcmp.ne.s16.totalorder %v7115_v39, 0 }
 0x2af   : > { %4815 = vmatprep.subr.bf16.mxu1 %v9415_v15 }
 0x2b0   : > { %v3723_v47 = vpop.permute.xlu1 %3722  ;;  %v3721_v14 = vpop.permute.xlu0 %3720 }
 0x2b2   : > { %4816 = vmatpush1.bf16.msra.mxu1 %v6398_v58  ;;  %v3856_v58 = vrot.slane %v3757_v62, 4 }
 0x2b3   : > { %4817 = vmatprep.subr.bf16.mxu1 %v9415_v15 }
 0x2b5   : > { %4105 = vmatmul.mubr.bf16.gmra.mrb[20].mxu1 %v3853_v3  ;;  %v3760_v3 = vsel %vm3376_vm3, %v8031_v22, %v3717_v61  ;;  %v3763_v61 = vsel %vm3376_vm3, %v8061_v28, %v3719_v24 }
 0x2b6   : > { %5911 = vmatprep.mubr.msk.bf16.mxu1 %vm3376_vm3, %v3859_v4  ;;  %4818 = vmatpush1.bf16.msra.mxu1 %v6399_v1  ;;  %v3857_v1 = vsel %vm9516_vm1, %v3852_v7, %v3856_v58  ;;  %v3863_v4 = vsel %vm9530_vm14, %v3858_v13, %v3862_v44  ;;  %v3860_v62 = vrot.slane %v3760_v3, 4  ;;  %v3867_v13 = vsel %vm9532_vm13, %v3862_v44, %v3866_v16  ;;  %vm9537_vm14 = vmmov %vm9531_vm8 }
 0x2b7   : > { %4819 = vmatprep.subr.bf16.mxu1 %v9415_v15  ;;  %v3864_v3 = vrot.slane %v3763_v61, 4  ;;  %vm9535_vm1 = vcmp.ne.s16.totalorder %v7186_v30, 0  ;;  %v3766_v61 = vsel %vm3376_vm3, %v8059_v31, %v3721_v14  ;;  %vm9538_vm13 = vcmp.ne.s16.totalorder %v7159_v52, 0 }
 0x2b8   : > { %v8416_v6 = vpop.permute.xlu1 %3726  ;;  %v8418_v56 = vpop.permute.xlu0 %3724  ;;  %v3861_v7 = vsel %vm9531_vm8, %v3856_v58, %v3860_v62  ;;  %v3539_v24 = vsel %vm9535_vm1, %v7975_v21, 0  ;;  %v3868_v40 = vrot.slane %v3766_v61, 4  ;;  %v3498_v10 = vsel %vm9538_vm13, %v8298_v5, 0 }
 0x2b9   : > { %v3865_v44 = vsel %vm9537_vm14, %v3860_v62, %v3864_v3  ;;  %v4999_v39 = vshrl.u32 %v3539_v24, 16  ;;  %v3874_v14 = vrot.slane %v8110_v57, 4  ;;  %v3499_v52 = vsel %vm9535_vm1, %v7957_v43, 0  ;;  %vm9540_vm14 = vmmov %vm9531_vm8 }
 0x2ba   : > { %4820 = vmatpush1.bf16.msra.mxu1 %v6400_v11 }
 0x2bb   : > { %6160 = vmatprep.subr.bf16.mxu1 %v9415_v15 }
 0x2bd   : > { %4113 = vmatmul.mubr.bf16.gmra.mrb[24].mxu1 %v3857_v1  ;;  %v3480_v1 = vld [vmem:[#allocation3] sm:$0xf8] }
 0x2be   : > { %5912 = vmatprep.mubr.msk.bf16.mxu1 %vm3376_vm3, %v3863_v4  ;;  %v3497_v54 = vsel %vm9534_vm7, %v3480_v1, 0  ;;  %v5002_v1 = vshll.u32 %v3539_v24, 16  ;;  %vm9539_vm7 = vcmp.ne.s16.totalorder %v7219_v25, 0 }
 0x2bf   : > { %v3540_v24 = vsel %vm9539_vm7, %v8007_v12, 0  ;;  %vm9541_vm13 = vmmov %vm9539_vm7  ;;  %vm9542_vm7 = vsmask.f32 4352 }
 0x2c0   : > { %v8425_v46 = vpop.permute.xlu1 %3730  ;;  %v8427_v11 = vpop.permute.xlu0 %3728  ;;  %v5019_v15 = vshll.u32 %v3540_v24, 16  ;;  %vm9543_vm1 = vmmov %vm9542_vm7 }
 0x2c4   : > { %v8430_v51 = vpop.permute.xlu1 %4264  ;;  %v8432_v38 = vpop.permute.xlu0 %3732 }
 0x2c5   : > { %4121 = vmatmul.mubr.bf16.gmra.mrb[28].mxu1 %v3861_v7 }
 0x2c6   : > { %5913 = vmatprep.mubr.msk.bf16.mxu1 %vm3376_vm3, %v3867_v13 }
 0x2c8   : > { %v8439_v4 = vpop.permute.xlu1 %4268  ;;  %v8441_v37 = vpop.permute.xlu0 %4266 }
 0x2c9   : > { %9533 = vst [vmem:[#allocation5_spill] sm:$0xff] %v8439_v4  ;;  %v3878_v4 = vrot.slane %v8108_v53, 4 }
 0x2cb   : > { %v3879_v25 = vsel %vm9545_vm11, %v3874_v14, %v3878_v4 }
 0x2cc   : > { %v3572_v58 = vpop.permute.xlu1 %3571  ;;  %v8449_v7 = vpop.permute.xlu0 %4270 }
 0x2cd   : > { %9536 = vst [vmem:[#allocation32_spill] sm:$0xff] %v8449_v7  ;;  %v3607_v13 = vsel %vm3376_vm3, %v3497_v54, %v3572_v58  ;;  %4129 = vmatmul.mubr.bf16.gmra.mrb[32].mxu1 %v3865_v44  ;;  %v5001_v58 = vrot.slane %v4999_v39, 3  ;;  %v5004_v44 = vrot.slane %v5002_v1, 4 }
 0x2ce   : > { %5914 = vmatprep.mubr.msk.bf16.mxu1 %vm3376_vm3, %v3871_v33  ;;  %v4958_v63 = vshrl.u32 %v3607_v13, 16  ;;  %v4961_v2 = vshll.u32 %v3607_v13, 16 }
 0x2cf   : > { %v5005_v1 = vor.u32 %v5004_v44, %v5001_v58  ;;  %v5021_v44 = vrot.slane %v5019_v15, 4 }
 0x2d0   : > { %v3574_v62 = vpop.permute.xlu0 %3573  ;;  %v4960_v16 = vrot.slane %v4958_v63, 3  ;;  %v4963_v19 = vrot.slane %v4961_v2, 4 }
 0x2d1   : > { %v3610_v50 = vsel %vm3376_vm3, %v3498_v10, %v3574_v62  ;;  %v3869_v10 = vsel %vm9540_vm14, %v3864_v3, %v3868_v40  ;;  %v3769_v62 = vsel %vm3376_vm3, %v8089_v60, %v3723_v47  ;;  %vm9544_vm14 = vcmp.ne.s16.totalorder %v9448_v45, 0 }
 0x2d2   : > { %v4965_v54 = vshrl.u32 %v3610_v50, 16  ;;  %v4968_v33 = vshll.u32 %v3610_v50, 16  ;;  %v3875_v50 = vsel %vm9531_vm8, %v3870_v55, %v3874_v14  ;;  %v4964_v30 = vor.u32 %v4963_v19, %v4960_v16  ;;  %vm9546_vm11 = vmmov %vm9544_vm14 }
 0x2d3   : > { %v3872_v48 = vrot.slane %v3769_v62, 4  ;;  %v5006_v19 = vsel %vm9543_vm1, %v7999_v42, %v5005_v1  ;;  %v3501_v14 = vsel %vm9546_vm11, %v7975_v21, 0  ;;  %v3775_v21 = vsel %vm3376_vm3, %v8110_v57, %v8416_v6 }
 0x2d4   : > { %v4967_v61 = vrot.slane %v4965_v54, 3  ;;  %v3576_v13 = vpop.permute.xlu0 %3575  ;;  %v4970_v39 = vrot.slane %v4968_v33, 4  ;;  %v5016_v54 = vshrl.u32 %v3540_v24, 16 }
 0x2d5   : > { %v3613_v63 = vsel %vm3376_vm3, %v3499_v52, %v3576_v13  ;;  %4137 = vmatmul.mubr.bf16.gmra.mrb[36].mxu1 %v3869_v10  ;;  %v3500_v52 = vsel %vm9541_vm13, %v7977_v23, 0  ;;  %v3873_v16 = vsel %vm9531_vm8, %v3868_v40, %v3872_v48  ;;  %v3772_v23 = vsel %vm3376_vm3, %v8087_v20, %v8418_v56  ;;  %vm9547_vm13 = vmmov %vm9543_vm1 }
 0x2d6   : > { %v4990_v2 = vshrl.u32 %v3613_v63, 16  ;;  %5915 = vmatprep.mubr.msk.bf16.mxu1 %vm3376_vm3, %v3875_v50  ;;  %v4971_v43 = vor.u32 %v4970_v39, %v4967_v61  ;;  %v4993_v7 = vshll.u32 %v3613_v63, 16  ;;  %v5018_v58 = vrot.slane %v5016_v54, 3 }
 0x2d7   : > { %v3876_v63 = vrot.slane %v3772_v23, 4  ;;  %v3882_v50 = vrot.slane %v8124_v9, 4 }
 0x2d8   : > { %v3578_v3 = vpop.permute.xlu0 %3577  ;;  %v4992_v47 = vrot.slane %v4990_v2, 3  ;;  %v4995_v33 = vrot.slane %v4993_v7, 4  ;;  %v4972_v55 = vsel %vm9542_vm7, %v4964_v30, %v4971_v43  ;;  %v3541_v7 = vsel %vm9544_vm14, %v8005_v59, 0  ;;  %vm9548_vm7 = vmmov %vm9543_vm1 }
 0x2d9   : > { %v3616_v13 = vsel %vm3376_vm3, %v3500_v52, %v3578_v3  ;;  %5414 = vmatmul.mubr.bf16.vlgmr.msra.gmra.mrb[32].mxu0 %v4972_v55  ;;  %v5022_v15 = vor.u32 %v5021_v44, %v5018_v58  ;;  %v5033_v42 = vshrl.u32 %v3541_v7, 16  ;;  %v5036_v62 = vshll.u32 %v3541_v7, 16  ;;  %vm9550_vm14 = vmmov %vm9531_vm8 }
 0x2da   : > { %5986 = vmatprep.mubr.msk.bf16.mxu0 %vm3376_vm3, %v5006_v19  ;;  %v4996_v24 = vor.u32 %v4995_v33, %v4992_v47  ;;  %v5007_v61 = vshrl.u32 %v3616_v13, 16  ;;  %v5010_v10 = vshll.u32 %v3616_v13, 16  ;;  %vm9549_vm1 = vcmp.ne.s16.totalorder %v9452_v41, 0 }
 0x2db   : > { %v5023_v54 = vsel %vm9548_vm7, %v5005_v1, %v5022_v15  ;;  %v5035_v30 = vrot.slane %v5033_v42, 3  ;;  %v5038_v3 = vrot.slane %v5036_v62, 4  ;;  %v3542_v47 = vsel %vm9549_vm1, %v8033_v26, 0  ;;  %vm9551_vm11 = vmmov %vm9549_vm1  ;;  %v6422_v42 = vld [vmem:[#allocation3 + $0x10] sm:$0xf0] }
 0x2dc   : > { %v3580_v39 = vpop.permute.xlu0 %3579  ;;  %v5009_v40 = vrot.slane %v5007_v61, 3  ;;  %v5012_v2 = vrot.slane %v5010_v10, 4  ;;  %v4997_v20 = vsel %vm9547_vm13, %v4971_v43, %v4996_v24  ;;  %v3877_v33 = vsel %vm9550_vm14, %v3872_v48, %v3876_v63  ;;  %v8510_v48 = vpop.permute.xlu1 %4272  ;;  %vm9552_vm13 = vmmov %vm9548_vm7 }
 0x2dd   : > { %4145 = vmatmul.mubr.bf16.gmra.mrb[40].mxu1 %v3873_v16  ;;  %v3619_v56 = vsel %vm3376_vm3, %v3501_v14, %v3580_v39  ;;  %v3883_v45 = vsel %vm9531_vm8, %v3878_v4, %v3882_v50  ;;  %v5039_v1 = vor.u32 %v5038_v3, %v5035_v30  ;;  %v5050_v13 = vshrl.u32 %v3542_v47, 16  ;;  %vm9554_vm14 = vmmov %vm9531_vm8 }
 0x2de   : > { %5916 = vmatprep.mubr.msk.bf16.mxu1 %vm3376_vm3, %v3879_v25  ;;  %v5013_v43 = vor.u32 %v5012_v2, %v5009_v40  ;;  %v5024_v52 = vshrl.u32 %v3619_v56, 16  ;;  %v5027_v55 = vshll.u32 %v3619_v56, 16  ;;  %v5053_v19 = vshll.u32 %v3542_v47, 16 }
 0x2df   : > { %v3880_v44 = vrot.slane %v3775_v21, 4  ;;  %v3886_v7 = vrot.slane %v8122_v32, 4  ;;  %v3502_v57 = vsel %vm9551_vm11, %v8007_v12, 0  ;;  %v5040_v23 = vsel %vm9548_vm7, %v5022_v15, %v5039_v1  ;;  %vm9555_vm11 = vmmov %vm9548_vm7 }
 0x2e0   : > { %v3582_v58 = vpop.permute.xlu0 %3581  ;;  %v5026_v4 = vrot.slane %v5024_v52, 3  ;;  %v5029_v16 = vrot.slane %v5027_v55, 4  ;;  %v5014_v6 = vsel %vm9552_vm13, %v4996_v24, %v5013_v43  ;;  %v5052_v61 = vrot.slane %v5050_v13, 3  ;;  %vm9556_vm13 = vmmov %vm9548_vm7  ;;  %v8548_v13 = vld [vmem:[#allocation3 + $0x18] sm:$0xff] }
 0x2e1   : > { %5422 = vmatmul.mubr.bf16.gmra.mrb[36].mxu0 %v4997_v20  ;;  %v3622_v25 = vsel %vm3376_vm3, %v3502_v57, %v3582_v58  ;;  %v5055_v10 = vrot.slane %v5053_v19, 4  ;;  %v3543_v32 = vsel %vm1243_vm10, %v8031_v22, 0  ;;  %vm9553_vm1 = vcmp.ne.s16.totalorder %v9482_v27, 0  ;;  %v8532_v20 = vpop.permute.xlu1 %4274  ;;  %vm9558_vm7 = vmmov %vm9531_vm8 }
 0x2e2   : > { %5987 = vmatprep.mubr.msk.bf16.mxu0 %vm3376_vm3, %v5023_v54  ;;  %v4230_v41 = vsel %vm9553_vm1, %v6422_v42, 0  ;;  %v3881_v12 = vsel %vm9554_vm14, %v3876_v63, %v3880_v44  ;;  %v3887_v24 = vsel %vm9531_vm8, %v3882_v50, %v3886_v7  ;;  %v8529_v15 = vsel %vm3376_vm3, %v8108_v53, %v8427_v11 }
 0x2e3   : > { %v5030_v62 = vor.u32 %v5029_v16, %v5026_v4  ;;  %v5041_v39 = vshrl.u32 %v3622_v25, 16  ;;  %v5044_v40 = vshll.u32 %v3622_v25, 16  ;;  %v5056_v22 = vor.u32 %v5055_v10, %v5052_v61  ;;  %v6424_v25 = vld [vmem:[#allocation3 + $0x10] sm:$0xff] }
 0x2e4   : > { %v5067_v2 = vshrl.u32 %v3543_v32, 16  ;;  %v5070_v14 = vshll.u32 %v3543_v32, 16  ;;  %v3584_v56 = vpop.permute.xlu0 %3583  ;;  %v4390_v63 = vshrl.u32 %v4230_v41, 16  ;;  %v3884_v50 = vrot.slane %v8529_v15, 4 }
 0x2e5   : > { %4153 = vmatmul.mubr.bf16.gmra.mrb[44].mxu1 %v3877_v33  ;;  %v3503_v53 = vsel %vm1243_vm10, %v8005_v59, 0  ;;  %v3890_v11 = vrot.slane %v8206_v18, 4  ;;  %v5043_v54 = vrot.slane %v5041_v39, 3  ;;  %v5046_v30 = vrot.slane %v5044_v40, 4  ;;  %vm9557_vm10 = vmmov %vm9531_vm8  ;;  %v8558_v19 = vpop.permute.xlu1 %4276 }
 0x2e6   : > { %5917 = vmatprep.mubr.msk.bf16.mxu1 %vm3376_vm3, %v3883_v45  ;;  %v5031_v3 = vsel %vm9555_vm11, %v5013_v43, %v5030_v62  ;;  %v3544_v47 = vsel %vm1244_vm4, %v8061_v28, 0  ;;  %v3625_v33 = vsel %vm3376_vm3, %v3503_v53, %v3584_v56  ;;  %v5057_v45 = vsel %vm9556_vm13, %v5039_v1, %v5056_v22  ;;  %vm9561_vm8 = vmmov %vm9555_vm11 }
 0x2e7   : > { %v5069_v21 = vrot.slane %v5067_v2, 3  ;;  %v5072_v52 = vrot.slane %v5070_v14, 4  ;;  %v4393_v55 = vshll.u32 %v4230_v41, 16  ;;  %v3891_v0 = vsel %vm9557_vm10, %v3886_v7, %v3890_v11  ;;  %vm9564_vm10 = vmmov %vm9561_vm8  ;;  %v8589_v14 = vld [vmem:[#allocation3 + $0x80] sm:$0xf] }
 0x2e8   : > { %v3885_v59 = vsel %vm9558_vm7, %v3880_v44, %v3884_v50  ;;  %v5084_v18 = vshrl.u32 %v3544_v47, 16  ;;  %v5087_v43 = vshll.u32 %v3544_v47, 16  ;;  %vm9559_vm1 = vcmp.ne.s16.totalorder %v9486_v35, 0 }
 0x2e9   : > { %5430 = vmatmul.mubr.bf16.gmra.mrb[40].mxu0 %v5014_v6  ;;  %v4231_v28 = vsel %vm9559_vm1, %v8548_v13, 0  ;;  %v8556_v1 = vsel %vm3376_vm3, %v8124_v9, %v8425_v46  ;;  %v8560_v58 = vor.u32 %v5046_v30, %v5043_v54  ;;  %v5058_v7 = vshrl.u32 %v3625_v33, 16  ;;  %v3586_v9 = vpop.permute.xlu0 %3585  ;;  %vm9563_vm13 = vmmov %vm9559_vm1  ;;  %v8591_v36 = vpop.permute.xlu1 %4278 }
 0x2ea   : > { %5988 = vmatprep.mubr.msk.bf16.mxu0 %vm3376_vm3, %v5040_v23  ;;  %v5061_v4 = vshll.u32 %v3625_v33, 16  ;;  %v8562_v44 = vrot.slane %v4390_v63, 4  ;;  %v5073_v16 = vor.u32 %v5072_v52, %v5069_v21  ;;  %v3894_v57 = vrot.slane %v8201_v17, 4  ;;  %vm9566_vm1 = vmmov %vm9558_vm7 }
 0x2eb   : > { %v8566_v6 = vrot.slane %v4393_v55, 5  ;;  %vm9560_vm14 = vcmp.ne.s16.totalorder %v9484_v49, 0  ;;  %v4398_v23 = vshrl.u32 %v4231_v28, 16  ;;  %v4401_v61 = vshll.u32 %v4231_v28, 16 }
 0x2ec   : > { %v8570_v46 = vsel %vm9560_vm14, %v6424_v25, 0  ;;  %v3888_v10 = vrot.slane %v8556_v1, 4  ;;  %v5086_v32 = vrot.slane %v5084_v18, 3  ;;  %v5089_v42 = vrot.slane %v5087_v43, 4 }
 0x2ed   : > { %4161 = vmatmul.mubr.bf16.gmra.mrb[48].mxu1 %v3881_v12  ;;  %v3545_v41 = vsel %vm1245_vm15, %v8059_v31, 0  ;;  %v5060_v12 = vrot.slane %v5058_v7, 3  ;;  %v5063_v17 = vrot.slane %v5061_v4, 4  ;;  %v5048_v15 = vsel %vm9561_vm8, %v5030_v62, %v8560_v58  ;;  %v3588_v33 = vpop.permute.xlu0 %3587  ;;  %v8625_v18 = vpop.permute.xlu1 %4280 }
 0x2ee   : > { %5918 = vmatprep.mubr.msk.bf16.mxu1 %vm3376_vm3, %v3887_v24  ;;  %v3504_v24 = vsel %vm1244_vm4, %v8033_v26, 0  ;;  %vm9562_vm11 = vcmp.ne.s16.totalorder %v9482_v27, 0  ;;  %v4195_v40 = vsel %vm9563_vm13, %v8298_v5, 0  ;;  %v5074_v31 = vsel %vm9564_vm10, %v5056_v22, %v5073_v16  ;;  %v8594_v27 = vld [vmem:[#allocation3 + $0x20] sm:$0xff]  ;;  %vm9565_vm4 = vmmov %vm9560_vm14 }
 0x2ef   : > { %v4194_v39 = vsel %vm9562_vm11, %v8292_v29, 0  ;;  %v3628_v2 = vsel %vm3376_vm3, %v3504_v24, %v3586_v9  ;;  %v4400_v26 = vrot.slane %v4398_v23, 4  ;;  %v4403_v62 = vrot.slane %v4401_v61, 5  ;;  %vm9568_vm14 = vmmov %vm9561_vm8  ;;  %v8635_v23 = vld [vmem:[#allocation3 + $0x28] sm:$0xff]  ;;  %v9569_v61 = vld [vmem:[#allocation7_spill] sm:$0xff] }
 0x2f0   : > { %v5101_v56 = vshrl.u32 %v3545_v41, 16  ;;  %v4232_v35 = vsel %vm9565_vm4, %v8594_v27, 0  ;;  %v3784_v29 = vsel %vm3376_vm3, %v8589_v14, %v8432_v38  ;;  %v3889_v5 = vsel %vm9558_vm7, %v3884_v50, %v3888_v10  ;;  %vm9571_vm11 = vmmov %vm9566_vm1 }
 0x2f1   : > { %5438 = vmatmul.mubr.bf16.gmra.mrb[44].mxu0 %v5031_v3  ;;  %v3895_v22 = vsel %vm9566_vm1, %v3890_v11, %v3894_v57  ;;  %v8606_v63 = vor.u32 %v5089_v42, %v5086_v32  ;;  %v4303_v53 = vsel %vm3376_vm3, %v4195_v40, %v8441_v37  ;;  %v8610_v54 = vor.u32 %v5063_v17, %v5060_v12  ;;  %v8612_v3 = vld [vmem:[#allocation3 + $0x40] sm:$0xff]  ;;  %vm9574_vm4 = vmmov %vm9564_vm10 }
 0x2f2   : > { %5989 = vmatprep.mubr.msk.bf16.mxu0 %vm3376_vm3, %v5057_v45  ;;  %v5075_v30 = vshrl.u32 %v3628_v2, 16  ;;  %v5078_v49 = vshll.u32 %v3628_v2, 16  ;;  %v3505_v38 = vsel %vm1245_vm15, %v8612_v3, 0  ;;  %v4396_v50 = vor.u32 %v8566_v6, %v8562_v44  ;;  %vm9567_vm15 = vmmov %vm9561_vm8  ;;  %v9572_v12 = vld [vmem:[#allocation5_spill] sm:$0xff] }
 0x2f3   : > { %v5104_v11 = vshll.u32 %v3545_v41, 16  ;;  %v4415_v47 = vshrl.u32 %v4232_v35, 16  ;;  %v4300_v37 = vsel %vm3376_vm3, %v4194_v39, %v8430_v51  ;;  %v4404_v45 = vor.u32 %v4403_v62, %v4400_v26  ;;  %v3590_v62 = vpop.permute.xlu0 %3589  ;;  %vm9581_vm1 = vmmov %vm9574_vm4 }
 0x2f4   : > { %v5103_v21 = vrot.slane %v5101_v56, 3  ;;  %v4418_v52 = vshll.u32 %v4232_v35, 16  ;;  %v3892_v55 = vrot.slane %v3784_v29, 4  ;;  %v5077_v43 = vrot.slane %v5075_v30, 3 }
 0x2f5   : > { %4169 = vmatmul.mubr.bf16.gmra.mrb[52].mxu1 %v3885_v59  ;;  %v4384_v59 = vshll.u32 %v4303_v53, 16  ;;  %v5080_v28 = vrot.slane %v5078_v49, 4  ;;  %v5065_v7 = vsel %vm9567_vm15, %v8560_v58, %v8610_v54  ;;  %v5091_v51 = vsel %vm9568_vm14, %v5073_v16, %v8606_v63  ;;  %vm9582_vm15 = vmmov %vm9581_vm1 }
 0x2f6   : > { %5919 = vmatprep.mubr.msk.bf16.mxu1 %vm3376_vm3, %v3891_v0  ;;  %v4381_v0 = vshrl.u32 %v4303_v53, 16  ;;  %v4374_v4 = vshrl.u32 %v4300_v37, 16  ;;  %v4377_v44 = vshll.u32 %v4300_v37, 16  ;;  %v3631_v57 = vsel %vm3376_vm3, %v3505_v38, %v3588_v33  ;;  %v8658_v53 = vld [vmem:[#allocation3 + $0x48] sm:$0xff] }
 0x2f7   : > { %v5106_v6 = vrot.slane %v5104_v11, 4  ;;  %v4405_v60 = vsel %vm1093_vm5, %v4396_v50, %v4404_v45  ;;  %v4417_v25 = vrot.slane %v4415_v47, 4  ;;  %v4420_v9 = vrot.slane %v4418_v52, 5 }
 0x2f8   : > { %vm9570_vm8 = vcmp.ne.s16.totalorder %v9569_v61, 0  ;;  %v4383_v32 = vrot.slane %v4381_v0, 4  ;;  %v4386_v16 = vrot.slane %v4384_v59, 5  ;;  %v3893_v42 = vsel %vm9571_vm11, %v3888_v10, %v3892_v55  ;;  %v8652_v10 = vpop.permute.xlu1 %4282  ;;  %v8672_v55 = vld [vmem:[#allocation3 + $0x60] sm:$0xff]  ;;  %vm9588_vm11 = vmmov %vm9581_vm1 }
 0x2f9   : > { %5446 = vmatmul.mubr.bf16.gmra.mrb[48].mxu0 %v5048_v15  ;;  %v4233_v58 = vsel %vm9570_vm8, %v8635_v23, 0  ;;  %v5118_v41 = vshrl.u32 %v3546_v8, 16  ;;  %v4306_v17 = vsel %vm3376_vm3, %v8570_v46, %v9572_v12  ;;  %v8646_v24 = vor.u32 %v5080_v28, %v5077_v43  ;;  %vm9573_vm13 = vmmov %vm9570_vm8  ;;  %v9576_v28 = vld [vmem:[#allocation8_spill] sm:$0xff] }
 0x2fa   : > { %5990 = vmatprep.mubr.msk.bf16.mxu0 %vm3376_vm3, %v5074_v31  ;;  %v5092_v15 = vshrl.u32 %v3631_v57, 16  ;;  %v5095_v39 = vshll.u32 %v3631_v57, 16  ;;  %v4376_v40 = vrot.slane %v4374_v4, 4  ;;  %v4379_v2 = vrot.slane %v4377_v44, 5  ;;  %vm9587_vm8 = vmmov %vm9581_vm1 }
 0x2fb   : > { %v5107_v31 = vor.u32 %v5106_v6, %v5103_v21  ;;  %v5121_v26 = vshll.u32 %v3546_v8, 16  ;;  %v4197_v1 = vsel %vm9573_vm13, %v8548_v13, 0  ;;  %v8654_v56 = vor.u32 %v4420_v9, %v4417_v25 }
 0x2fc   : > { %v4432_v46 = vshrl.u32 %v4233_v58, 16  ;;  %v4435_v35 = vshll.u32 %v4233_v58, 16  ;;  %v4406_v29 = vshrl.u32 %v4306_v17, 16  ;;  %v3506_v30 = vsel %vm1246_vm12, %v8658_v53, 0  ;;  %v8686_v4 = vpop.permute.xlu1 %4284 }
 0x2fd   : > { %4177 = vmatmul.mubr.bf16.gmra.mrb[56].mxu1 %v3889_v5  ;;  %v4409_v5 = vshll.u32 %v4306_v17, 16  ;;  %v5094_v49 = vrot.slane %v5092_v15, 3  ;;  %v5097_v38 = vrot.slane %v5095_v39, 4  ;;  %v5082_v13 = vsel %vm9564_vm10, %v8610_v54, %v8646_v24  ;;  %vm9593_vm10 = vmmov %vm9581_vm1 }
 0x2fe   : > { %5920 = vmatprep.mubr.msk.bf16.mxu1 %vm3376_vm3, %v3895_v22  ;;  %v8656_v22 = vor.u32 %v4386_v16, %v4383_v32  ;;  %v5120_v50 = vrot.slane %v5118_v41, 3  ;;  %v4380_v11 = vor.u32 %v4379_v2, %v4376_v40  ;;  %v3634_v47 = vsel %vm3376_vm3, %v3506_v30, %v3590_v62  ;;  %v3592_v32 = vpop.permute.xlu0 %3591 }
 0x2ff   : > { %v5108_v37 = vsel %vm9574_vm4, %v8606_v63, %v5107_v31  ;;  %v5123_v33 = vrot.slane %v5121_v26, 4  ;;  %v4422_v34 = vsel %vm1093_vm5, %v4404_v45, %v8654_v56  ;;  %v4434_v21 = vrot.slane %v4432_v46, 4  ;;  %v8679_v63 = vld [vmem:[#allocation3 + $0x30] sm:$0xff]  ;;  %v9578_v45 = vld [vmem:[#allocation32_spill] sm:$0xff]  ;;  %vm9594_vm4 = vmmov %vm9581_vm1 }
 0x300   : > { %v4437_v52 = vrot.slane %v4435_v35, 5  ;;  %v3547_v0 = vsel %vm1247_vm2, %v8672_v55, 0  ;;  %v4408_v59 = vrot.slane %v4406_v29, 4  ;;  %v4411_v8 = vrot.slane %v4409_v5, 5  ;;  %v8704_v26 = vld [vmem:[#allocation3 + $0x50] sm:$0xff]  ;;  %v8718_v30 = vpop.permute.xlu1 %4286 }
 0x301   : > { %5454 = vmatmul.mubr.bf16.gmra.mrb[52].mxu0 %v5065_v7  ;;  %v4388_v43 = vsel %vm1093_vm5, %v4380_v11, %v8656_v22  ;;  %vm9577_vm12 = vcmp.ne.s16.totalorder %v9576_v28, 0  ;;  %v8688_v44 = vor.u32 %v5097_v38, %v5094_v49  ;;  %v5109_v57 = vshrl.u32 %v3634_v47, 16  ;;  %v6433_v35 = vld [vmem:[%s9244_s4 + $0x8] sm:$0xff]   ;;  %v8725_v38 = vld [vmem:[#allocation3 + $0x68] sm:$0xff]  ;;  %v9584_v11 = vld [vmem:[#allocation9_spill] sm:$0xff] }
 0x302   : > { %5991 = vmatprep.mubr.msk.bf16.mxu0 %vm3376_vm3, %v5091_v51  ;;  %v4234_v7 = vsel %vm9577_vm12, %v8679_v63, 0  ;;  %v4309_v51 = vsel %vm3376_vm3, %v4197_v1, %v9578_v45  ;;  %v5112_v6 = vshll.u32 %v3634_v47, 16  ;;  %v8694_v25 = vor.u32 %v5123_v33, %v5120_v50  ;;  %vm9579_vm7 = vmmov %vm9577_vm12  ;;  %v8730_v50 = vld [vmem:[#allocation3 + $0x38] sm:$0xff] }
 0x303   : > { %v5135_v9 = vshrl.u32 %v3547_v0, 16  ;;  %v5138_v61 = vshll.u32 %v3547_v0, 16  ;;  %v4198_v58 = vsel %vm9579_vm7, %v8594_v27, 0  ;;  %v8699_v16 = vor.u32 %v4437_v52, %v4434_v21  ;;  %v6436_v28 = vld [vmem:[%s9244_s4 + $0x10] sm:$0xff]   ;;  %vm9598_vm12 = vmmov %vm9581_vm1 }
 0x304   : > { %v4449_v41 = vshrl.u32 %v4234_v7, 16  ;;  %v8702_v12 = vor.u32 %v4411_v8, %v4408_v59  ;;  %v4423_v17 = vshrl.u32 %v4309_v51, 16  ;;  %v4426_v15 = vshll.u32 %v4309_v51, 16  ;;  %vm9599_vm7 = vmmov %vm9581_vm1 }
 0x305   : > { %4185 = vmatmul.mubr.bf16.gmra.mrb[60].mxu1 %v3893_v42  ;;  %v9580_v42 = vmov 0   ;;  %v4452_v39 = vshll.u32 %v4234_v7, 16  ;;  %v5111_v40 = vrot.slane %v5109_v57, 3  ;;  %v5114_v2 = vrot.slane %v5112_v6, 4 }
 0x306   : > { %5957 = vmatprep.mubr.msk.bf16.mxu1 %vm3376_vm3, %v4405_v60  ;;  %v6431_v60 = vld [vmem:[%s9244_s4] sm:$0xff]   ;;  %v3507_v1 = vsel %vm1247_vm2, %v8704_v26, 0  ;;  %v5099_v27 = vsel %vm9581_vm1, %v8646_v24, %v8688_v44  ;;  %v5125_v46 = vsel %vm9582_vm15, %v5107_v31, %v8694_v25  ;;  %v5137_v29 = vrot.slane %v5135_v9, 3  ;;  %v8754_v9 = vpop.permute.xlu1 %4288 }
 0x307   : > { %v3637_v62 = vsel %vm3376_vm3, %v3507_v1, %v3592_v32  ;;  %v5140_v5 = vrot.slane %v5138_v61, 4  ;;  %v4439_v24 = vsel %vm1093_vm5, %v8654_v56, %v8699_v16  ;;  %v4451_v49 = vrot.slane %v4449_v41, 4  ;;  %v8756_v32 = vld [vmem:[#allocation3 + $0x58] sm:$0xff] }
 0x308   : > { %vm9585_vm2 = vcmp.ne.s16.totalorder %v9584_v11, 0  ;;  %v4428_v33 = vrot.slane %v4426_v15, 5  ;;  %v4413_v56 = vsel %vm1093_vm5, %v8656_v22, %v8702_v12  ;;  %v4312_v21 = vsel %vm3376_vm3, %v4198_v58, %v8510_v48  ;;  %v3594_v22 = vpop.permute.xlu0 %3593 }
 0x309   : > { %5462 = vmatmul.mubr.bf16.gmra.mrb[56].mxu0 %v5082_v13  ;;  %v3548_v13 = vsel %vm1248_vm9, %v8725_v38, 0  ;;  %v4235_v47 = vsel %vm9585_vm2, %v8730_v50, 0  ;;  %v8740_v52 = vor.u32 %v5114_v2, %v5111_v40  ;;  %v5126_v54 = vshrl.u32 %v3637_v62, 16  ;;  %vm9586_vm14 = vmmov %vm9585_vm2  ;;  %v6438_v2 = vld [vmem:[%s9244_s4 + $0x18] sm:$0xff]  }
 0x30a   : > { %5992 = vmatprep.mubr.msk.bf16.mxu0 %vm3376_vm3, %v5108_v37  ;;  %v4425_v37 = vrot.slane %v4423_v17, 4  ;;  %v5129_v0 = vshll.u32 %v3637_v62, 16  ;;  %v8743_v59 = vor.u32 %v5140_v5, %v5137_v29  ;;  %v5152_v8 = vshrl.u32 %v3548_v13, 16  ;;  %v8772_v62 = vld [vmem:[#allocation3 + $0x70] sm:$0xff]  ;;  %vm9605_vm2 = vmmov %vm9594_vm4 }
 0x30b   : > { %v4199_v48 = vsel %vm9586_vm14, %v8635_v23, 0  ;;  %v4466_v7 = vshrl.u32 %v4235_v47, 16  ;;  %v4469_v45 = vshll.u32 %v4235_v47, 16  ;;  %v4440_v57 = vshrl.u32 %v4312_v21, 16  ;;  %vm9606_vm14 = vmmov %vm9605_vm2 }
 0x30c   : > { %v8752_v51 = vor.u32 %v4428_v33, %v4425_v37  ;;  %v4443_v6 = vshll.u32 %v4312_v21, 16  ;;  %v5128_v61 = vrot.slane %v5126_v54, 3  ;;  %v5131_v58 = vrot.slane %v5129_v0, 4 }
 0x30d   : > { %4830 = vmatmul.mubr.bf16.vlgmr.msra.gmra.mrb[0].mxu1 %v4388_v43  ;;  %v5155_v43 = vshll.u32 %v3548_v13, 16  ;;  %v3508_v23 = vsel %vm1248_vm9, %v8756_v32, 0  ;;  %v5116_v41 = vsel %vm9587_vm8, %v8688_v44, %v8740_v52  ;;  %v5142_v15 = vsel %vm9588_vm11, %v8694_v25, %v8743_v59 }
 0x30e   : > { %6172 = vmatpush1.bf16.msra.mxu1 %v6431_v60  ;;  %5958 = vmatprep.mubr.msk.bf16.mxu1 %vm3376_vm3, %v4422_v34  ;;  %v4454_v34 = vrot.slane %v4452_v39, 5  ;;  %v3640_v17 = vsel %vm3376_vm3, %v3508_v23, %v3594_v22  ;;  %v5154_v39 = vrot.slane %v5152_v8, 3  ;;  %v4468_v1 = vrot.slane %v4466_v7, 4 }
 0x30f   : > { %6161 = vmatprep.subr.bf16.mxu1 %v9580_v42  ;;  %v5157_v40 = vrot.slane %v5155_v43, 4  ;;  %v4442_v29 = vrot.slane %v4440_v57, 4  ;;  %v4445_v5 = vrot.slane %v4443_v6, 5  ;;  %v4315_v31 = vsel %vm3376_vm3, %v4199_v48, %v8532_v20 }
 0x310   : > { %v4455_v60 = vor.u32 %v4454_v34, %v4451_v49  ;;  %v8788_v13 = vor.u32 %v5131_v58, %v5128_v61  ;;  %v5143_v11 = vshrl.u32 %v3640_v17, 16  ;;  %v5146_v47 = vshll.u32 %v3640_v17, 16  ;;  %v3596_v34 = vpop.permute.xlu0 %3595  ;;  %v8822_v17 = vld [vmem:[#allocation3 + $0x78] sm:$0xff] }
 0x311   : > { %5470 = vmatmul.mubr.bf16.gmra.mrb[60].mxu0 %v5099_v27  ;;  %v4471_v27 = vrot.slane %v4469_v45, 5  ;;  %v8791_v37 = vor.u32 %v5157_v40, %v5154_v39  ;;  %v8801_v0 = vor.u32 %v4445_v5, %v4442_v29  ;;  %v4457_v8 = vshrl.u32 %v4315_v31, 16 }
 0x312   : > { %6173 = vmatpush1.bf16.msra.mxu1 %v6433_v35  ;;  %5993 = vmatprep.mubr.msk.bf16.mxu0 %vm3376_vm3, %v5125_v46  ;;  %v3549_v46 = vsel %vm1249_vm0, %v8772_v62, 0  ;;  %v9590_v35 = vld [vmem:[#allocation10_spill] sm:$0xff]  ;;  %v4456_v49 = vsel %vm1093_vm5, %v8699_v16, %v4455_v60  ;;  %v8796_v16 = vpop.permute.xlu1 %4290  ;;  %v4460_v43 = vshll.u32 %v4315_v31, 16  ;;  %v5145_v48 = vrot.slane %v5143_v11, 3 }
 0x313   : > { %6162 = vmatprep.subr.bf16.mxu1 %v9580_v42  ;;  %vm9591_vm9 = vcmp.ne.s16.totalorder %v9590_v35, 0  ;;  %v5169_v33 = vshrl.u32 %v3549_v46, 16  ;;  %v8798_v20 = vor.u32 %v4471_v27, %v4468_v1  ;;  %v5148_v22 = vrot.slane %v5146_v47, 4  ;;  %v9596_v1 = vld [vmem:[#allocation11_spill] sm:$0xff] }
 0x314   : > { %v4236_v25 = vsel %vm9591_vm9, %v8612_v3, 0  ;;  %vm9592_vm13 = vmmov %vm9591_vm9  ;;  %v3509_v7 = vsel %vm1249_vm0, %v8672_v55, 0  ;;  %v5133_v45 = vsel %vm9593_vm10, %v8740_v52, %v8788_v13  ;;  %v5159_v6 = vsel %vm9594_vm4, %v8743_v59, %v8791_v37 }
 0x315   : > { %4838 = vmatmul.mubr.bf16.gmra.mrb[4].mxu1 %v4413_v56  ;;  %v5172_v56 = vshll.u32 %v3549_v46, 16  ;;  %v4483_v21 = vshrl.u32 %v4236_v25, 16  ;;  %v4486_v54 = vshll.u32 %v4236_v25, 16  ;;  %v3643_v57 = vsel %vm3376_vm3, %v3509_v7, %v3596_v34  ;;  %vm9614_vm10 = vmmov %vm9605_vm2 }
 0x316   : > { %5959 = vmatprep.mubr.msk.bf16.mxu1 %vm3376_vm3, %v4439_v24  ;;  %6174 = vmatpush1.bf16.msra.mxu1 %v6436_v28  ;;  %v4430_v24 = vsel %vm1093_vm5, %v8702_v12, %v8752_v51  ;;  %v6440_v12 = vld [vmem:[%s9244_s4 + $0x20] sm:$0xff]   ;;  %v4200_v28 = vsel %vm9592_vm13, %v8679_v63, 0  ;;  %v5171_v61 = vrot.slane %v5169_v33, 3  ;;  %v6441_v63 = vld [vmem:[%s9244_s4 + $0x28] sm:$0xff]   ;;  %v4473_v23 = vsel %vm1093_vm5, %v4455_v60, %v8798_v20  ;;  %v8838_v46 = vpop.permute.xlu1 %4292  ;;  %vm9612_vm13 = vmmov %vm9605_vm2 }
 0x317   : > { %6163 = vmatprep.subr.bf16.mxu1 %v9580_v42  ;;  %v5174_v58 = vrot.slane %v5172_v56, 4  ;;  %v4485_v52 = vrot.slane %v4483_v21, 4  ;;  %v3550_v59 = vsel %vm1250_vm6, %v8822_v17, 0  ;;  %v4459_v39 = vrot.slane %v4457_v8, 4 }
 0x318   : > { %v4462_v40 = vrot.slane %v4460_v43, 5  ;;  %vm9597_vm0 = vcmp.ne.s16.totalorder %v9596_v1, 0  ;;  %v4318_v27 = vsel %vm3376_vm3, %v4200_v28, %v8558_v19  ;;  %v8836_v44 = vor.u32 %v5148_v22, %v5145_v48  ;;  %v6444_v22 = vld [vmem:[%s9244_s4 + $0x38] sm:$0xff]  }
 0x319   : > { %5478 = vmatmul.mubr.bf16.gmra.mrb[64].mxu0 %v5116_v41  ;;  %v4488_v41 = vrot.slane %v4486_v54, 5  ;;  %v4237_v60 = vsel %vm9597_vm0, %v8658_v53, 0  ;;  %v5160_v35 = vshrl.u32 %v3643_v57, 16  ;;  %v5163_v25 = vshll.u32 %v3643_v57, 16  ;;  %v9601_v57 = vld [vmem:[#allocation12_spill] sm:$0xff] }
 0x31a   : > { %6175 = vmatpush1.bf16.msra.mxu1 %v6438_v2  ;;  %5994 = vmatprep.mubr.msk.bf16.mxu0 %vm3376_vm3, %v5142_v15  ;;  %v4447_v2 = vsel %vm1093_vm5, %v8752_v51, %v8801_v0  ;;  %v5175_v29 = vor.u32 %v5174_v58, %v5171_v61  ;;  %v5186_v5 = vshrl.u32 %v3550_v59, 16  ;;  %v6443_v51 = vld [vmem:[%s9244_s4 + $0x30] sm:$0xff]   ;;  %v4500_v19 = vshrl.u32 %v4237_v60, 16 }
 0x31b   : > { %6164 = vmatprep.subr.bf16.mxu1 %v9580_v42  ;;  %v8844_v31 = vor.u32 %v4488_v41, %v4485_v52  ;;  %v4463_v11 = vor.u32 %v4462_v40, %v4459_v39  ;;  %v4474_v47 = vshrl.u32 %v4318_v27, 16  ;;  %v4477_v33 = vshll.u32 %v4318_v27, 16 }
 0x31c   : > { %v4503_v56 = vshll.u32 %v4237_v60, 16  ;;  %v5165_v34 = vrot.slane %v5163_v25, 4  ;;  %v3510_v21 = vsel %vm1250_vm6, %v8725_v38, 0  ;;  %v5150_v54 = vsel %vm9598_vm12, %v8788_v13, %v8836_v44  ;;  %vm9600_vm6 = vmmov %vm9597_vm0 }
 0x31d   : > { %4846 = vmatmul.mubr.bf16.gmra.mrb[8].mxu1 %v4430_v24  ;;  %v5189_v24 = vshll.u32 %v3550_v59, 16  ;;  %v5176_v43 = vsel %vm9599_vm7, %v8791_v37, %v5175_v29  ;;  %v5188_v28 = vrot.slane %v5186_v5, 3  ;;  %v4201_v7 = vsel %vm9600_vm6, %v8730_v50, 0  ;;  %v6445_v59 = vld [vmem:[%s9244_s4 + $0x40] sm:$0xff]   ;;  %v9603_v5 = vld [vmem:[#allocation29_spill] sm:$0xff]  ;;  %vm9618_vm12 = vmmov %vm9605_vm2 }
 0x31e   : > { %5960 = vmatprep.mubr.msk.bf16.mxu1 %vm3376_vm3, %v4456_v49  ;;  %6176 = vmatpush1.bf16.msra.mxu1 %v6440_v12  ;;  %v3598_v49 = vpop.permute.xlu0 %3597  ;;  %v5162_v12 = vrot.slane %v5160_v35, 3  ;;  %v4490_v13 = vsel %vm1093_vm5, %v8798_v20, %v8844_v31  ;;  %v4502_v37 = vrot.slane %v4500_v19, 4  ;;  %vm9602_vm1 = vcmp.ne.s16.totalorder %v9601_v57, 0 }
 0x31f   : > { %6165 = vmatprep.subr.bf16.mxu1 %v9580_v42  ;;  %v3646_v8 = vsel %vm3376_vm3, %v3510_v21, %v3598_v49  ;;  %v5191_v48 = vrot.slane %v5189_v24, 4  ;;  %v4476_v61 = vrot.slane %v4474_v47, 4  ;;  %v4479_v58 = vrot.slane %v4477_v33, 5  ;;  %v6446_v47 = vld [vmem:[%s9244_s4 + $0x48] sm:$0xff]   ;;  %vm9607_vm8 = vmmov %vm9602_vm1 }
 0x320   : > { %v4464_v50 = vsel %vm1093_vm5, %v8801_v0, %v4463_v11  ;;  %v5166_v52 = vor.u32 %v5165_v34, %v5162_v12  ;;  %v5177_v41 = vshrl.u32 %v3646_v8, 16  ;;  %v5180_v15 = vshll.u32 %v3646_v8, 16 }
 0x321   : > { %5486 = vmatmul.mubr.bf16.gmra.mrb[68].mxu0 %v5133_v45  ;;  %v8862_v45 = vpop.permute.xlu1 %4294  ;;  %v5192_v20 = vor.u32 %v5191_v48, %v5188_v28  ;;  %v4480_v0 = vor.u32 %v4479_v58, %v4476_v61  ;;  %vm9604_vm15 = vcmp.ne.s16.totalorder %v9603_v5, 0  ;;  %v4202_v33 = vsel %vm9607_vm8, %v8612_v3, 0 }
 0x322   : > { %6177 = vmatpush1.bf16.msra.mxu1 %v6441_v63  ;;  %5995 = vmatprep.mubr.msk.bf16.mxu0 %vm3376_vm3, %v5159_v6  ;;  %v4238_v6 = vsel %vm9602_vm1, %v8704_v26, 0  ;;  %v4505_v63 = vrot.slane %v4503_v56, 5  ;;  %v3600_v39 = vpop.permute.xlu0 %3599  ;;  %v5179_v27 = vrot.slane %v5177_v41, 3  ;;  %v5182_v35 = vrot.slane %v5180_v15, 4  ;;  %v9613_v41 = vld [vmem:[#allocation21_spill] sm:$0xff]  ;;  %vm9623_vm1 = vmmov %vm9605_vm2 }
 0x323   : > { %6166 = vmatprep.subr.bf16.mxu1 %v9580_v42  ;;  %v4517_v40 = vshrl.u32 %v4238_v6, 16  ;;  %v3511_v24 = vsel %vm9604_vm15, %v8772_v62, 0  ;;  %v5193_v19 = vsel %vm9606_vm14, %v5175_v29, %v5192_v20  ;;  %v4324_v3 = vsel %vm3376_vm3, %v4202_v33, %v8625_v18 }
 0x324   : > { %v4506_v60 = vor.u32 %v4505_v63, %v4502_v37  ;;  %v3649_v49 = vsel %vm3376_vm3, %v3511_v24, %v3600_v39  ;;  %v4508_v37 = vshrl.u32 %v4324_v3, 16  ;;  %v4511_v57 = vshll.u32 %v4324_v3, 16 }
 0x325   : > { %4854 = vmatmul.mubr.bf16.gmra.mrb[12].mxu1 %v4447_v2  ;;  %v4520_v2 = vshll.u32 %v4238_v6, 16  ;;  %v8881_v25 = vpop.permute.xlu1 %4296  ;;  %v4519_v56 = vrot.slane %v4517_v40, 4  ;;  %v5194_v28 = vshrl.u32 %v3649_v49, 16  ;;  %v5197_v48 = vshll.u32 %v3649_v49, 16  ;;  %v9610_v6 = vld [vmem:[#allocation31_spill] sm:$0xff] }
 0x326   : > { %5961 = vmatprep.mubr.msk.bf16.mxu1 %vm3376_vm3, %v4473_v23  ;;  %6178 = vmatpush1.bf16.msra.mxu1 %v6443_v51  ;;  %v4321_v23 = vsel %vm3376_vm3, %v4201_v7, %v8591_v36  ;;  %v5167_v51 = vsel %vm9605_vm2, %v8836_v44, %v5166_v52  ;;  %v9608_v44 = vld [vmem:[#allocation13_spill] sm:$0xff]  ;;  %v4507_v8 = vsel %vm1093_vm5, %v8844_v31, %v4506_v60  ;;  %vm9611_vm9 = vcmp.ne.s16.totalorder %v9610_v6, 0 }
 0x327   : > { %6167 = vmatprep.subr.bf16.mxu1 %v9580_v42  ;;  %v4491_v1 = vshrl.u32 %v4321_v23, 16  ;;  %v4494_v36 = vshll.u32 %v4321_v23, 16  ;;  %v4522_v12 = vrot.slane %v4520_v2, 5  ;;  %vm9609_vm11 = vcmp.ne.s16.totalorder %v9608_v44, 0 }
 0x328   : > { %v4239_v34 = vsel %vm9609_vm11, %v8756_v32, 0  ;;  %v3512_v61 = vsel %vm9611_vm9, %v8822_v17, 0  ;;  %v5196_v58 = vrot.slane %v5194_v28, 3  ;;  %v5210_v15 = vsel %vm9614_vm10, %v5192_v20, %v9613_v41  ;;  %vm9615_vm4 = vmmov %vm9609_vm11  ;;  %v9625_v41 = vld [vmem:[#allocation16_spill] sm:$0xff] }
 0x329   : > { %5494 = vmatmul.mubr.bf16.gmra.mrb[72].mxu0 %v5150_v54  ;;  %v4493_v29 = vrot.slane %v4491_v1, 4  ;;  %v4496_v21 = vrot.slane %v4494_v36, 5  ;;  %v4481_v54 = vsel %vm1093_vm5, %v4463_v11, %v4480_v0  ;;  %v3602_v7 = vpop.permute.xlu1 %3601  ;;  %v4537_v11 = vshll.u32 %v4239_v34, 16 }
 0x32a   : > { %6179 = vmatpush1.bf16.msra.mxu1 %v6444_v22  ;;  %5996 = vmatprep.mubr.msk.bf16.mxu0 %vm3376_vm3, %v5176_v43  ;;  %v5183_v43 = vor.u32 %v5182_v35, %v5179_v27  ;;  %v6447_v22 = vld [vmem:[%s9244_s4 + $0x50] sm:$0xff]   ;;  %v4523_v18 = vor.u32 %v4522_v12, %v4519_v56  ;;  %v3652_v23 = vsel %vm3376_vm3, %v3512_v61, %v3602_v7  ;;  %v4510_v1 = vrot.slane %v4508_v37, 4 }
 0x32b   : > { %6168 = vmatprep.subr.bf16.mxu1 %v9580_v42  ;;  %v4497_v31 = vor.u32 %v4496_v21, %v4493_v29  ;;  %v4539_v40 = vrot.slane %v4537_v11, 5  ;;  %v4513_v36 = vrot.slane %v4511_v57, 5  ;;  %v5211_v5 = vshrl.u32 %v3652_v23, 16 }
 0x32c   : > { %v5184_v63 = vsel %vm9612_vm13, %v5166_v52, %v5183_v43  ;;  %v9616_v52 = vld [vmem:[#allocation14_spill] sm:$0xff]  ;;  %v4524_v27 = vsel %vm1093_vm5, %v4506_v60, %v4523_v18  ;;  %v5214_v24 = vshll.u32 %v3652_v23, 16  ;;  %vm9626_vm2 = vcmp.ne.s16.totalorder %v9625_v41, 0 }
 0x32d   : > { %4862 = vmatmul.mubr.bf16.gmra.mrb[16].mxu1 %v4464_v50  ;;  %v5199_v50 = vrot.slane %v5197_v48, 4  ;;  %vm9617_vm0 = vcmp.ne.s16.totalorder %v9616_v52, 0  ;;  %v4498_v20 = vsel %vm1093_vm5, %v4480_v0, %v4497_v31  ;;  %v4514_v49 = vor.u32 %v4513_v36, %v4510_v1  ;;  %v9620_v60 = vld [vmem:[#allocation22_spill] sm:$0xff]  ;;  %vm9627_vm14 = vmmov %vm9626_vm2 }
 0x32e   : > { %5962 = vmatprep.mubr.msk.bf16.mxu1 %vm3376_vm3, %v4490_v13  ;;  %6180 = vmatpush1.bf16.msra.mxu1 %v6445_v59  ;;  %v4534_v13 = vshrl.u32 %v4239_v34, 16  ;;  %v4203_v59 = vsel %vm9615_vm4, %v8658_v53, 0  ;;  %v4240_v2 = vsel %vm9617_vm0, %v8672_v55, 0  ;;  %v5213_v56 = vrot.slane %v5211_v5, 3  ;;  %vm9619_vm7 = vmmov %vm9617_vm0 }
 0x32f   : > { %6169 = vmatprep.subr.bf16.mxu1 %v9580_v42  ;;  %v4327_v35 = vsel %vm3376_vm3, %v4203_v59, %v8652_v10  ;;  %v5200_v53 = vor.u32 %v5199_v50, %v5196_v58  ;;  %v4554_v33 = vshll.u32 %v4240_v2, 16  ;;  %v5216_v12 = vrot.slane %v5214_v24, 4  ;;  %v9628_v24 = vld [vmem:[#allocation17_spill] sm:$0xff] }
 0x330   : > { %v4536_v39 = vrot.slane %v4534_v13, 4  ;;  %v4204_v10 = vsel %vm9619_vm7, %v8704_v26, 0  ;;  %v4515_v21 = vsel %vm1093_vm5, %v4497_v31, %v4514_v49  ;;  %v9621_v26 = vld [vmem:[#allocation15_spill] sm:$0xff]  ;;  %vm9629_vm8 = vcmp.ne.s16.totalorder %v9628_v24, 0 }
 0x331   : > { %5502 = vmatmul.mubr.bf16.gmra.mrb[76].mxu0 %v5167_v51  ;;  %v4551_v51 = vshrl.u32 %v4240_v2, 16  ;;  %v5201_v0 = vsel %vm9618_vm12, %v5183_v43, %v5200_v53  ;;  %v8942_v3 = vor.u32 %v5216_v12, %v5213_v56  ;;  %v4556_v28 = vrot.slane %v4554_v33, 5  ;;  %vm9630_vm11 = vmmov %vm9629_vm8 }
 0x332   : > { %6181 = vmatpush1.bf16.msra.mxu1 %v6446_v47  ;;  %5997 = vmatprep.mubr.msk.bf16.mxu0 %vm3376_vm3, %v5193_v19  ;;  %v4525_v19 = vshrl.u32 %v4327_v35, 16  ;;  %v4528_v47 = vshll.u32 %v4327_v35, 16  ;;  %v4540_v44 = vor.u32 %v4539_v40, %v4536_v39  ;;  %vm9622_vm6 = vcmp.ne.s16.totalorder %v9621_v26, 0  ;;  %vm9644_vm12 = vmmov %vm9623_vm1 }
 0x333   : > { %6170 = vmatprep.subr.bf16.mxu1 %v9580_v42  ;;  %v4241_v48 = vsel %vm9622_vm6, %v8725_v38, 0  ;;  %v5218_v11 = vsel %vm9623_vm1, %v5200_v53, %v8942_v3  ;;  %vm9624_vm15 = vmmov %vm9622_vm6  ;;  %v4243_v53 = vsel %vm9629_vm8, %v8822_v17, 0 }
 0x334   : > { %v4527_v34 = vrot.slane %v4525_v19, 4  ;;  %v4530_v29 = vrot.slane %v4528_v47, 5  ;;  %v4541_v43 = vsel %vm1093_vm5, %v4523_v18, %v4540_v44  ;;  %v4571_v37 = vshll.u32 %v4241_v48, 16 }
 0x335   : > { %4870 = vmatmul.mubr.bf16.gmra.mrb[20].mxu1 %v4481_v54  ;;  %v4553_v54 = vrot.slane %v4551_v51, 4  ;;  %v4205_v18 = vsel %vm9624_vm15, %v8756_v32, 0  ;;  %v4602_v47 = vshrl.u32 %v4243_v53, 16  ;;  %v4605_v33 = vshll.u32 %v4243_v53, 16  ;;  %v9640_v53 = vld [vmem:[#allocation4_spill] sm:$0xff] }
 0x336   : > { %5963 = vmatprep.mubr.msk.bf16.mxu1 %vm3376_vm3, %v4507_v8  ;;  %6182 = vmatpush1.bf16.msra.mxu1 %v6447_v22  ;;  %v4330_v8 = vsel %vm3376_vm3, %v4204_v10, %v8686_v4  ;;  %v4531_v22 = vor.u32 %v4530_v29, %v4527_v34  ;;  %v4568_v4 = vshrl.u32 %v4241_v48, 16  ;;  %v4333_v58 = vsel %vm3376_vm3, %v4205_v18, %v8718_v30  ;;  %v9635_v18 = vld [vmem:[#allocation24_spill] sm:$0xff] }
 0x337   : > { %6171 = vmatprep.subr.bf16.mxu1 %v9580_v42  ;;  %v6448_v42 = vld [vmem:[%s9244_s4 + $0x58] sm:$0xff]   ;;  %v4542_v7 = vshrl.u32 %v4330_v8, 16  ;;  %v4545_v13 = vshll.u32 %v4330_v8, 16  ;;  %v4557_v31 = vor.u32 %v4556_v28, %v4553_v54  ;;  %v4573_v23 = vrot.slane %v4571_v37, 5 }
 0x338   : > { %v4532_v61 = vsel %vm1093_vm5, %v4514_v49, %v4531_v22  ;;  %v4559_v59 = vshrl.u32 %v4333_v58, 16  ;;  %v4562_v39 = vshll.u32 %v4333_v58, 16  ;;  %v4206_v30 = vsel %vm9627_vm14, %v8672_v55, 0  ;;  %v9636_v58 = vld [vmem:[#allocation19_spill] sm:$0xff] }
 0x339   : > { %5510 = vmatmul.mubr.bf16.gmra.mrb[80].mxu0 %v5184_v63  ;;  %v4544_v57 = vrot.slane %v4542_v7, 4  ;;  %v4547_v6 = vrot.slane %v4545_v13, 5  ;;  %v4558_v50 = vsel %vm1093_vm5, %v4540_v44, %v4557_v31  ;;  %v4570_v63 = vrot.slane %v4568_v4, 4 }
 0x33a   : > { %6183 = vmatpush1.bf16.msra.mxu1 %v6448_v42  ;;  %5998 = vmatprep.mubr.msk.bf16.mxu0 %vm3376_vm3, %v5210_v15  ;;  %v4242_v15 = vsel %vm9626_vm2, %v8772_v62, 0  ;;  %v4561_v2 = vrot.slane %v4559_v59, 4  ;;  %v4564_v1 = vrot.slane %v4562_v39, 5  ;;  %v4607_v34 = vrot.slane %v4605_v33, 5 }
 0x33b   : > { %v4548_v42 = vor.u32 %v4547_v6, %v4544_v57  ;;  %v4574_v32 = vor.u32 %v4573_v23, %v4570_v63  ;;  %v4585_v40 = vshrl.u32 %v4242_v15, 16  ;;  %v4588_v52 = vshll.u32 %v4242_v15, 16  ;;  %v9633_v57 = vld [vmem:[#allocation20_spill] sm:$0xff]  ;;  %v4193_v15 = vld [vmem:[#allocation3 + $0x80] sm:$0x1f] }
 0x33c   : > { %v4565_v51 = vor.u32 %v4564_v1, %v4561_v2  ;;  %vm9634_vm13 = vcmp.ne.s16.totalorder %v9633_v57, 0  ;;  %vm9637_vm10 = vcmp.ne.s16.totalorder %v9636_v58, 0  ;;  %v9639_v1 = vld [vmem:[#allocation6_spill] sm:$0xff] }
 0x33d   : > { %4878 = vmatmul.mubr.bf16.gmra.mrb[24].mxu1 %v4498_v20  ;;  %v4549_v36 = vsel %vm1093_vm5, %v4531_v22, %v4548_v42  ;;  %v4336_v20 = vsel %vm3376_vm3, %v4206_v30, %v8754_v9  ;;  %v4587_v35 = vrot.slane %v4585_v40, 4  ;;  %v4590_v5 = vrot.slane %v4588_v52, 5  ;;  %vm9638_vm4 = vmmov %vm9637_vm10 }
 0x33e   : > { %5964 = vmatprep.mubr.msk.bf16.mxu1 %vm3376_vm3, %v4524_v27  ;;  %v4575_v27 = vsel %vm1093_vm5, %v4557_v31, %v4574_v32  ;;  %v4576_v49 = vshrl.u32 %v4336_v20, 16  ;;  %v4579_v19 = vshll.u32 %v4336_v20, 16  ;;  %v4207_v9 = vsel %vm9630_vm11, %v8725_v38, 0  ;;  %v9631_v38 = vld [vmem:[#allocation18_spill] sm:$0xff]  ;;  %v4229_v31 = vld [vmem:[#allocation3 + $0x90] sm:$0x1f] }
 0x33f   : > { %v4591_v55 = vor.u32 %v4590_v5, %v4587_v35  ;;  %v4339_v44 = vsel %vm3376_vm3, %v4207_v9, %v8796_v16  ;;  %vm9632_vm9 = vcmp.ne.s16.totalorder %v9631_v38, 0  ;;  %v9643_v9 = vld [vmem:[#allocation23_spill] sm:$0xff] }
 0x340   : > { %v4578_v56 = vrot.slane %v4576_v49, 4  ;;  %v4581_v12 = vrot.slane %v4579_v19, 5  ;;  %v4596_v54 = vshll.u32 %v4339_v44, 16  ;;  %v4208_v26 = vsel %vm9632_vm9, %v8772_v62, 0  ;;  %v3604_v49 = vpop.permute.xlu0 %3603  ;;  %v9641_v19 = vld [vmem:[#allocation30_spill] sm:$0xff] }
 0x341   : > { %5518 = vmatmul.mubr.bf16.gmra.mrb[84].mxu0 %v5201_v0  ;;  %v4566_v0 = vsel %vm1093_vm5, %v4548_v42, %v4565_v51  ;;  %v4592_v10 = vsel %vm1093_vm5, %v4574_v32, %v4591_v55  ;;  %v4342_v16 = vsel %vm3376_vm3, %v4208_v26, %v8838_v46  ;;  %v4209_v62 = vsel %vm9634_vm13, %v8822_v17, 0 }
 0x342   : > { %5999 = vmatprep.mubr.msk.bf16.mxu0 %vm3376_vm3, %v9620_v60  ;;  %v4604_v60 = vrot.slane %v4602_v47, 4  ;;  %v4582_v29 = vor.u32 %v4581_v12, %v4578_v56  ;;  %v4598_v28 = vrot.slane %v4596_v54, 5  ;;  %v4610_v13 = vshrl.u32 %v4342_v16, 16 }
 0x343   : > { %v4345_v46 = vsel %vm3376_vm3, %v4209_v62, %v8862_v45  ;;  %v4210_v45 = vsel %vm9638_vm4, %v4193_v15, 0  ;;  %vm9642_vm0 = vcmp.ne.s16.totalorder %v9641_v19, 0 }
 0x344   : > { %v4608_v8 = vor.u32 %v4607_v34, %v4604_v60  ;;  %v4583_v48 = vsel %vm1093_vm5, %v4565_v51, %v4582_v29  ;;  %v4612_v4 = vrot.slane %v4610_v13, 4  ;;  %v4627_v23 = vshrl.u32 %v4345_v46, 16 }
 0x345   : > { %4886 = vmatmul.mubr.bf16.gmra.mrb[28].mxu1 %v4515_v21  ;;  %v4593_v21 = vshrl.u32 %v4339_v44, 16  ;;  %v4630_v41 = vshll.u32 %v4345_v46, 16  ;;  %v4348_v40 = vsel %vm3376_vm3, %v4210_v45, %v8881_v25 }
 0x346   : > { %5965 = vmatprep.mubr.msk.bf16.mxu1 %vm3376_vm3, %v4541_v43  ;;  %v4609_v22 = vsel %vm1093_vm5, %v4591_v55, %v4608_v8  ;;  %v4629_v59 = vrot.slane %v4627_v23, 4  ;;  %v4647_v20 = vshll.u32 %v4348_v40, 16  ;;  %v3513_v55 = vsel %vm9642_vm0, %v8589_v14, 0  ;;  %v9039_v23 = vld [vmem:[%s9245_s5] ss:$0 sm:$0xff] }
 0x347   : > { %v4595_v43 = vrot.slane %v4593_v21, 4  ;;  %v4632_v39 = vrot.slane %v4630_v41, 5  ;;  %v3655_v47 = vsel %vm3376_vm3, %v3513_v55, %v3604_v49 }
 0x348   : > { %v4649_v5 = vrot.slane %v4647_v20, 5  ;;  %v5228_v33 = vshrl.u32 %v3655_v47, 16  ;;  %v5231_v56 = vshll.u32 %v3655_v47, 16 }
 0x349   : > { %5526 = vmatmul.mubr.bf16.gmra.mrb[88].mxu0 %v5218_v11  ;;  %v4599_v7 = vor.u32 %v4598_v28, %v4595_v43  ;;  %v4613_v11 = vshll.u32 %v4342_v16, 16  ;;  %v4633_v30 = vor.u32 %v4632_v39, %v4629_v59 }
 0x34a   : > { %v5233_v44 = vrot.slane %v5231_v56, 4 }
 0x34b   : > { %v4615_v37 = vrot.slane %v4613_v11, 5  ;;  %v4600_v6 = vsel %vm1093_vm5, %v4582_v29, %v4599_v7 }
 0x34d   : > { %4894 = vmatmul.mubr.bf16.gmra.mrb[32].mxu1 %v4532_v61  ;;  %v4626_v61 = vsel %vm1093_vm5, %v4608_v8, %v9635_v18  ;;  %v4616_v63 = vor.u32 %v4615_v37, %v4612_v4 }
 0x34e   : > { %5966 = vmatprep.mubr.msk.bf16.mxu1 %vm3376_vm3, %v4558_v50  ;;  %v4246_v50 = vsel %vm9637_vm10, %v4229_v31, 0 }
 0x34f   : > { %v4653_v42 = vshrl.u32 %v4246_v50, 16  ;;  %v4656_v17 = vshll.u32 %v4246_v50, 16  ;;  %v4617_v32 = vsel %vm1093_vm5, %v4599_v7, %v4616_v63  ;;  %v4634_v24 = vsel %vm1093_vm5, %v4616_v63, %v4633_v30 }
 0x351   : > { %v4655_v52 = vrot.slane %v4653_v42, 4  ;;  %v4658_v2 = vrot.slane %v4656_v17, 5  ;;  %v9044_v42 = vld [vmem:[%s9246_s6] ss:$0 sm:$0xff] }
 0x355   : > { %4902 = vmatmul.mubr.bf16.gmra.mrb[36].mxu1 %v4549_v36  ;;  %v4644_v36 = vshrl.u32 %v4348_v40, 16 }
 0x356   : > { %5967 = vmatprep.mubr.msk.bf16.mxu1 %vm3376_vm3, %v4575_v27  ;;  %v4659_v27 = vor.u32 %v4658_v2, %v4655_v52 }
 0x357   : > { %v4646_v35 = vrot.slane %v4644_v36, 4 }
 0x358   : > { %v4660_v51 = vsel %vm1093_vm5, %v9640_v53, %v4659_v27 }
 0x359   : > { %v4650_v25 = vor.u32 %v4649_v5, %v4646_v35 }
 0x35b   : > { %v4651_v12 = vsel %vm1093_vm5, %v4633_v30, %v4650_v25 }
 0x35d   : > { %4910 = vmatmul.mubr.bf16.gmra.mrb[40].mxu1 %v4566_v0  ;;  %v5230_v0 = vrot.slane %v5228_v33, 3 }
 0x35e   : > { %5968 = vmatprep.mubr.msk.bf16.mxu1 %vm3376_vm3, %v4592_v10 }
 0x35f   : > { %v5234_v10 = vor.u32 %v5233_v44, %v5230_v0 }
 0x361   : > { %v5235_v60 = vsel %vm9644_vm12, %v8942_v3, %v5234_v10 }
 0x365   : > { %4918 = vmatmul.mubr.bf16.gmra.mrb[44].mxu1 %v4583_v48 }
 0x366   : > { %5969 = vmatprep.mubr.msk.bf16.mxu1 %vm3376_vm3, %v4609_v22 }
 0x36d   : > { %4926 = vmatmul.mubr.bf16.gmra.mrb[48].mxu1 %v4600_v6 }
 0x36e   : > { %5970 = vmatprep.mubr.msk.bf16.mxu1 %vm3376_vm3, %v4626_v61 }
 0x375   : > { %4934 = vmatmul.mubr.bf16.gmra.mrb[52].mxu1 %v4617_v32 }
 0x376   : > { %5971 = vmatprep.mubr.msk.bf16.mxu1 %vm3376_vm3, %v9639_v1 }
 0x37d   : > { %4942 = vmatmul.mubr.bf16.gmra.mrb[56].mxu1 %v4634_v24 }
 0x37e   : > { %5972 = vmatprep.mubr.msk.bf16.mxu1 %vm3376_vm3, %v4660_v51 }
 0x385   : > { %4950 = vmatmul.mubr.bf16.gmra.mrb[60].mxu1 %v4651_v12 }
 0x386   : > { %6000 = vmatprep.mubr.msk.bf16.mxu1 %vm3376_vm3, %v9643_v9 }
 0x391   : > { %5534 = vmatmul.mubr.bf16.vlgmr.msra.gmra.mrb[60].mxu1 %v5235_v60 }
 0x3ac   : > { %v5415_v34 = vpop.f32.mrb[32].mxu0 }
 0x3ad   : > { %v5417_v29 = vpop.f32.mrb[33].mxu0 }
 0x3ae   : > { %v5418_v14 = vpop.f32.mrb[34].mxu0 }
 0x3af   : > { %v5420_v21 = vpop.f32.mrb[35].mxu0 }
 0x3b4   : > { %v5423_v54 = vpop.f32.mrb[36].mxu0 }
 0x3b5   : > { %v5425_v8 = vpop.f32.mrb[37].mxu0 }
 0x3b6   : > { %v5426_v43 = vpop.f32.mrb[38].mxu0 }
 0x3b7   : > { %v5428_v28 = vpop.f32.mrb[39].mxu0 }
 0x3bc   : > { %v5431_v38 = vpop.f32.mrb[40].mxu0 }
 0x3bd   : > { %v5433_v26 = vpop.f32.mrb[41].mxu0 }
 0x3be   : > { %v5434_v48 = vpop.f32.mrb[42].mxu0 }
 0x3bf   : > { %v5436_v16 = vpop.f32.mrb[43].mxu0 }
 0x3c4   : > { %v9020_v22 = vpop.f32.mrb[44].mxu0 }
 0x3c5   : > { %v5441_v7 = vpop.f32.mrb[45].mxu0 }
 0x3c6   : > { %v9022_v13 = vpop.f32.mrb[46].mxu0 }
 0x3c7   : > { %v5444_v11 = vpop.f32.mrb[47].mxu0 }
 0x3cc   : > { %v9024_v3 = vpop.f32.mrb[48].mxu0 }
 0x3cd   : > { %v5449_v31 = vpop.f32.mrb[49].mxu0 }
 0x3ce   : > { %v9026_v4 = vpop.f32.mrb[50].mxu0 }
 0x3cf   : > { %v5452_v37 = vpop.f32.mrb[51].mxu0 }
 0x3d4   : > { %v9028_v57 = vpop.f32.mrb[52].mxu0 }
 0x3d5   : > { %v5457_v62 = vpop.f32.mrb[53].mxu0 }
 0x3d6   : > { %v9030_v6 = vpop.f32.mrb[54].mxu0 }
 0x3d7   : > { %v5460_v46 = vpop.f32.mrb[55].mxu0 }
 0x3dc   : > { %v9032_v18 = vpop.f32.mrb[56].mxu0 }
 0x3dd   : > { %v5465_v61 = vpop.f32.mrb[57].mxu0 }
 0x3de   : > { %v9034_v58 = vpop.f32.mrb[58].mxu0 }
 0x3df   : > { %v5468_v50 = vpop.f32.mrb[59].mxu0 }
 0x3e0   : > { %v4831_v63 = vpop.f32.mrb[0].mxu1 }
 0x3e1   : > { %v6184_v41 = vadd.f32 %v5415_v34, %v4831_v63  ;;  %v4833_v15 = vpop.f32.mrb[1].mxu1 }
 0x3e2   : > { %v4834_v17 = vpop.f32.mrb[2].mxu1 }
 0x3e3   : > { %v5581_v59 = vmul.f32 %v6184_v41, %v9039_v23  ;;  %v6185_v39 = vadd.f32 %v5418_v14, %v4834_v17  ;;  %v4836_v45 = vpop.f32.mrb[3].mxu1 }
 0x3e4   : > { %v9049_v52 = vpop.f32.mrb[60].mxu0 }
 0x3e5   : > { %v5620_v32 = vadd.f32 %v9044_v42, %v5581_v59  ;;  %v5582_v40 = vmul.f32 %v6185_v39, %v9039_v23  ;;  %v5473_v2 = vpop.f32.mrb[61].mxu0 }
 0x3e6   : > { %v9059_v36 = vpop.f32.mrb[62].mxu0 }
 0x3e7   : > { %v5652_v1 = vmax.f32 %v5620_v32, 0.0  ;;  %v5621_v30 = vadd.f32 %v9044_v42, %v5582_v40  ;;  %v5476_v20 = vpop.f32.mrb[63].mxu0 }
 0x3e8   : > { %v4839_v27 = vpop.f32.mrb[4].mxu1 }
 0x3e9   : > { %5684 = vst.msk [vmem:[%s9056_s22] sm:$0xff] %vm3376_vm3, %v5652_v1  ;;  %v5653_v35 = vmax.f32 %v5621_v30, 0.0  ;;  %v6186_v5 = vadd.f32 %v5423_v54, %v4839_v27  ;;  %v4841_v24 = vpop.f32.mrb[5].mxu1 }
 0x3ea   : > { %v4842_v53 = vpop.f32.mrb[6].mxu1 }
 0x3eb   : > { %5685 = vst.msk [vmem:[%s9056_s22 + $0x8] sm:$0xff] %vm3376_vm3, %v5653_v35  ;;  %v5583_v51 = vmul.f32 %v6186_v5, %v9039_v23  ;;  %v6187_v49 = vadd.f32 %v5426_v43, %v4842_v53  ;;  %v4844_v25 = vpop.f32.mrb[7].mxu1 }
 0x3ec   : > { %v9068_v47 = vpop.f32.mrb[64].mxu0 }
 0x3ed   : > { %v5622_v19 = vadd.f32 %v9044_v42, %v5583_v51  ;;  %v5584_v55 = vmul.f32 %v6187_v49, %v9039_v23  ;;  %v5481_v33 = vpop.f32.mrb[65].mxu0 }
 0x3ee   : > { %v9071_v9 = vpop.f32.mrb[66].mxu0 }
 0x3ef   : > { %v5654_v56 = vmax.f32 %v5622_v19, 0.0  ;;  %v5623_v12 = vadd.f32 %v9044_v42, %v5584_v55  ;;  %v5484_v0 = vpop.f32.mrb[67].mxu0 }
 0x3f0   : > { %v4847_v44 = vpop.f32.mrb[8].mxu1 }
 0x3f1   : > { %5686 = vst.msk [vmem:[%s9056_s22 + $0x10] sm:$0xff] %vm3376_vm3, %v5654_v56  ;;  %v5655_v10 = vmax.f32 %v5623_v12, 0.0  ;;  %v6188_v60 = vadd.f32 %v5431_v38, %v4847_v44  ;;  %v4849_v34 = vpop.f32.mrb[9].mxu1 }
 0x3f2   : > { %v4850_v29 = vpop.f32.mrb[10].mxu1 }
 0x3f3   : > { %5687 = vst.msk [vmem:[%s9056_s22 + $0x18] sm:$0xff] %vm3376_vm3, %v5655_v10  ;;  %v5585_v14 = vmul.f32 %v6188_v60, %v9039_v23  ;;  %v6189_v21 = vadd.f32 %v5434_v48, %v4850_v29  ;;  %v4852_v54 = vpop.f32.mrb[11].mxu1 }
 0x3f4   : > { %v9080_v28 = vpop.f32.mrb[68].mxu0 }
 0x3f5   : > { %v5624_v8 = vadd.f32 %v9044_v42, %v5585_v14  ;;  %v5586_v43 = vmul.f32 %v6189_v21, %v9039_v23  ;;  %v5489_v26 = vpop.f32.mrb[69].mxu0 }
 0x3f6   : > { %v9083_v7 = vpop.f32.mrb[70].mxu0 }
 0x3f7   : > { %v5656_v16 = vmax.f32 %v5624_v8, 0.0  ;;  %v5625_v38 = vadd.f32 %v9044_v42, %v5586_v43  ;;  %v5492_v11 = vpop.f32.mrb[71].mxu0 }
 0x3f8   : > { %v4855_v31 = vpop.f32.mrb[12].mxu1 }
 0x3f9   : > { %5688 = vst.msk [vmem:[%s9056_s22 + $0x20] sm:$0xff] %vm3376_vm3, %v5656_v16  ;;  %v5657_v37 = vmax.f32 %v5625_v38, 0.0  ;;  %v6190_v48 = vadd.f32 %v9020_v22, %v4855_v31  ;;  %v4857_v62 = vpop.f32.mrb[13].mxu1 }
 0x3fa   : > { %v4858_v46 = vpop.f32.mrb[14].mxu1 }
 0x3fb   : > { %5689 = vst.msk [vmem:[%s9056_s22 + $0x28] sm:$0xff] %vm3376_vm3, %v5657_v37  ;;  %v5587_v61 = vmul.f32 %v6190_v48, %v9039_v23  ;;  %v6191_v50 = vadd.f32 %v9022_v13, %v4858_v46  ;;  %v4860_v63 = vpop.f32.mrb[15].mxu1 }
 0x3fc   : > { %v9094_v17 = vpop.f32.mrb[72].mxu0 }
 0x3fd   : > { %v5626_v41 = vadd.f32 %v9044_v42, %v5587_v61  ;;  %v5588_v15 = vmul.f32 %v6191_v50, %v9039_v23  ;;  %v5497_v59 = vpop.f32.mrb[73].mxu0 }
 0x3fe   : > { %v9097_v45 = vpop.f32.mrb[74].mxu0 }
 0x3ff   : > { %v5658_v39 = vmax.f32 %v5626_v41, 0.0  ;;  %v5627_v22 = vadd.f32 %v9044_v42, %v5588_v15  ;;  %v5500_v32 = vpop.f32.mrb[75].mxu0 }
 0x400   : > { %v4863_v40 = vpop.f32.mrb[16].mxu1 }
 0x401   : > { %5690 = vst.msk [vmem:[%s9056_s22 + $0x30] sm:$0xff] %vm3376_vm3, %v5658_v39  ;;  %v5659_v2 = vmax.f32 %v5627_v22, 0.0  ;;  %v6192_v13 = vadd.f32 %v9024_v3, %v4863_v40  ;;  %v4865_v1 = vpop.f32.mrb[17].mxu1 }
 0x402   : > { %v4866_v30 = vpop.f32.mrb[18].mxu1 }
 0x403   : > { %5691 = vst.msk [vmem:[%s9056_s22 + $0x38] sm:$0xff] %vm3376_vm3, %v5659_v2  ;;  %v5589_v20 = vmul.f32 %v6192_v13, %v9039_v23  ;;  %v6193_v27 = vadd.f32 %v9026_v4, %v4866_v30  ;;  %v4868_v35 = vpop.f32.mrb[19].mxu1 }
 0x404   : > { %v9108_v53 = vpop.f32.mrb[76].mxu0 }
 0x405   : > { %v5628_v5 = vadd.f32 %v9044_v42, %v5589_v20  ;;  %v5590_v24 = vmul.f32 %v6193_v27, %v9039_v23  ;;  %v5505_v51 = vpop.f32.mrb[77].mxu0 }
 0x406   : > { %v9111_v25 = vpop.f32.mrb[78].mxu0 }
 0x407   : > { %v5660_v49 = vmax.f32 %v5628_v5, 0.0  ;;  %v5629_v3 = vadd.f32 %v9044_v42, %v5590_v24  ;;  %v5508_v19 = vpop.f32.mrb[79].mxu0 }
 0x408   : > { %v4871_v55 = vpop.f32.mrb[20].mxu1 }
 0x409   : > { %5692 = vst.msk [vmem:[%s9056_s22 + $0x40] sm:$0xff] %vm3376_vm3, %v5660_v49  ;;  %v5661_v33 = vmax.f32 %v5629_v3, 0.0  ;;  %v6194_v4 = vadd.f32 %v9028_v57, %v4871_v55  ;;  %v4873_v56 = vpop.f32.mrb[21].mxu1 }
 0x40a   : > { %v4874_v12 = vpop.f32.mrb[22].mxu1 }
 0x40b   : > { %5693 = vst.msk [vmem:[%s9056_s22 + $0x48] sm:$0xff] %vm3376_vm3, %v5661_v33  ;;  %v5591_v0 = vmul.f32 %v6194_v4, %v9039_v23  ;;  %v6195_v44 = vadd.f32 %v9030_v6, %v4874_v12  ;;  %v4876_v10 = vpop.f32.mrb[23].mxu1 }
 0x40c   : > { %v9122_v29 = vpop.f32.mrb[80].mxu0 }
 0x40d   : > { %v5630_v60 = vadd.f32 %v9044_v42, %v5591_v0  ;;  %v5592_v34 = vmul.f32 %v6195_v44, %v9039_v23  ;;  %v5513_v14 = vpop.f32.mrb[81].mxu0 }
 0x40e   : > { %v9125_v54 = vpop.f32.mrb[82].mxu0 }
 0x40f   : > { %v5662_v21 = vmax.f32 %v5630_v60, 0.0  ;;  %v5631_v57 = vadd.f32 %v9044_v42, %v5592_v34  ;;  %v5516_v8 = vpop.f32.mrb[83].mxu0 }
 0x410   : > { %v4879_v43 = vpop.f32.mrb[24].mxu1 }
 0x411   : > { %5694 = vst.msk [vmem:[%s9056_s22 + $0x50] sm:$0xff] %vm3376_vm3, %v5662_v21  ;;  %v5663_v26 = vmax.f32 %v5631_v57, 0.0  ;;  %v6196_v6 = vadd.f32 %v9032_v18, %v4879_v43  ;;  %v4881_v16 = vpop.f32.mrb[25].mxu1 }
 0x412   : > { %v4882_v38 = vpop.f32.mrb[26].mxu1 }
 0x413   : > { %5695 = vst.msk [vmem:[%s9056_s22 + $0x58] sm:$0xff] %vm3376_vm3, %v5663_v26  ;;  %v5593_v11 = vmul.f32 %v6196_v6, %v9039_v23  ;;  %v6197_v31 = vadd.f32 %v9034_v58, %v4882_v38  ;;  %v4884_v37 = vpop.f32.mrb[27].mxu1 }
 0x414   : > { %v9136_v46 = vpop.f32.mrb[84].mxu0 }
 0x415   : > { %v5632_v48 = vadd.f32 %v9044_v42, %v5593_v11  ;;  %v5594_v62 = vmul.f32 %v6197_v31, %v9039_v23  ;;  %v5521_v61 = vpop.f32.mrb[85].mxu0 }
 0x416   : > { %v9139_v63 = vpop.f32.mrb[86].mxu0 }
 0x417   : > { %v5664_v50 = vmax.f32 %v5632_v48, 0.0  ;;  %v5633_v18 = vadd.f32 %v9044_v42, %v5594_v62  ;;  %v5524_v41 = vpop.f32.mrb[87].mxu0 }
 0x418   : > { %v4887_v15 = vpop.f32.mrb[28].mxu1 }
 0x419   : > { %5696 = vst.msk [vmem:[%s9056_s22 + $0x60] sm:$0xff] %vm3376_vm3, %v5664_v50  ;;  %v5665_v59 = vmax.f32 %v5633_v18, 0.0  ;;  %v6198_v58 = vadd.f32 %v9049_v52, %v4887_v15  ;;  %v4889_v39 = vpop.f32.mrb[29].mxu1 }
 0x41a   : > { %v4890_v22 = vpop.f32.mrb[30].mxu1 }
 0x41b   : > { %5697 = vst.msk [vmem:[%s9056_s22 + $0x68] sm:$0xff] %vm3376_vm3, %v5665_v59  ;;  %v5595_v32 = vmul.f32 %v6198_v58, %v9039_v23  ;;  %v6199_v40 = vadd.f32 %v9059_v36, %v4890_v22  ;;  %v4892_v2 = vpop.f32.mrb[31].mxu1 }
 0x41c   : > { %v9150_v30 = vpop.f32.mrb[88].mxu0 }
 0x41d   : > { %v5634_v13 = vadd.f32 %v9044_v42, %v5595_v32  ;;  %v5596_v1 = vmul.f32 %v6199_v40, %v9039_v23  ;;  %v5529_v20 = vpop.f32.mrb[89].mxu0 }
 0x41e   : > { %v9153_v35 = vpop.f32.mrb[90].mxu0 }
 0x41f   : > { %v5666_v27 = vmax.f32 %v5634_v13, 0.0  ;;  %v5635_v52 = vadd.f32 %v9044_v42, %v5596_v1  ;;  %v5532_v5 = vpop.f32.mrb[91].mxu0 }
 0x420   : > { %v4895_v24 = vpop.f32.mrb[32].mxu1 }
 0x421   : > { %5698 = vst.msk [vmem:[%s9056_s22 + $0x70] sm:$0xff] %vm3376_vm3, %v5666_v27  ;;  %v5667_v36 = vmax.f32 %v5635_v52, 0.0  ;;  %v6200_v51 = vadd.f32 %v9068_v47, %v4895_v24  ;;  %v4897_v49 = vpop.f32.mrb[33].mxu1 }
 0x422   : > { %v4898_v3 = vpop.f32.mrb[34].mxu1 }
 0x423   : > { %5699 = vst.msk [vmem:[%s9056_s22 + $0x78] sm:$0xff] %vm3376_vm3, %v5667_v36  ;;  %v5597_v19 = vmul.f32 %v6200_v51, %v9039_v23  ;;  %v6201_v55 = vadd.f32 %v9071_v9, %v4898_v3  ;;  %v4900_v33 = vpop.f32.mrb[35].mxu1 }
 0x425   : > { %v5636_v4 = vadd.f32 %v9044_v42, %v5597_v19  ;;  %v5598_v56 = vmul.f32 %v6201_v55, %v9039_v23 }
 0x427   : > { %v5668_v12 = vmax.f32 %v5636_v4, 0.0  ;;  %v5637_v0 = vadd.f32 %v9044_v42, %v5598_v56 }
 0x428   : > { %v4903_v44 = vpop.f32.mrb[36].mxu1 }
 0x429   : > { %5700 = vst.msk [vmem:[%s9056_s22 + $0x80] sm:$0xff] %vm3376_vm3, %v5668_v12  ;;  %v5669_v47 = vmax.f32 %v5637_v0, 0.0  ;;  %v6202_v10 = vadd.f32 %v9080_v28, %v4903_v44  ;;  %v4905_v60 = vpop.f32.mrb[37].mxu1 }
 0x42a   : > { %v4906_v34 = vpop.f32.mrb[38].mxu1 }
 0x42b   : > { %5701 = vst.msk [vmem:[%s9056_s22 + $0x88] sm:$0xff] %vm3376_vm3, %v5669_v47  ;;  %v5599_v9 = vmul.f32 %v6202_v10, %v9039_v23  ;;  %v6203_v14 = vadd.f32 %v9083_v7, %v4906_v34  ;;  %v4908_v21 = vpop.f32.mrb[39].mxu1 }
 0x42d   : > { %v5638_v57 = vadd.f32 %v9044_v42, %v5599_v9  ;;  %v5600_v8 = vmul.f32 %v6203_v14, %v9039_v23 }
 0x42f   : > { %v5670_v43 = vmax.f32 %v5638_v57, 0.0  ;;  %v5639_v26 = vadd.f32 %v9044_v42, %v5600_v8 }
 0x430   : > { %v4911_v6 = vpop.f32.mrb[40].mxu1 }
 0x431   : > { %5702 = vst.msk [vmem:[%s9056_s22 + $0x90] sm:$0xff] %vm3376_vm3, %v5670_v43  ;;  %v5671_v28 = vmax.f32 %v5639_v26, 0.0  ;;  %v6204_v16 = vadd.f32 %v9094_v17, %v4911_v6  ;;  %v4913_v38 = vpop.f32.mrb[41].mxu1 }
 0x432   : > { %v4914_v11 = vpop.f32.mrb[42].mxu1 }
 0x433   : > { %5703 = vst.msk [vmem:[%s9056_s22 + $0x98] sm:$0xff] %vm3376_vm3, %v5671_v28  ;;  %v5601_v7 = vmul.f32 %v6204_v16, %v9039_v23  ;;  %v6205_v31 = vadd.f32 %v9097_v45, %v4914_v11  ;;  %v4916_v37 = vpop.f32.mrb[43].mxu1 }
 0x435   : > { %v5640_v48 = vadd.f32 %v9044_v42, %v5601_v7  ;;  %v5602_v62 = vmul.f32 %v6205_v31, %v9039_v23 }
 0x437   : > { %v5672_v61 = vmax.f32 %v5640_v48, 0.0  ;;  %v5641_v50 = vadd.f32 %v9044_v42, %v5602_v62 }
 0x438   : > { %v4919_v18 = vpop.f32.mrb[44].mxu1 }
 0x439   : > { %5704 = vst.msk [vmem:[%s9056_s22 + $0xa0] sm:$0xff] %vm3376_vm3, %v5672_v61  ;;  %v5673_v17 = vmax.f32 %v5641_v50, 0.0  ;;  %v6206_v41 = vadd.f32 %v9108_v53, %v4919_v18  ;;  %v4921_v15 = vpop.f32.mrb[45].mxu1 }
 0x43a   : > { %v4922_v59 = vpop.f32.mrb[46].mxu1 }
 0x43b   : > { %5705 = vst.msk [vmem:[%s9056_s22 + $0xa8] sm:$0xff] %vm3376_vm3, %v5673_v17  ;;  %v5603_v45 = vmul.f32 %v6206_v41, %v9039_v23  ;;  %v6207_v58 = vadd.f32 %v9111_v25, %v4922_v59  ;;  %v4924_v39 = vpop.f32.mrb[47].mxu1 }
 0x43d   : > { %v5642_v22 = vadd.f32 %v9044_v42, %v5603_v45  ;;  %v5604_v32 = vmul.f32 %v6207_v58, %v9039_v23 }
 0x43f   : > { %v5674_v40 = vmax.f32 %v5642_v22, 0.0  ;;  %v5643_v2 = vadd.f32 %v9044_v42, %v5604_v32 }
 0x440   : > { %v4927_v13 = vpop.f32.mrb[48].mxu1 }
 0x441   : > { %5706 = vst.msk [vmem:[%s9056_s22 + $0xb0] sm:$0xff] %vm3376_vm3, %v5674_v40  ;;  %v5675_v53 = vmax.f32 %v5643_v2, 0.0  ;;  %v6208_v1 = vadd.f32 %v9122_v29, %v4927_v13  ;;  %v4929_v20 = vpop.f32.mrb[49].mxu1 }
 0x442   : > { %v4930_v27 = vpop.f32.mrb[50].mxu1 }
 0x443   : > { %5707 = vst.msk [vmem:[%s9056_s22 + $0xb8] sm:$0xff] %vm3376_vm3, %v5675_v53  ;;  %v5605_v25 = vmul.f32 %v6208_v1, %v9039_v23  ;;  %v6209_v52 = vadd.f32 %v9125_v54, %v4930_v27  ;;  %v4932_v5 = vpop.f32.mrb[51].mxu1 }
 0x445   : > { %v5644_v24 = vadd.f32 %v9044_v42, %v5605_v25  ;;  %v5606_v36 = vmul.f32 %v6209_v52, %v9039_v23 }
 0x447   : > { %v5676_v51 = vmax.f32 %v5644_v24, 0.0  ;;  %v5645_v49 = vadd.f32 %v9044_v42, %v5606_v36 }
 0x448   : > { %v4935_v3 = vpop.f32.mrb[52].mxu1 }
 0x449   : > { %5708 = vst.msk [vmem:[%s9056_s22 + $0xc0] sm:$0xff] %vm3376_vm3, %v5676_v51  ;;  %v5677_v29 = vmax.f32 %v5645_v49, 0.0  ;;  %v6210_v19 = vadd.f32 %v9136_v46, %v4935_v3  ;;  %v4937_v55 = vpop.f32.mrb[53].mxu1 }
 0x44a   : > { %v4938_v33 = vpop.f32.mrb[54].mxu1 }
 0x44b   : > { %5709 = vst.msk [vmem:[%s9056_s22 + $0xc8] sm:$0xff] %vm3376_vm3, %v5677_v29  ;;  %v5607_v54 = vmul.f32 %v6210_v19, %v9039_v23  ;;  %v6211_v4 = vadd.f32 %v9139_v63, %v4938_v33  ;;  %v4940_v56 = vpop.f32.mrb[55].mxu1 }
 0x44d   : > { %v5646_v12 = vadd.f32 %v9044_v42, %v5607_v54  ;;  %v5608_v0 = vmul.f32 %v6211_v4, %v9039_v23 }
 0x44f   : > { %v5678_v44 = vmax.f32 %v5646_v12, 0.0  ;;  %v5647_v47 = vadd.f32 %v9044_v42, %v5608_v0 }
 0x450   : > { %v4943_v10 = vpop.f32.mrb[56].mxu1 }
 0x451   : > { %5710 = vst.msk [vmem:[%s9056_s22 + $0xd0] sm:$0xff] %vm3376_vm3, %v5678_v44  ;;  %v5679_v46 = vmax.f32 %v5647_v47, 0.0  ;;  %v6212_v60 = vadd.f32 %v9150_v30, %v4943_v10  ;;  %v4945_v34 = vpop.f32.mrb[57].mxu1 }
 0x452   : > { %v4946_v9 = vpop.f32.mrb[58].mxu1 }
 0x453   : > { %5711 = vst.msk [vmem:[%s9056_s22 + $0xd8] sm:$0xff] %vm3376_vm3, %v5679_v46  ;;  %v5609_v63 = vmul.f32 %v6212_v60, %v9039_v23  ;;  %v6213_v14 = vadd.f32 %v9153_v35, %v4946_v9  ;;  %v4948_v21 = vpop.f32.mrb[59].mxu1 }
 0x455   : > { %v5648_v57 = vadd.f32 %v9044_v42, %v5609_v63  ;;  %v5610_v8 = vmul.f32 %v6213_v14, %v9039_v23 }
 0x457   : > { %v5680_v43 = vmax.f32 %v5648_v57, 0.0  ;;  %v5649_v26 = vadd.f32 %v9044_v42, %v5610_v8 }
 0x459   : > { %5712 = vst.msk [vmem:[%s9056_s22 + $0xe0] sm:$0xff] %vm3376_vm3, %v5680_v43  ;;  %v5681_v30 = vmax.f32 %v5649_v26, 0.0 }
 0x45b   : > { %5713 = vst.msk [vmem:[%s9056_s22 + $0xe8] sm:$0xff] %vm3376_vm3, %v5681_v30 }
 0x464   : > { %v5535_v6 = vpop.f32.mrb[60].mxu1 }
 0x465   : > { %v5611_v28 = vmul.f32 %v9039_v23, %v5535_v6  ;;  %v5537_v16 = vpop.f32.mrb[61].mxu1 }
 0x466   : > { %v5538_v35 = vpop.f32.mrb[62].mxu1 }
 0x467   : > { %v5650_v38 = vadd.f32 %v9044_v42, %v5611_v28  ;;  %v5612_v11 = vmul.f32 %v9039_v23, %v5538_v35  ;;  %v5540_v7 = vpop.f32.mrb[63].mxu1 }
 0x469   : > { %v5682_v31 = vmax.f32 %v5650_v38, 0.0  ;;  %v5651_v37 = vadd.f32 %v9044_v42, %v5612_v11 }
 0x46b   : > { %5714 = vst.msk [vmem:[%s9056_s22 + $0xf0] sm:$0xff] %vm3376_vm3, %v5682_v31  ;;  %v5683_v48 = vmax.f32 %v5651_v37, 0.0 }
 0x46d   : > { %5715 = vst.msk [vmem:[%s9056_s22 + $0xf8] sm:$0xff] %vm3376_vm3, %v5683_v48 }
 0x46e PF: > { %s17_s24 = sadd.s32 1, %s6455_s24  }
 0x46f   : > { %p14_p4 = scmp.ge.s32.totalorder %s17_s24, 4  }
 0x471   :  { %16 = sbr.rel (!%p14_p4) target bundleno = 1 (0x1), region = 82 }

</bundles_post_ra>
